<compile_context>
chip_gen: v6e
topology: v6e:2x2x1
jax: 0.10.0
libtpu: 0.0.40
codegen_flags: <defaults>
</compile_context>

<pallas_src>
import math

import jax
import jax.numpy as jnp
from jax.experimental import pallas as pl
from jax.experimental.pallas import tpu as pltpu

# ---------------- small configuration ----------------
B = 2          # batch size
C = 2          # num_choices
S = 8          # sequence length
D = 32         # d_model
H = 4          # attention heads
DH = D // H    # head dim
F = 64         # FFN inner dim
V = 64         # vocab size
L = 2          # number of transformer layers
BF = B * C     # flattened batch (batch * num_choices)
R = BF * S     # total token rows
LANES = 128    # slab / output lane width (lane-dense DMAs)


# ---------------- packed weight-slab layout ----------------
def _build_slab_layout():
    """Row layout of the single packed weight slab (row offsets 8-aligned)."""
    layout = {}
    row = 0

    def add(name, shape):
        nonlocal row
        layout[name] = (row, shape)
        row += ((shape[0] + 7) // 8) * 8   # keep every entry on a sublane-tile boundary

    for l in range(L):
        add(f"wq{l}", (D, D)); add(f"bq{l}", (1, D))
        add(f"wk{l}", (D, D)); add(f"bk{l}", (1, D))
        add(f"wv{l}", (D, D)); add(f"bv{l}", (1, D))
        add(f"wo{l}", (D, D)); add(f"bo{l}", (1, D))
        add(f"g1{l}", (1, D)); add(f"b1{l}", (1, D))
        add(f"wff1{l}", (D, F)); add(f"bff1{l}", (1, F))
        add(f"wff2{l}", (F, D)); add(f"bff2{l}", (1, D))
        add(f"g2{l}", (1, D)); add(f"b2{l}", (1, D))
    add("w_sum", (D, D)); add("b_sum", (1, D))
    add("w_clsT", (1, D)); add("b_cls", (1, 1))
    return layout, row


_SLAB_LAYOUT, _SLAB_ROWS = _build_slab_layout()


def _layer_norm(x, gamma, beta, eps=1e-12):
    # Two independent reductions (E[x], E[x^2]) -> var = E[x^2] - E[x]^2.
    m1 = jnp.mean(x, axis=-1, keepdims=True)
    m2 = jnp.mean(x * x, axis=-1, keepdims=True)
    var = m2 - m1 * m1
    return (x - m1) * jax.lax.rsqrt(var + eps) * gamma + beta


# ---------------- fused kernel ----------------
def fused_forward_kernel(labels_ref,   # SMEM (B,) int32
                         x_ref,        # VMEM (R, D) f32   token embeddings
                         slab_ref,     # VMEM (_SLAB_ROWS, 128) f32  all weights
                         out_ref,      # VMEM (8, 128) f32 padded outputs
                         xres_ref):    # VMEM (R, D) f32 scratch (final residual)
    def w(name):
        r0, (nr, nc) = _SLAB_LAYOUT[name]
        return slab_ref[pl.ds(r0, nr), pl.ds(0, nc)]

    def split_heads(t):   # (R, D) -> (H*BF, S, DH), head-major batch dim
        parts = [t[:, h * DH:(h + 1) * DH] for h in range(H)]
        return jnp.concatenate(parts, axis=0).reshape(H * BF, S, DH)

    x = x_ref[...]                                          # residual stream (R, D)

    for l in range(L):                                      # static unroll over layers
        # ---- multi-head self-attention (projections as single 2-D matmuls) ----
        q = jnp.dot(x, w(f"wq{l}"), preferred_element_type=jnp.float32) + w(f"bq{l}")
        k = jnp.dot(x, w(f"wk{l}"), preferred_element_type=jnp.float32) + w(f"bk{l}")
        v = jnp.dot(x, w(f"wv{l}"), preferred_element_type=jnp.float32) + w(f"bv{l}")
        qh, kh, vh = split_heads(q), split_heads(k), split_heads(v)

        # 1/sqrt(DH) is folded into wq/bq in pack_params().
        sc = jnp.einsum('bqd,bkd->bqk', qh, kh, preferred_element_type=jnp.float32)
        sc = sc - jnp.max(sc, axis=-1, keepdims=True)
        e = jnp.exp(sc)
        p = e * pl.reciprocal(jnp.sum(e, axis=-1, keepdims=True), approx=True)
        ctx = jnp.einsum('bqk,bkd->bqd', p, vh, preferred_element_type=jnp.float32)

        # merge heads back to (R, D) and apply the output projection once (K=D=32)
        ctx = ctx.reshape(H, R, DH)
        ctx2 = jnp.concatenate([ctx[h] for h in range(H)], axis=-1)      # (R, D)
        attn = jnp.dot(ctx2, w(f"wo{l}"),
                       preferred_element_type=jnp.float32) + w(f"bo{l}")
        h1 = _layer_norm(x + attn, w(f"g1{l}"), w(f"b1{l}"))

        # ---- position-wise FFN ----
        f = jnp.dot(h1, w(f"wff1{l}"), preferred_element_type=jnp.float32) + w(f"bff1{l}")
        f = jax.nn.gelu(f, approximate=True)   # TODO(synk): HF XLNet uses exact erf GELU.
        f = jnp.dot(f, w(f"wff2{l}"), preferred_element_type=jnp.float32) + w(f"bff2{l}")
        x = _layer_norm(h1 + f, w(f"g2{l}"), w(f"b2{l}"))

    # ---- SequenceSummary('last') + tanh proj + classifier (dropout = identity) ----
    xres_ref[...] = x
    h_last = xres_ref[pl.ds(S - 1, BF, stride=S), :]          # last token per choice
    s = jnp.tanh(jnp.dot(h_last, w("w_sum"),
                         preferred_element_type=jnp.float32) + w("b_sum"))
    logits = jnp.sum(s * w("w_clsT"), axis=-1, keepdims=True) + w("b_cls")   # (BF, 1)

    # ---- CrossEntropyLoss (mean) over choice groups, labels read from SMEM ----
    rowb = jax.lax.broadcasted_iota(jnp.int32, (B, BF), 0)
    colr = jax.lax.broadcasted_iota(jnp.int32, (B, BF), 1)
    group = ((colr >= rowb * C) & (colr < (rowb + 1) * C)).astype(jnp.float32)
    gmax = jnp.max(logits)                                    # single stability offset
    expl = jnp.exp(logits - gmax)                             # (BF, 1)
    lse = jnp.log(jnp.dot(group, expl,
                          preferred_element_type=jnp.float32)) + gmax       # (B, 1)
    lbl = jnp.zeros((B, BF), jnp.int32)
    for b in range(B):                                        # static, B is tiny
        lbl = jnp.where(rowb == b, labels_ref[b], lbl)
    tsel = (colr == rowb * C + lbl).astype(jnp.float32)       # picks logits[b*C+label_b]
    true_logit = jnp.dot(tsel, logits, preferred_element_type=jnp.float32)   # (B, 1)
    loss = jnp.mean(lse - true_logit)

    # ---- lane-dense padded output tile: logits at [0:BF, 0], loss at [BF, 0] ----
    out_ref[...] = jnp.zeros((8, LANES), jnp.float32)
    out_ref[pl.ds(0, BF), pl.ds(0, 1)] = logits
    out_ref[pl.ds(BF, 1), pl.ds(0, 1)] = jnp.broadcast_to(loss, (1, 1))


# ---------------- pallas_call wrapper ----------------
def fused_forward(slab, h0_flat, labels):
    out = pl.pallas_call(
        fused_forward_kernel,
        out_shape=jax.ShapeDtypeStruct((8, LANES), jnp.float32),
        in_specs=[
            pl.BlockSpec(memory_space=pltpu.MemorySpace.SMEM),   # labels
            pl.BlockSpec(memory_space=pltpu.MemorySpace.VMEM),   # embeddings
            pl.BlockSpec(memory_space=pltpu.MemorySpace.VMEM),   # weight slab
        ],
        out_specs=pl.BlockSpec(memory_space=pltpu.MemorySpace.VMEM),
        scratch_shapes=[pltpu.VMEM((R, D), jnp.float32)],
    )(labels, h0_flat, slab)
    return out[0:BF, 0], out[BF, 0]          # (BF,) logits, () loss


# ---------------- parameters ----------------
def init_params(key):
    keys = iter(jax.random.split(key, 128))

    def nrm(shape):
        return 0.02 * jax.random.normal(next(keys), shape, dtype=jnp.float32)

    params = {"embed": nrm((V, D)), "layers": []}
    for _ in range(L):
        params["layers"].append(dict(
            wq=nrm((D, D)), bq=jnp.zeros((1, D), jnp.float32),
            wk=nrm((D, D)), bk=jnp.zeros((1, D), jnp.float32),
            wv=nrm((D, D)), bv=jnp.zeros((1, D), jnp.float32),
            wo=nrm((D, D)), bo=jnp.zeros((1, D), jnp.float32),
            g1=jnp.ones((1, D), jnp.float32), b1=jnp.zeros((1, D), jnp.float32),
            wff1=nrm((D, F)), bff1=jnp.zeros((1, F), jnp.float32),
            wff2=nrm((F, D)), bff2=jnp.zeros((1, D), jnp.float32),
            g2=jnp.ones((1, D), jnp.float32), b2=jnp.zeros((1, D), jnp.float32),
        ))
    params["w_sum"] = nrm((D, D))
    params["b_sum"] = jnp.zeros((1, D), jnp.float32)
    params["w_cls"] = nrm((D, 1))
    params["b_cls"] = jnp.zeros((1, 1), jnp.float32)
    return params


def pack_params(params):
    """Pack every weight into one lane-dense (rows, 128) f32 slab (1 DMA)."""
    scale = jnp.float32(1.0 / math.sqrt(DH))
    entries = {}
    for l, lp in enumerate(params["layers"]):
        entries[f"wq{l}"] = lp["wq"] * scale   # fold softmax 1/sqrt(DH) into q proj
        entries[f"bq{l}"] = lp["bq"] * scale
        entries[f"wk{l}"] = lp["wk"]; entries[f"bk{l}"] = lp["bk"]
        entries[f"wv{l}"] = lp["wv"]; entries[f"bv{l}"] = lp["bv"]
        entries[f"wo{l}"] = lp["wo"]; entries[f"bo{l}"] = lp["bo"]
        entries[f"g1{l}"] = lp["g1"]; entries[f"b1{l}"] = lp["b1"]
        entries[f"wff1{l}"] = lp["wff1"]; entries[f"bff1{l}"] = lp["bff1"]
        entries[f"wff2{l}"] = lp["wff2"]; entries[f"bff2{l}"] = lp["bff2"]
        entries[f"g2{l}"] = lp["g2"]; entries[f"b2{l}"] = lp["b2"]
    entries["w_sum"] = params["w_sum"]; entries["b_sum"] = params["b_sum"]
    entries["w_clsT"] = params["w_cls"].T                      # (1, D)
    entries["b_cls"] = params["b_cls"]                         # (1, 1)

    slab = jnp.zeros((_SLAB_ROWS, LANES), jnp.float32)
    for name, arr in entries.items():
        r0, shape = _SLAB_LAYOUT[name]
        assert tuple(arr.shape) == shape, (name, arr.shape, shape)
        slab = slab.at[r0:r0 + shape[0], :shape[1]].set(arr.astype(jnp.float32))
    return slab


# ---------------- forward (matches module semantics) ----------------
def xlnet_multiple_choice_forward(params, slab, input_ids, labels=None):
    num_choices = input_ids.shape[1]
    flat_ids = input_ids.reshape(-1, input_ids.shape[-1])              # (BF, S)

    # TODO(synk): XLNet relative positional attention, mems, perm_mask,
    # target_mapping, token-type embeddings and attention masks are omitted;
    # the encoder is a synthetic standard transformer. Embedding gather kept
    # in plain JAX (glue).
    h0 = jnp.take(params["embed"], flat_ids, axis=0).astype(jnp.float32)   # (BF,S,D)
    h0_flat = h0.reshape(R, D)

    if labels is None:
        lbl_arr = jnp.zeros((input_ids.shape[0],), jnp.int32)
    else:
        lbl_arr = labels.reshape(-1).astype(jnp.int32)

    logits_flat, loss_val = fused_forward(slab, h0_flat, lbl_arr)      # (BF,), ()
    reshaped_logits = logits_flat.reshape(-1, num_choices)             # (B, C)
    loss = loss_val if labels is not None else None
    return loss, reshaped_logits


if __name__ == "__main__":
    key = jax.random.PRNGKey(0)
    k_par, k_ids, k_lab = jax.random.split(key, 3)

    params = init_params(k_par)
    slab = pack_params(params)
    input_ids = jax.random.randint(k_ids, (B, C, S), 0, V, dtype=jnp.int32)
    labels = jax.random.randint(k_lab, (B,), 0, C, dtype=jnp.int32)

    loss, logits = xlnet_multiple_choice_forward(params, slab, input_ids, labels)
    loss = jax.block_until_ready(loss)
    logits = jax.block_until_ready(logits)

    assert logits.shape == (B, C)
    assert loss.shape == () and jnp.isfinite(loss)
    print("KERNEL_OK")
</pallas_src>

<mosaic_0001>
module attributes {stable_mosaic.version = 11 : i64} {
  func.func @fused_forward_kernel(%arg0: memref<2xi32, #tpu.memory_space<smem>>, %arg1: memref<32x32xf32, #tpu.memory_space<vmem>>, %arg2: memref<664x128xf32, #tpu.memory_space<vmem>>, %arg3: memref<8x128xf32, #tpu.memory_space<vmem>>, %arg4: memref<32x32xf32, #tpu.memory_space<vmem>>) attributes {dimension_semantics = [], scalar_prefetch = 0 : i64, scratch_operands = 1 : i64, tpu.core_type = #tpu.core_type<tc>} {
    %c0 = arith.constant 0 : index
    %c0_0 = arith.constant 0 : index
    %0 = vector.load %arg1[%c0, %c0_0] : memref<32x32xf32, #tpu.memory_space<vmem>>, vector<32x32xf32>
    %c0_1 = arith.constant 0 : index
    %c0_2 = arith.constant 0 : index
    %1 = vector.load %arg2[%c0_1, %c0_2] : memref<664x128xf32, #tpu.memory_space<vmem>>, vector<32x32xf32>
    %cst = arith.constant dense<0.000000e+00> : vector<32x32xf32>
    %2 = tpu.matmul %0, %1, %cst {dimension_numbers = #tpu.dot_dimension_numbers<[1], [0], [0], [1], [0, 0, 1, 1], [], []>} : vector<32x32xf32>, vector<32x32xf32>, vector<32x32xf32> -> vector<32x32xf32>
    %c32 = arith.constant 32 : index
    %c0_3 = arith.constant 0 : index
    %3 = vector.load %arg2[%c32, %c0_3] : memref<664x128xf32, #tpu.memory_space<vmem>>, vector<1x32xf32>
    %4 = vector.broadcast %3 : vector<1x32xf32> to vector<32x32xf32>
    %5 = arith.addf %2, %4 : vector<32x32xf32>
    %c40 = arith.constant 40 : index
    %c0_4 = arith.constant 0 : index
    %6 = vector.load %arg2[%c40, %c0_4] : memref<664x128xf32, #tpu.memory_space<vmem>>, vector<32x32xf32>
    %cst_5 = arith.constant dense<0.000000e+00> : vector<32x32xf32>
    %7 = tpu.matmul %0, %6, %cst_5 {dimension_numbers = #tpu.dot_dimension_numbers<[1], [0], [0], [1], [0, 0, 1, 1], [], []>} : vector<32x32xf32>, vector<32x32xf32>, vector<32x32xf32> -> vector<32x32xf32>
    %c72 = arith.constant 72 : index
    %c0_6 = arith.constant 0 : index
    %8 = vector.load %arg2[%c72, %c0_6] : memref<664x128xf32, #tpu.memory_space<vmem>>, vector<1x32xf32>
    %9 = vector.broadcast %8 : vector<1x32xf32> to vector<32x32xf32>
    %10 = arith.addf %7, %9 : vector<32x32xf32>
    %c80 = arith.constant 80 : index
    %c0_7 = arith.constant 0 : index
    %11 = vector.load %arg2[%c80, %c0_7] : memref<664x128xf32, #tpu.memory_space<vmem>>, vector<32x32xf32>
    %cst_8 = arith.constant dense<0.000000e+00> : vector<32x32xf32>
    %12 = tpu.matmul %0, %11, %cst_8 {dimension_numbers = #tpu.dot_dimension_numbers<[1], [0], [0], [1], [0, 0, 1, 1], [], []>} : vector<32x32xf32>, vector<32x32xf32>, vector<32x32xf32> -> vector<32x32xf32>
    %c112 = arith.constant 112 : index
    %c0_9 = arith.constant 0 : index
    %13 = vector.load %arg2[%c112, %c0_9] : memref<664x128xf32, #tpu.memory_space<vmem>>, vector<1x32xf32>
    %14 = vector.broadcast %13 : vector<1x32xf32> to vector<32x32xf32>
    %15 = arith.addf %12, %14 : vector<32x32xf32>
    %16 = vector.extract_strided_slice %5 {offsets = [0, 0], sizes = [32, 8], strides = [1, 1]} : vector<32x32xf32> to vector<32x8xf32>
    %17 = vector.extract_strided_slice %5 {offsets = [0, 8], sizes = [32, 8], strides = [1, 1]} : vector<32x32xf32> to vector<32x8xf32>
    %18 = vector.extract_strided_slice %5 {offsets = [0, 16], sizes = [32, 8], strides = [1, 1]} : vector<32x32xf32> to vector<32x8xf32>
    %19 = vector.extract_strided_slice %5 {offsets = [0, 24], sizes = [32, 8], strides = [1, 1]} : vector<32x32xf32> to vector<32x8xf32>
    %20 = tpu.concatenate %16, %17, %18, %19 in 0 : vector<32x8xf32>, vector<32x8xf32>, vector<32x8xf32>, vector<32x8xf32> -> vector<128x8xf32>
    %21 = vector.shape_cast %20 : vector<128x8xf32> to vector<16x8x8xf32>
    %22 = vector.extract_strided_slice %10 {offsets = [0, 0], sizes = [32, 8], strides = [1, 1]} : vector<32x32xf32> to vector<32x8xf32>
    %23 = vector.extract_strided_slice %10 {offsets = [0, 8], sizes = [32, 8], strides = [1, 1]} : vector<32x32xf32> to vector<32x8xf32>
    %24 = vector.extract_strided_slice %10 {offsets = [0, 16], sizes = [32, 8], strides = [1, 1]} : vector<32x32xf32> to vector<32x8xf32>
    %25 = vector.extract_strided_slice %10 {offsets = [0, 24], sizes = [32, 8], strides = [1, 1]} : vector<32x32xf32> to vector<32x8xf32>
    %26 = tpu.concatenate %22, %23, %24, %25 in 0 : vector<32x8xf32>, vector<32x8xf32>, vector<32x8xf32>, vector<32x8xf32> -> vector<128x8xf32>
    %27 = vector.shape_cast %26 : vector<128x8xf32> to vector<16x8x8xf32>
    %28 = vector.extract_strided_slice %15 {offsets = [0, 0], sizes = [32, 8], strides = [1, 1]} : vector<32x32xf32> to vector<32x8xf32>
    %29 = vector.extract_strided_slice %15 {offsets = [0, 8], sizes = [32, 8], strides = [1, 1]} : vector<32x32xf32> to vector<32x8xf32>
    %30 = vector.extract_strided_slice %15 {offsets = [0, 16], sizes = [32, 8], strides = [1, 1]} : vector<32x32xf32> to vector<32x8xf32>
    %31 = vector.extract_strided_slice %15 {offsets = [0, 24], sizes = [32, 8], strides = [1, 1]} : vector<32x32xf32> to vector<32x8xf32>
    %32 = tpu.concatenate %28, %29, %30, %31 in 0 : vector<32x8xf32>, vector<32x8xf32>, vector<32x8xf32>, vector<32x8xf32> -> vector<128x8xf32>
    %33 = vector.shape_cast %32 : vector<128x8xf32> to vector<16x8x8xf32>
    "tpu.trace_start"() <{level = 10 : i32, message = "bqd,bkd->bqk"}> : () -> ()
    %cst_10 = arith.constant dense<0.000000e+00> : vector<16x8x8xf32>
    %34 = tpu.matmul %21, %27, %cst_10 {dimension_numbers = #tpu.dot_dimension_numbers<[2], [2], [1], [1], [0, 0, 0, 1, 1, 1], [0], [0]>} : vector<16x8x8xf32>, vector<16x8x8xf32>, vector<16x8x8xf32> -> vector<16x8x8xf32>
    "tpu.trace_stop"() : () -> ()
    %cst_11 = arith.constant dense<0xFF800000> : vector<16x8xf32>
    %35 = vector.multi_reduction <maximumf>, %34, %cst_11 [2] : vector<16x8x8xf32> to vector<16x8xf32>
    %36 = vector.shape_cast %35 : vector<16x8xf32> to vector<16x8x1xf32>
    %37 = vector.broadcast %36 : vector<16x8x1xf32> to vector<16x8x8xf32>
    %38 = arith.subf %34, %37 : vector<16x8x8xf32>
    %39 = math.exp %38 : vector<16x8x8xf32>
    %cst_12 = arith.constant dense<0.000000e+00> : vector<16x8xf32>
    %40 = vector.multi_reduction <add>, %39, %cst_12 [2] : vector<16x8x8xf32> to vector<16x8xf32>
    %41 = vector.shape_cast %40 : vector<16x8xf32> to vector<16x8x1xf32>
    %42 = tpu.reciprocal %41 {approx = true} : vector<16x8x1xf32> -> vector<16x8x1xf32>
    %43 = vector.broadcast %42 : vector<16x8x1xf32> to vector<16x8x8xf32>
    %44 = arith.mulf %39, %43 : vector<16x8x8xf32>
    "tpu.trace_start"() <{level = 10 : i32, message = "bqk,bkd->bqd"}> : () -> ()
    %cst_13 = arith.constant dense<0.000000e+00> : vector<16x8x8xf32>
    %45 = tpu.matmul %44, %33, %cst_13 {dimension_numbers = #tpu.dot_dimension_numbers<[2], [1], [1], [2], [0, 0, 0, 1, 1, 2], [0], [0]>} : vector<16x8x8xf32>, vector<16x8x8xf32>, vector<16x8x8xf32> -> vector<16x8x8xf32>
    "tpu.trace_stop"() : () -> ()
    %46 = vector.shape_cast %45 : vector<16x8x8xf32> to vector<4x32x8xf32>
    %47 = vector.extract_strided_slice %46 {offsets = [0, 0, 0], sizes = [1, 32, 8], strides = [1, 1, 1]} : vector<4x32x8xf32> to vector<1x32x8xf32>
    %48 = vector.shape_cast %47 : vector<1x32x8xf32> to vector<32x8xf32>
    %49 = vector.extract_strided_slice %46 {offsets = [1, 0, 0], sizes = [1, 32, 8], strides = [1, 1, 1]} : vector<4x32x8xf32> to vector<1x32x8xf32>
    %50 = vector.shape_cast %49 : vector<1x32x8xf32> to vector<32x8xf32>
    %51 = vector.extract_strided_slice %46 {offsets = [2, 0, 0], sizes = [1, 32, 8], strides = [1, 1, 1]} : vector<4x32x8xf32> to vector<1x32x8xf32>
    %52 = vector.shape_cast %51 : vector<1x32x8xf32> to vector<32x8xf32>
    %53 = vector.extract_strided_slice %46 {offsets = [3, 0, 0], sizes = [1, 32, 8], strides = [1, 1, 1]} : vector<4x32x8xf32> to vector<1x32x8xf32>
    %54 = vector.shape_cast %53 : vector<1x32x8xf32> to vector<32x8xf32>
    %55 = tpu.concatenate %48, %50, %52, %54 in 1 : vector<32x8xf32>, vector<32x8xf32>, vector<32x8xf32>, vector<32x8xf32> -> vector<32x32xf32>
    %c120 = arith.constant 120 : index
    %c0_14 = arith.constant 0 : index
    %56 = vector.load %arg2[%c120, %c0_14] : memref<664x128xf32, #tpu.memory_space<vmem>>, vector<32x32xf32>
    %cst_15 = arith.constant dense<0.000000e+00> : vector<32x32xf32>
    %57 = tpu.matmul %55, %56, %cst_15 {dimension_numbers = #tpu.dot_dimension_numbers<[1], [0], [0], [1], [0, 0, 1, 1], [], []>} : vector<32x32xf32>, vector<32x32xf32>, vector<32x32xf32> -> vector<32x32xf32>
    %c152 = arith.constant 152 : index
    %c0_16 = arith.constant 0 : index
    %58 = vector.load %arg2[%c152, %c0_16] : memref<664x128xf32, #tpu.memory_space<vmem>>, vector<1x32xf32>
    %59 = vector.broadcast %58 : vector<1x32xf32> to vector<32x32xf32>
    %60 = arith.addf %57, %59 : vector<32x32xf32>
    %61 = arith.addf %0, %60 : vector<32x32xf32>
    %c160 = arith.constant 160 : index
    %c0_17 = arith.constant 0 : index
    %62 = vector.load %arg2[%c160, %c0_17] : memref<664x128xf32, #tpu.memory_space<vmem>>, vector<1x32xf32>
    %c168 = arith.constant 168 : index
    %c0_18 = arith.constant 0 : index
    %63 = vector.load %arg2[%c168, %c0_18] : memref<664x128xf32, #tpu.memory_space<vmem>>, vector<1x32xf32>
    %cst_19 = arith.constant dense<0.000000e+00> : vector<32xf32>
    %64 = vector.multi_reduction <add>, %61, %cst_19 [1] : vector<32x32xf32> to vector<32xf32>
    %65 = vector.shape_cast %64 : vector<32xf32> to vector<32x1xf32>
    %cst_20 = arith.constant 3.200000e+01 : f32
    %66 = vector.broadcast %cst_20 : f32 to vector<32x1xf32>
    %67 = arith.divf %65, %66 : vector<32x1xf32>
    %68 = arith.mulf %61, %61 : vector<32x32xf32>
    %cst_21 = arith.constant dense<0.000000e+00> : vector<32xf32>
    %69 = vector.multi_reduction <add>, %68, %cst_21 [1] : vector<32x32xf32> to vector<32xf32>
    %70 = vector.shape_cast %69 : vector<32xf32> to vector<32x1xf32>
    %cst_22 = arith.constant 3.200000e+01 : f32
    %71 = vector.broadcast %cst_22 : f32 to vector<32x1xf32>
    %72 = arith.divf %70, %71 : vector<32x1xf32>
    %73 = arith.mulf %67, %67 : vector<32x1xf32>
    %74 = arith.subf %72, %73 : vector<32x1xf32>
    %75 = vector.broadcast %67 : vector<32x1xf32> to vector<32x32xf32>
    %76 = arith.subf %61, %75 : vector<32x32xf32>
    %cst_23 = arith.constant 9.99999996E-13 : f32
    %77 = vector.broadcast %cst_23 : f32 to vector<32x1xf32>
    %78 = arith.addf %74, %77 : vector<32x1xf32>
    %79 = math.rsqrt %78 : vector<32x1xf32>
    %80 = vector.broadcast %79 : vector<32x1xf32> to vector<32x32xf32>
    %81 = arith.mulf %76, %80 : vector<32x32xf32>
    %82 = vector.broadcast %62 : vector<1x32xf32> to vector<32x32xf32>
    %83 = arith.mulf %81, %82 : vector<32x32xf32>
    %84 = vector.broadcast %63 : vector<1x32xf32> to vector<32x32xf32>
    %85 = arith.addf %83, %84 : vector<32x32xf32>
    %c176 = arith.constant 176 : index
    %c0_24 = arith.constant 0 : index
    %86 = vector.load %arg2[%c176, %c0_24] : memref<664x128xf32, #tpu.memory_space<vmem>>, vector<32x64xf32>
    %cst_25 = arith.constant dense<0.000000e+00> : vector<32x64xf32>
    %87 = tpu.matmul %85, %86, %cst_25 {dimension_numbers = #tpu.dot_dimension_numbers<[1], [0], [0], [1], [0, 0, 1, 1], [], []>} : vector<32x32xf32>, vector<32x64xf32>, vector<32x64xf32> -> vector<32x64xf32>
    %c208 = arith.constant 208 : index
    %c0_26 = arith.constant 0 : index
    %88 = vector.load %arg2[%c208, %c0_26] : memref<664x128xf32, #tpu.memory_space<vmem>>, vector<1x64xf32>
    %89 = vector.broadcast %88 : vector<1x64xf32> to vector<32x64xf32>
    %90 = arith.addf %87, %89 : vector<32x64xf32>
    %91 = arith.mulf %90, %90 : vector<32x64xf32>
    %92 = arith.mulf %90, %91 : vector<32x64xf32>
    %cst_27 = arith.constant 4.471500e-02 : f32
    %93 = vector.broadcast %cst_27 : f32 to vector<32x64xf32>
    %94 = arith.mulf %93, %92 : vector<32x64xf32>
    %95 = arith.addf %90, %94 : vector<32x64xf32>
    %cst_28 = arith.constant 0.797884583 : f32
    %96 = vector.broadcast %cst_28 : f32 to vector<32x64xf32>
    %97 = arith.mulf %96, %95 : vector<32x64xf32>
    %98 = math.tanh %97 : vector<32x64xf32>
    %cst_29 = arith.constant 1.000000e+00 : f32
    %99 = vector.broadcast %cst_29 : f32 to vector<32x64xf32>
    %100 = arith.addf %99, %98 : vector<32x64xf32>
    %cst_30 = arith.constant 5.000000e-01 : f32
    %101 = vector.broadcast %cst_30 : f32 to vector<32x64xf32>
    %102 = arith.mulf %101, %100 : vector<32x64xf32>
    %103 = arith.mulf %90, %102 : vector<32x64xf32>
    %c216 = arith.constant 216 : index
    %c0_31 = arith.constant 0 : index
    %104 = vector.load %arg2[%c216, %c0_31] : memref<664x128xf32, #tpu.memory_space<vmem>>, vector<64x32xf32>
    %cst_32 = arith.constant dense<0.000000e+00> : vector<32x32xf32>
    %105 = tpu.matmul %103, %104, %cst_32 {dimension_numbers = #tpu.dot_dimension_numbers<[1], [0], [0], [1], [0, 0, 1, 1], [], []>} : vector<32x64xf32>, vector<64x32xf32>, vector<32x32xf32> -> vector<32x32xf32>
    %c280 = arith.constant 280 : index
    %c0_33 = arith.constant 0 : index
    %106 = vector.load %arg2[%c280, %c0_33] : memref<664x128xf32, #tpu.memory_space<vmem>>, vector<1x32xf32>
    %107 = vector.broadcast %106 : vector<1x32xf32> to vector<32x32xf32>
    %108 = arith.addf %105, %107 : vector<32x32xf32>
    %109 = arith.addf %85, %108 : vector<32x32xf32>
    %c288 = arith.constant 288 : index
    %c0_34 = arith.constant 0 : index
    %110 = vector.load %arg2[%c288, %c0_34] : memref<664x128xf32, #tpu.memory_space<vmem>>, vector<1x32xf32>
    %c296 = arith.constant 296 : index
    %c0_35 = arith.constant 0 : index
    %111 = vector.load %arg2[%c296, %c0_35] : memref<664x128xf32, #tpu.memory_space<vmem>>, vector<1x32xf32>
    %cst_36 = arith.constant dense<0.000000e+00> : vector<32xf32>
    %112 = vector.multi_reduction <add>, %109, %cst_36 [1] : vector<32x32xf32> to vector<32xf32>
    %113 = vector.shape_cast %112 : vector<32xf32> to vector<32x1xf32>
    %cst_37 = arith.constant 3.200000e+01 : f32
    %114 = vector.broadcast %cst_37 : f32 to vector<32x1xf32>
    %115 = arith.divf %113, %114 : vector<32x1xf32>
    %116 = arith.mulf %109, %109 : vector<32x32xf32>
    %cst_38 = arith.constant dense<0.000000e+00> : vector<32xf32>
    %117 = vector.multi_reduction <add>, %116, %cst_38 [1] : vector<32x32xf32> to vector<32xf32>
    %118 = vector.shape_cast %117 : vector<32xf32> to vector<32x1xf32>
    %cst_39 = arith.constant 3.200000e+01 : f32
    %119 = vector.broadcast %cst_39 : f32 to vector<32x1xf32>
    %120 = arith.divf %118, %119 : vector<32x1xf32>
    %121 = arith.mulf %115, %115 : vector<32x1xf32>
    %122 = arith.subf %120, %121 : vector<32x1xf32>
    %123 = vector.broadcast %115 : vector<32x1xf32> to vector<32x32xf32>
    %124 = arith.subf %109, %123 : vector<32x32xf32>
    %cst_40 = arith.constant 9.99999996E-13 : f32
    %125 = vector.broadcast %cst_40 : f32 to vector<32x1xf32>
    %126 = arith.addf %122, %125 : vector<32x1xf32>
    %127 = math.rsqrt %126 : vector<32x1xf32>
    %128 = vector.broadcast %127 : vector<32x1xf32> to vector<32x32xf32>
    %129 = arith.mulf %124, %128 : vector<32x32xf32>
    %130 = vector.broadcast %110 : vector<1x32xf32> to vector<32x32xf32>
    %131 = arith.mulf %129, %130 : vector<32x32xf32>
    %132 = vector.broadcast %111 : vector<1x32xf32> to vector<32x32xf32>
    %133 = arith.addf %131, %132 : vector<32x32xf32>
    %c304 = arith.constant 304 : index
    %c0_41 = arith.constant 0 : index
    %134 = vector.load %arg2[%c304, %c0_41] : memref<664x128xf32, #tpu.memory_space<vmem>>, vector<32x32xf32>
    %cst_42 = arith.constant dense<0.000000e+00> : vector<32x32xf32>
    %135 = tpu.matmul %133, %134, %cst_42 {dimension_numbers = #tpu.dot_dimension_numbers<[1], [0], [0], [1], [0, 0, 1, 1], [], []>} : vector<32x32xf32>, vector<32x32xf32>, vector<32x32xf32> -> vector<32x32xf32>
    %c336 = arith.constant 336 : index
    %c0_43 = arith.constant 0 : index
    %136 = vector.load %arg2[%c336, %c0_43] : memref<664x128xf32, #tpu.memory_space<vmem>>, vector<1x32xf32>
    %137 = vector.broadcast %136 : vector<1x32xf32> to vector<32x32xf32>
    %138 = arith.addf %135, %137 : vector<32x32xf32>
    %c344 = arith.constant 344 : index
    %c0_44 = arith.constant 0 : index
    %139 = vector.load %arg2[%c344, %c0_44] : memref<664x128xf32, #tpu.memory_space<vmem>>, vector<32x32xf32>
    %cst_45 = arith.constant dense<0.000000e+00> : vector<32x32xf32>
    %140 = tpu.matmul %133, %139, %cst_45 {dimension_numbers = #tpu.dot_dimension_numbers<[1], [0], [0], [1], [0, 0, 1, 1], [], []>} : vector<32x32xf32>, vector<32x32xf32>, vector<32x32xf32> -> vector<32x32xf32>
    %c376 = arith.constant 376 : index
    %c0_46 = arith.constant 0 : index
    %141 = vector.load %arg2[%c376, %c0_46] : memref<664x128xf32, #tpu.memory_space<vmem>>, vector<1x32xf32>
    %142 = vector.broadcast %141 : vector<1x32xf32> to vector<32x32xf32>
    %143 = arith.addf %140, %142 : vector<32x32xf32>
    %c384 = arith.constant 384 : index
    %c0_47 = arith.constant 0 : index
    %144 = vector.load %arg2[%c384, %c0_47] : memref<664x128xf32, #tpu.memory_space<vmem>>, vector<32x32xf32>
    %cst_48 = arith.constant dense<0.000000e+00> : vector<32x32xf32>
    %145 = tpu.matmul %133, %144, %cst_48 {dimension_numbers = #tpu.dot_dimension_numbers<[1], [0], [0], [1], [0, 0, 1, 1], [], []>} : vector<32x32xf32>, vector<32x32xf32>, vector<32x32xf32> -> vector<32x32xf32>
    %c416 = arith.constant 416 : index
    %c0_49 = arith.constant 0 : index
    %146 = vector.load %arg2[%c416, %c0_49] : memref<664x128xf32, #tpu.memory_space<vmem>>, vector<1x32xf32>
    %147 = vector.broadcast %146 : vector<1x32xf32> to vector<32x32xf32>
    %148 = arith.addf %145, %147 : vector<32x32xf32>
    %149 = vector.extract_strided_slice %138 {offsets = [0, 0], sizes = [32, 8], strides = [1, 1]} : vector<32x32xf32> to vector<32x8xf32>
    %150 = vector.extract_strided_slice %138 {offsets = [0, 8], sizes = [32, 8], strides = [1, 1]} : vector<32x32xf32> to vector<32x8xf32>
    %151 = vector.extract_strided_slice %138 {offsets = [0, 16], sizes = [32, 8], strides = [1, 1]} : vector<32x32xf32> to vector<32x8xf32>
    %152 = vector.extract_strided_slice %138 {offsets = [0, 24], sizes = [32, 8], strides = [1, 1]} : vector<32x32xf32> to vector<32x8xf32>
    %153 = tpu.concatenate %149, %150, %151, %152 in 0 : vector<32x8xf32>, vector<32x8xf32>, vector<32x8xf32>, vector<32x8xf32> -> vector<128x8xf32>
    %154 = vector.shape_cast %153 : vector<128x8xf32> to vector<16x8x8xf32>
    %155 = vector.extract_strided_slice %143 {offsets = [0, 0], sizes = [32, 8], strides = [1, 1]} : vector<32x32xf32> to vector<32x8xf32>
    %156 = vector.extract_strided_slice %143 {offsets = [0, 8], sizes = [32, 8], strides = [1, 1]} : vector<32x32xf32> to vector<32x8xf32>
    %157 = vector.extract_strided_slice %143 {offsets = [0, 16], sizes = [32, 8], strides = [1, 1]} : vector<32x32xf32> to vector<32x8xf32>
    %158 = vector.extract_strided_slice %143 {offsets = [0, 24], sizes = [32, 8], strides = [1, 1]} : vector<32x32xf32> to vector<32x8xf32>
    %159 = tpu.concatenate %155, %156, %157, %158 in 0 : vector<32x8xf32>, vector<32x8xf32>, vector<32x8xf32>, vector<32x8xf32> -> vector<128x8xf32>
    %160 = vector.shape_cast %159 : vector<128x8xf32> to vector<16x8x8xf32>
    %161 = vector.extract_strided_slice %148 {offsets = [0, 0], sizes = [32, 8], strides = [1, 1]} : vector<32x32xf32> to vector<32x8xf32>
    %162 = vector.extract_strided_slice %148 {offsets = [0, 8], sizes = [32, 8], strides = [1, 1]} : vector<32x32xf32> to vector<32x8xf32>
    %163 = vector.extract_strided_slice %148 {offsets = [0, 16], sizes = [32, 8], strides = [1, 1]} : vector<32x32xf32> to vector<32x8xf32>
    %164 = vector.extract_strided_slice %148 {offsets = [0, 24], sizes = [32, 8], strides = [1, 1]} : vector<32x32xf32> to vector<32x8xf32>
    %165 = tpu.concatenate %161, %162, %163, %164 in 0 : vector<32x8xf32>, vector<32x8xf32>, vector<32x8xf32>, vector<32x8xf32> -> vector<128x8xf32>
    %166 = vector.shape_cast %165 : vector<128x8xf32> to vector<16x8x8xf32>
    "tpu.trace_start"() <{level = 10 : i32, message = "bqd,bkd->bqk"}> : () -> ()
    %cst_50 = arith.constant dense<0.000000e+00> : vector<16x8x8xf32>
    %167 = tpu.matmul %154, %160, %cst_50 {dimension_numbers = #tpu.dot_dimension_numbers<[2], [2], [1], [1], [0, 0, 0, 1, 1, 1], [0], [0]>} : vector<16x8x8xf32>, vector<16x8x8xf32>, vector<16x8x8xf32> -> vector<16x8x8xf32>
    "tpu.trace_stop"() : () -> ()
    %cst_51 = arith.constant dense<0xFF800000> : vector<16x8xf32>
    %168 = vector.multi_reduction <maximumf>, %167, %cst_51 [2] : vector<16x8x8xf32> to vector<16x8xf32>
    %169 = vector.shape_cast %168 : vector<16x8xf32> to vector<16x8x1xf32>
    %170 = vector.broadcast %169 : vector<16x8x1xf32> to vector<16x8x8xf32>
    %171 = arith.subf %167, %170 : vector<16x8x8xf32>
    %172 = math.exp %171 : vector<16x8x8xf32>
    %cst_52 = arith.constant dense<0.000000e+00> : vector<16x8xf32>
    %173 = vector.multi_reduction <add>, %172, %cst_52 [2] : vector<16x8x8xf32> to vector<16x8xf32>
    %174 = vector.shape_cast %173 : vector<16x8xf32> to vector<16x8x1xf32>
    %175 = tpu.reciprocal %174 {approx = true} : vector<16x8x1xf32> -> vector<16x8x1xf32>
    %176 = vector.broadcast %175 : vector<16x8x1xf32> to vector<16x8x8xf32>
    %177 = arith.mulf %172, %176 : vector<16x8x8xf32>
    "tpu.trace_start"() <{level = 10 : i32, message = "bqk,bkd->bqd"}> : () -> ()
    %cst_53 = arith.constant dense<0.000000e+00> : vector<16x8x8xf32>
    %178 = tpu.matmul %177, %166, %cst_53 {dimension_numbers = #tpu.dot_dimension_numbers<[2], [1], [1], [2], [0, 0, 0, 1, 1, 2], [0], [0]>} : vector<16x8x8xf32>, vector<16x8x8xf32>, vector<16x8x8xf32> -> vector<16x8x8xf32>
    "tpu.trace_stop"() : () -> ()
    %179 = vector.shape_cast %178 : vector<16x8x8xf32> to vector<4x32x8xf32>
    %180 = vector.extract_strided_slice %179 {offsets = [0, 0, 0], sizes = [1, 32, 8], strides = [1, 1, 1]} : vector<4x32x8xf32> to vector<1x32x8xf32>
    %181 = vector.shape_cast %180 : vector<1x32x8xf32> to vector<32x8xf32>
    %182 = vector.extract_strided_slice %179 {offsets = [1, 0, 0], sizes = [1, 32, 8], strides = [1, 1, 1]} : vector<4x32x8xf32> to vector<1x32x8xf32>
    %183 = vector.shape_cast %182 : vector<1x32x8xf32> to vector<32x8xf32>
    %184 = vector.extract_strided_slice %179 {offsets = [2, 0, 0], sizes = [1, 32, 8], strides = [1, 1, 1]} : vector<4x32x8xf32> to vector<1x32x8xf32>
    %185 = vector.shape_cast %184 : vector<1x32x8xf32> to vector<32x8xf32>
    %186 = vector.extract_strided_slice %179 {offsets = [3, 0, 0], sizes = [1, 32, 8], strides = [1, 1, 1]} : vector<4x32x8xf32> to vector<1x32x8xf32>
    %187 = vector.shape_cast %186 : vector<1x32x8xf32> to vector<32x8xf32>
    %188 = tpu.concatenate %181, %183, %185, %187 in 1 : vector<32x8xf32>, vector<32x8xf32>, vector<32x8xf32>, vector<32x8xf32> -> vector<32x32xf32>
    %c424 = arith.constant 424 : index
    %c0_54 = arith.constant 0 : index
    %189 = vector.load %arg2[%c424, %c0_54] : memref<664x128xf32, #tpu.memory_space<vmem>>, vector<32x32xf32>
    %cst_55 = arith.constant dense<0.000000e+00> : vector<32x32xf32>
    %190 = tpu.matmul %188, %189, %cst_55 {dimension_numbers = #tpu.dot_dimension_numbers<[1], [0], [0], [1], [0, 0, 1, 1], [], []>} : vector<32x32xf32>, vector<32x32xf32>, vector<32x32xf32> -> vector<32x32xf32>
    %c456 = arith.constant 456 : index
    %c0_56 = arith.constant 0 : index
    %191 = vector.load %arg2[%c456, %c0_56] : memref<664x128xf32, #tpu.memory_space<vmem>>, vector<1x32xf32>
    %192 = vector.broadcast %191 : vector<1x32xf32> to vector<32x32xf32>
    %193 = arith.addf %190, %192 : vector<32x32xf32>
    %194 = arith.addf %133, %193 : vector<32x32xf32>
    %c464 = arith.constant 464 : index
    %c0_57 = arith.constant 0 : index
    %195 = vector.load %arg2[%c464, %c0_57] : memref<664x128xf32, #tpu.memory_space<vmem>>, vector<1x32xf32>
    %c472 = arith.constant 472 : index
    %c0_58 = arith.constant 0 : index
    %196 = vector.load %arg2[%c472, %c0_58] : memref<664x128xf32, #tpu.memory_space<vmem>>, vector<1x32xf32>
    %cst_59 = arith.constant dense<0.000000e+00> : vector<32xf32>
    %197 = vector.multi_reduction <add>, %194, %cst_59 [1] : vector<32x32xf32> to vector<32xf32>
    %198 = vector.shape_cast %197 : vector<32xf32> to vector<32x1xf32>
    %cst_60 = arith.constant 3.200000e+01 : f32
    %199 = vector.broadcast %cst_60 : f32 to vector<32x1xf32>
    %200 = arith.divf %198, %199 : vector<32x1xf32>
    %201 = arith.mulf %194, %194 : vector<32x32xf32>
    %cst_61 = arith.constant dense<0.000000e+00> : vector<32xf32>
    %202 = vector.multi_reduction <add>, %201, %cst_61 [1] : vector<32x32xf32> to vector<32xf32>
    %203 = vector.shape_cast %202 : vector<32xf32> to vector<32x1xf32>
    %cst_62 = arith.constant 3.200000e+01 : f32
    %204 = vector.broadcast %cst_62 : f32 to vector<32x1xf32>
    %205 = arith.divf %203, %204 : vector<32x1xf32>
    %206 = arith.mulf %200, %200 : vector<32x1xf32>
    %207 = arith.subf %205, %206 : vector<32x1xf32>
    %208 = vector.broadcast %200 : vector<32x1xf32> to vector<32x32xf32>
    %209 = arith.subf %194, %208 : vector<32x32xf32>
    %cst_63 = arith.constant 9.99999996E-13 : f32
    %210 = vector.broadcast %cst_63 : f32 to vector<32x1xf32>
    %211 = arith.addf %207, %210 : vector<32x1xf32>
    %212 = math.rsqrt %211 : vector<32x1xf32>
    %213 = vector.broadcast %212 : vector<32x1xf32> to vector<32x32xf32>
    %214 = arith.mulf %209, %213 : vector<32x32xf32>
    %215 = vector.broadcast %195 : vector<1x32xf32> to vector<32x32xf32>
    %216 = arith.mulf %214, %215 : vector<32x32xf32>
    %217 = vector.broadcast %196 : vector<1x32xf32> to vector<32x32xf32>
    %218 = arith.addf %216, %217 : vector<32x32xf32>
    %c480 = arith.constant 480 : index
    %c0_64 = arith.constant 0 : index
    %219 = vector.load %arg2[%c480, %c0_64] : memref<664x128xf32, #tpu.memory_space<vmem>>, vector<32x64xf32>
    %cst_65 = arith.constant dense<0.000000e+00> : vector<32x64xf32>
    %220 = tpu.matmul %218, %219, %cst_65 {dimension_numbers = #tpu.dot_dimension_numbers<[1], [0], [0], [1], [0, 0, 1, 1], [], []>} : vector<32x32xf32>, vector<32x64xf32>, vector<32x64xf32> -> vector<32x64xf32>
    %c512 = arith.constant 512 : index
    %c0_66 = arith.constant 0 : index
    %221 = vector.load %arg2[%c512, %c0_66] : memref<664x128xf32, #tpu.memory_space<vmem>>, vector<1x64xf32>
    %222 = vector.broadcast %221 : vector<1x64xf32> to vector<32x64xf32>
    %223 = arith.addf %220, %222 : vector<32x64xf32>
    %224 = arith.mulf %223, %223 : vector<32x64xf32>
    %225 = arith.mulf %223, %224 : vector<32x64xf32>
    %cst_67 = arith.constant 4.471500e-02 : f32
    %226 = vector.broadcast %cst_67 : f32 to vector<32x64xf32>
    %227 = arith.mulf %226, %225 : vector<32x64xf32>
    %228 = arith.addf %223, %227 : vector<32x64xf32>
    %cst_68 = arith.constant 0.797884583 : f32
    %229 = vector.broadcast %cst_68 : f32 to vector<32x64xf32>
    %230 = arith.mulf %229, %228 : vector<32x64xf32>
    %231 = math.tanh %230 : vector<32x64xf32>
    %cst_69 = arith.constant 1.000000e+00 : f32
    %232 = vector.broadcast %cst_69 : f32 to vector<32x64xf32>
    %233 = arith.addf %232, %231 : vector<32x64xf32>
    %cst_70 = arith.constant 5.000000e-01 : f32
    %234 = vector.broadcast %cst_70 : f32 to vector<32x64xf32>
    %235 = arith.mulf %234, %233 : vector<32x64xf32>
    %236 = arith.mulf %223, %235 : vector<32x64xf32>
    %c520 = arith.constant 520 : index
    %c0_71 = arith.constant 0 : index
    %237 = vector.load %arg2[%c520, %c0_71] : memref<664x128xf32, #tpu.memory_space<vmem>>, vector<64x32xf32>
    %cst_72 = arith.constant dense<0.000000e+00> : vector<32x32xf32>
    %238 = tpu.matmul %236, %237, %cst_72 {dimension_numbers = #tpu.dot_dimension_numbers<[1], [0], [0], [1], [0, 0, 1, 1], [], []>} : vector<32x64xf32>, vector<64x32xf32>, vector<32x32xf32> -> vector<32x32xf32>
    %c584 = arith.constant 584 : index
    %c0_73 = arith.constant 0 : index
    %239 = vector.load %arg2[%c584, %c0_73] : memref<664x128xf32, #tpu.memory_space<vmem>>, vector<1x32xf32>
    %240 = vector.broadcast %239 : vector<1x32xf32> to vector<32x32xf32>
    %241 = arith.addf %238, %240 : vector<32x32xf32>
    %242 = arith.addf %218, %241 : vector<32x32xf32>
    %c592 = arith.constant 592 : index
    %c0_74 = arith.constant 0 : index
    %243 = vector.load %arg2[%c592, %c0_74] : memref<664x128xf32, #tpu.memory_space<vmem>>, vector<1x32xf32>
    %c600 = arith.constant 600 : index
    %c0_75 = arith.constant 0 : index
    %244 = vector.load %arg2[%c600, %c0_75] : memref<664x128xf32, #tpu.memory_space<vmem>>, vector<1x32xf32>
    %cst_76 = arith.constant dense<0.000000e+00> : vector<32xf32>
    %245 = vector.multi_reduction <add>, %242, %cst_76 [1] : vector<32x32xf32> to vector<32xf32>
    %246 = vector.shape_cast %245 : vector<32xf32> to vector<32x1xf32>
    %cst_77 = arith.constant 3.200000e+01 : f32
    %247 = vector.broadcast %cst_77 : f32 to vector<32x1xf32>
    %248 = arith.divf %246, %247 : vector<32x1xf32>
    %249 = arith.mulf %242, %242 : vector<32x32xf32>
    %cst_78 = arith.constant dense<0.000000e+00> : vector<32xf32>
    %250 = vector.multi_reduction <add>, %249, %cst_78 [1] : vector<32x32xf32> to vector<32xf32>
    %251 = vector.shape_cast %250 : vector<32xf32> to vector<32x1xf32>
    %cst_79 = arith.constant 3.200000e+01 : f32
    %252 = vector.broadcast %cst_79 : f32 to vector<32x1xf32>
    %253 = arith.divf %251, %252 : vector<32x1xf32>
    %254 = arith.mulf %248, %248 : vector<32x1xf32>
    %255 = arith.subf %253, %254 : vector<32x1xf32>
    %256 = vector.broadcast %248 : vector<32x1xf32> to vector<32x32xf32>
    %257 = arith.subf %242, %256 : vector<32x32xf32>
    %cst_80 = arith.constant 9.99999996E-13 : f32
    %258 = vector.broadcast %cst_80 : f32 to vector<32x1xf32>
    %259 = arith.addf %255, %258 : vector<32x1xf32>
    %260 = math.rsqrt %259 : vector<32x1xf32>
    %261 = vector.broadcast %260 : vector<32x1xf32> to vector<32x32xf32>
    %262 = arith.mulf %257, %261 : vector<32x32xf32>
    %263 = vector.broadcast %243 : vector<1x32xf32> to vector<32x32xf32>
    %264 = arith.mulf %262, %263 : vector<32x32xf32>
    %265 = vector.broadcast %244 : vector<1x32xf32> to vector<32x32xf32>
    %266 = arith.addf %264, %265 : vector<32x32xf32>
    %c0_81 = arith.constant 0 : index
    %c0_82 = arith.constant 0 : index
    %267 = vector.load %arg4[%c0_81, %c0_82] : memref<32x32xf32, #tpu.memory_space<vmem>>, vector<32x32xf32>
    tpu.vector_store %arg4[%c0_81, %c0_82], %266 {strides = array<i32>} : memref<32x32xf32, #tpu.memory_space<vmem>>, vector<32x32xf32>,
    %c7 = arith.constant 7 : index
    %c0_83 = arith.constant 0 : index
    %268 = tpu.strided_load %arg4[%c7, %c0_83] {strides = array<i32: 8, 1>} : memref<32x32xf32, #tpu.memory_space<vmem>>, vector<4x32xf32>
    %c608 = arith.constant 608 : index
    %c0_84 = arith.constant 0 : index
    %269 = vector.load %arg2[%c608, %c0_84] : memref<664x128xf32, #tpu.memory_space<vmem>>, vector<32x32xf32>
    %cst_85 = arith.constant dense<0.000000e+00> : vector<4x32xf32>
    %270 = tpu.matmul %268, %269, %cst_85 {dimension_numbers = #tpu.dot_dimension_numbers<[1], [0], [0], [1], [0, 0, 1, 1], [], []>} : vector<4x32xf32>, vector<32x32xf32>, vector<4x32xf32> -> vector<4x32xf32>
    %c640 = arith.constant 640 : index
    %c0_86 = arith.constant 0 : index
    %271 = vector.load %arg2[%c640, %c0_86] : memref<664x128xf32, #tpu.memory_space<vmem>>, vector<1x32xf32>
    %272 = vector.broadcast %271 : vector<1x32xf32> to vector<4x32xf32>
    %273 = arith.addf %270, %272 : vector<4x32xf32>
    %274 = math.tanh %273 : vector<4x32xf32>
    %c648 = arith.constant 648 : index
    %c0_87 = arith.constant 0 : index
    %275 = vector.load %arg2[%c648, %c0_87] : memref<664x128xf32, #tpu.memory_space<vmem>>, vector<1x32xf32>
    %276 = vector.broadcast %275 : vector<1x32xf32> to vector<4x32xf32>
    %277 = arith.mulf %274, %276 : vector<4x32xf32>
    %cst_88 = arith.constant dense<0.000000e+00> : vector<4xf32>
    %278 = vector.multi_reduction <add>, %277, %cst_88 [1] : vector<4x32xf32> to vector<4xf32>
    %279 = vector.shape_cast %278 : vector<4xf32> to vector<4x1xf32>
    %c656 = arith.constant 656 : index
    %c0_89 = arith.constant 0 : index
    %280 = vector.load %arg2[%c656, %c0_89] : memref<664x128xf32, #tpu.memory_space<vmem>>, vector<1x1xf32>
    %281 = vector.broadcast %280 : vector<1x1xf32> to vector<4x1xf32>
    %282 = arith.addf %279, %281 : vector<4x1xf32>
    %283 = tpu.iota {dimensions = array<i32: 0>} : vector<2x4xi32>
    %284 = tpu.iota {dimensions = array<i32: 1>} : vector<2x4xi32>
    %c2_i32 = arith.constant 2 : i32
    %285 = vector.broadcast %c2_i32 : i32 to vector<2x4xi32>
    %286 = arith.muli %283, %285 : vector<2x4xi32>
    %287 = arith.cmpi sge, %284, %286 : vector<2x4xi32>
    %c1_i32 = arith.constant 1 : i32
    %288 = vector.broadcast %c1_i32 : i32 to vector<2x4xi32>
    %289 = arith.addi %283, %288 : vector<2x4xi32>
    %c2_i32_90 = arith.constant 2 : i32
    %290 = vector.broadcast %c2_i32_90 : i32 to vector<2x4xi32>
    %291 = arith.muli %289, %290 : vector<2x4xi32>
    %292 = arith.cmpi slt, %284, %291 : vector<2x4xi32>
    %293 = arith.andi %287, %292 : vector<2x4xi1>
    %294 = arith.extui %293 : vector<2x4xi1> to vector<2x4xi32>
    %295 = arith.sitofp %294 : vector<2x4xi32> to vector<2x4xf32>
    %296 = vector.shape_cast %282 : vector<4x1xf32> to vector<1x4x1xf32>
    %cst_91 = arith.constant dense<0xFF800000> : vector<1xf32>
    %297 = vector.multi_reduction <maximumf>, %296, %cst_91 [1, 2] : vector<1x4x1xf32> to vector<1xf32>
    %298 = vector.shape_cast %297 : vector<1xf32> to vector<1x1x1xf32>
    %299 = vector.extract %298[0, 0, 0] : f32 from vector<1x1x1xf32>
    %300 = vector.broadcast %299 : f32 to vector<4x1xf32>
    %301 = arith.subf %282, %300 : vector<4x1xf32>
    %302 = math.exp %301 : vector<4x1xf32>
    %cst_92 = arith.constant dense<0.000000e+00> : vector<2x1xf32>
    %303 = tpu.matmul %295, %302, %cst_92 {dimension_numbers = #tpu.dot_dimension_numbers<[1], [0], [0], [1], [0, 0, 1, 1], [], []>} : vector<2x4xf32>, vector<4x1xf32>, vector<2x1xf32> -> vector<2x1xf32>
    %304 = math.log %303 : vector<2x1xf32>
    %305 = vector.broadcast %299 : f32 to vector<2x1xf32>
    %306 = arith.addf %304, %305 : vector<2x1xf32>
    %c0_i32 = arith.constant 0 : i32
    %307 = vector.broadcast %c0_i32 : i32 to vector<2x4xi32>
    %c0_i32_93 = arith.constant 0 : i32
    %308 = vector.broadcast %c0_i32_93 : i32 to vector<2x4xi32>
    %309 = arith.cmpi eq, %283, %308 : vector<2x4xi32>
    %c0_94 = arith.constant 0 : index
    %310 = memref.load %arg0[%c0_94] : memref<2xi32, #tpu.memory_space<smem>>
    %311 = vector.broadcast %310 : i32 to vector<2x4xi32>
    %312 = arith.select %309, %311, %307 : vector<2x4xi1>, vector<2x4xi32>
    %c1_i32_95 = arith.constant 1 : i32
    %313 = vector.broadcast %c1_i32_95 : i32 to vector<2x4xi32>
    %314 = arith.cmpi eq, %283, %313 : vector<2x4xi32>
    %c1 = arith.constant 1 : index
    %315 = memref.load %arg0[%c1] : memref<2xi32, #tpu.memory_space<smem>>
    %316 = vector.broadcast %315 : i32 to vector<2x4xi32>
    %317 = arith.select %314, %316, %312 : vector<2x4xi1>, vector<2x4xi32>
    %c2_i32_96 = arith.constant 2 : i32
    %318 = vector.broadcast %c2_i32_96 : i32 to vector<2x4xi32>
    %319 = arith.muli %283, %318 : vector<2x4xi32>
    %320 = arith.addi %319, %317 : vector<2x4xi32>
    %321 = arith.cmpi eq, %284, %320 : vector<2x4xi32>
    %322 = arith.extui %321 : vector<2x4xi1> to vector<2x4xi32>
    %323 = arith.sitofp %322 : vector<2x4xi32> to vector<2x4xf32>
    %cst_97 = arith.constant dense<0.000000e+00> : vector<2x1xf32>
    %324 = tpu.matmul %323, %282, %cst_97 {dimension_numbers = #tpu.dot_dimension_numbers<[1], [0], [0], [1], [0, 0, 1, 1], [], []>} : vector<2x4xf32>, vector<4x1xf32>, vector<2x1xf32> -> vector<2x1xf32>
    %325 = arith.subf %306, %324 : vector<2x1xf32>
    %326 = vector.shape_cast %325 : vector<2x1xf32> to vector<1x2x1xf32>
    %cst_98 = arith.constant dense<0.000000e+00> : vector<1xf32>
    %327 = vector.multi_reduction <add>, %326, %cst_98 [1, 2] : vector<1x2x1xf32> to vector<1xf32>
    %328 = vector.shape_cast %327 : vector<1xf32> to vector<1x1x1xf32>
    %329 = vector.extract %328[0, 0, 0] : f32 from vector<1x1x1xf32>
    %cst_99 = arith.constant 2.000000e+00 : f32
    %330 = arith.divf %329, %cst_99 : f32
    %cst_100 = arith.constant 0.000000e+00 : f32
    %331 = vector.broadcast %cst_100 : f32 to vector<8x128xf32>
    %c0_101 = arith.constant 0 : index
    %c0_102 = arith.constant 0 : index
    %332 = vector.load %arg3[%c0_101, %c0_102] : memref<8x128xf32, #tpu.memory_space<vmem>>, vector<8x128xf32>
    tpu.vector_store %arg3[%c0_101, %c0_102], %331 {strides = array<i32>} : memref<8x128xf32, #tpu.memory_space<vmem>>, vector<8x128xf32>,
    %c0_103 = arith.constant 0 : index
    %c0_104 = arith.constant 0 : index
    %333 = vector.load %arg3[%c0_103, %c0_104] : memref<8x128xf32, #tpu.memory_space<vmem>>, vector<4x1xf32>
    tpu.vector_store %arg3[%c0_103, %c0_104], %282 {strides = array<i32>} : memref<8x128xf32, #tpu.memory_space<vmem>>, vector<4x1xf32>,
    %334 = vector.broadcast %330 : f32 to vector<1x1xf32>
    %c4 = arith.constant 4 : index
    %c0_105 = arith.constant 0 : index
    %335 = vector.load %arg3[%c4, %c0_105] : memref<8x128xf32, #tpu.memory_space<vmem>>, vector<1x1xf32>
    tpu.vector_store %arg3[%c4, %c0_105], %334 {strides = array<i32>} : memref<8x128xf32, #tpu.memory_space<vmem>>, vector<1x1xf32>,
    return
  }
}

</mosaic_0001>

<bundles_post_ra>
// kernel: tpu_custom_call.1
= control target key start
LH: loop header
LB: loop body
LE: loop exit
PB: predicated region body
PF: predicated region fallthrough
CT: control target
= control target key end

     0   :  { %8 = vsyncpa [#allocation6], 0  ;;  %s9775_s0 = inlined_call_operand.hbm [shape: s32[2], index: 0, kind: input, shape index: {}]   ;;  %s9776_s1 = inlined_call_operand.hbm [shape: f32[32,32], index: 1, kind: input, shape index: {}]   ;;  %s9777_s2 = inlined_call_operand.hbm [shape: f32[664,128], index: 2, kind: input, shape index: {}]   ;;  %s9778_s3 = inlined_call_operand.hbm [shape: f32[8,128], index: 3, kind: output, shape index: {}]  }
   0x1   :  { %9 = vsyncpa [#allocation4], 0 }
   0x2   :  { %10 = vsyncpa [#allocation9], 0 }
   0x3   :  { %11 = vsyncpa [#allocation5], 0  ;;  %s8624_s12 = smov [#allocation3]   ;;  %s8625_s15 = smov [#allocation7]  }
   0x4   :  { %19 = dma.hbm_to_smem %s9775_s0, 16, %s8624_s12, [#allocation6]  }
   0x5   :  { %s25_s16 = sshll.u32 %s8625_s15, 4  ;;  %s26_s16 = int_to_ptr.vmem [resolvable:$true] %s25_s16 }
   0x6   :  { %s8564_s17 = scalar_lea.vmem %s26_s16, 512  ;;  %p8569_p1 = scmp.lt.s32.totalorder %s26_s16, %s26_s16 }
   0x7   :  { %p8565_p0 = scmp.ne.s32.totalorder %s26_s16, %s8564_s17  ;;  %p8570_p2 = scmp.lt.s32.totalorder %s8564_s17, %s8564_s17 }
   0x9   :  { %p8571_p3 = por %p8570_p2, %p8569_p1 }
   0xb   :  { %p8572_p4 = pnand %p8571_p3, %p8565_p0 }
   0xd   :  { %8575 = shalt.err (!%p8572_p4)
}
   0xe   :  { %s8626_s18 = smov 128   ;;  %s8627_s19 = smov 8  }
   0xf   :  { %31 = dma.hbm_to_vmem [thread:$0]  %s9776_s1, 512, %s26_s16, [#allocation4], %s8626_s18, %s8626_s18, %s8627_s19  }
  0x10   :  { %s8628_s22 = smov [#allocation8]  }
  0x11   :  { %s37_s23 = sshll.u32 %s8628_s22, 4  ;;  %s38_s23 = int_to_ptr.vmem [resolvable:$true] %s37_s23 }
  0x12   :  { %s8584_s0 = scalar_lea.vmem %s38_s23, 10624  ;;  %p8589_p6 = scmp.lt.s32.totalorder %s38_s23, %s38_s23 }
  0x13   :  { %p8585_p5 = scmp.ne.s32.totalorder %s38_s23, %s8584_s0  ;;  %p8590_p7 = scmp.lt.s32.totalorder %s8584_s0, %s8584_s0 }
  0x15   :  { %p8591_p8 = por %p8590_p7, %p8589_p6 }
  0x17   :  { %p8592_p9 = pnand %p8591_p8, %p8585_p5 }
  0x19   :  { %8595 = shalt.err (!%p8592_p9)
}
  0x1a   :  { %43 = dma.hbm_to_vmem [thread:$0]  %s9777_s2, 10624, %s38_s23, [#allocation9], %s8626_s18, %s8626_s18, %s8627_s19  }
  0x1b   :  { %8616 = dma.done.wait [#allocation6], 16  }
  0x1c   :  { %8617 = vsyncadd [#allocation6], 4294967280 }
  0x1d   :  { %8618 = dma.done.wait [#allocation4], 512  }
  0x1e   :  { %8619 = vsyncadd [#allocation4], 4294966784 }
  0x1f   :  { %8620 = dma.done.wait [#allocation9], 10624  }
  0x20   :  { %8621 = vsyncadd [#allocation9], 4294956672 }
  0x21   :  { %53 = sfence }
  0x22   :  { %v61_v0 = vld [vmem:[#allocation8 + $0x18] sm:$0xff]  ;;  %v168_v1 = vld [vmem:[#allocation8 + $0x40] sm:$0xff]  ;;  %v60_v2 = vld [vmem:[#allocation8 + $0x10] sm:$0xff]  ;;  %vm67_vm0 = vcmask 261120   ;;  %v8629_v16 = vmov 0.0   ;;  %vm8630_vm1 = vmmov 0  }
  0x23   :  { %7818 = vmatprep.subr.mxu0 %v61_v0  ;;  %7832 = vmatprep.subr.mxu1 %v168_v1  ;;  %v167_v3 = vld [vmem:[#allocation8 + $0x38] sm:$0xff]  ;;  %v59_v4 = vld [vmem:[#allocation8 + $0x8] sm:$0xff]  ;;  %v166_v5 = vld [vmem:[#allocation8 + $0x30] sm:$0xff]  ;;  %7380 = vst [vmem:[#allocation10] sm:$0xff] %v8629_v16  ;;  %vm449_vm2 = vcmask 64512   ;;  %s8631_s1 = smov 120  }
  0x24   :  { %7819 = vmatpush3.msra.mxu0 %v61_v0  ;;  %7833 = vmatpush3.msra.mxu1 %v168_v1  ;;  %v58_v6 = vld [vmem:[#allocation8] sm:$0xff]  ;;  %v165_v7 = vld [vmem:[#allocation8 + $0x28] sm:$0xff]  ;;  %v56_v10 = vld [vmem:[#allocation7 + $0x10] sm:$0xff]  ;;  %s8632_s2 = smov 112   ;;  %s8633_s26 = smov 104   ;;  %vm3030_vm3 = vcmask 130048  }
  0x25   :  { %7820 = vmatprep.subr.mxu0 %v60_v2  ;;  %7834 = vmatprep.subr.mxu1 %v167_v3  ;;  %v54_v8 = vld [vmem:[#allocation7] sm:$0xff]  ;;  %v55_v9 = vld [vmem:[#allocation7 + $0x8] sm:$0xff]  ;;  %v57_v12 = vld [vmem:[#allocation7 + $0x18] sm:$0xff]  ;;  %s8634_s27 = smov 16   ;;  %s8635_s28 = smov 24   ;;  %vm3035_vm4 = vcmask 195584  }
  0x26   :  { %7821 = vmatpush3.msra.mxu0 %v60_v2  ;;  %7835 = vmatpush3.msra.mxu1 %v167_v3  ;;  %v262_v11 = vld [vmem:[#allocation8 + $0x68] sm:$0xff]  ;;  %v261_v13 = vld [vmem:[#allocation8 + $0x60] sm:$0xff]  ;;  %v260_v14 = vld [vmem:[#allocation8 + $0x58] sm:$0xff]  ;;  %vm3384_vm5 = vcmask 523264   ;;  %vm7159_vm6 = vcmask 257024   ;;  %vm7181_vm7 = vcmask 3072  }
  0x27   :  { %7822 = vmatprep.subr.mxu0 %v59_v4  ;;  %7836 = vmatprep.subr.mxu1 %v166_v5  ;;  %v259_v15 = vld [vmem:[#allocation8 + $0x50] sm:$0xff]  ;;  %v7402_v17 = vld [vmem:[#allocation8 + $0x20] ss:$0 sm:$0xff]  ;;  %v7407_v18 = vld [vmem:[#allocation8 + $0x48] ss:$0 sm:$0xff]  ;;  %s7278_s29 = sld [smem:[#allocation3]] }
  0x28   :  { %7823 = vmatpush3.msra.mxu0 %v59_v4  ;;  %7837 = vmatpush3.msra.mxu1 %v166_v5  ;;  %v7412_v36 = vld [vmem:[#allocation8 + $0x70] ss:$0 sm:$0xff]  ;;  %s7573_s4 = sld [smem:[#allocation3 + $0x1]]  ;;  %vm7200_vm13 = vcmask 1043456   ;;  %vm7196_vm14 = vcmask 31744   ;;  %s8636_s5 = smov [#allocation10]  }
  0x29   :  { %7824 = vmatprep.subr.mxu0 %v58_v6  ;;  %7838 = vmatprep.subr.mxu1 %v165_v7  ;;  %s7391_s6 = sshll.u32 %s8636_s5, 4  ;;  %s7392_s6 = int_to_ptr.vmem [resolvable:$true] %s7391_s6 }
  0x2a   :  { %7825 = vmatpush3.msra.mxu0 %v58_v6  ;;  %7826 = vmatprep.mubr.msk.f32.mxu0 %vm67_vm0, %v54_v8  ;;  %s8596_s9 = scalar_lea.vmem %s7392_s6, 128  ;;  %p8601_p11 = scmp.lt.s32.totalorder %s7392_s6, %s7392_s6 }
  0x2b   :  { %7839 = vmatpush3.msra.mxu1 %v165_v7  ;;  %7840 = vmatprep.mubr.msk.f32.mxu1 %vm67_vm0, %v54_v8  ;;  %p8597_p10 = scmp.ne.s32.totalorder %s7392_s6, %s8596_s9  ;;  %p8602_p12 = scmp.lt.s32.totalorder %s8596_s9, %s8596_s9 }
  0x2c   :  { %7827 = vmatmul.mubr.msk.f32.vlgmr.msra.gmra.mxu0 %vm67_vm0, %v55_v9  ;;  %7841 = vmatmul.mubr.msk.f32.vlgmr.msra.gmra.mxu1 %vm67_vm0, %v55_v9 }
  0x2d   :  { %7843 = vmatprep.mubr.msk.f32.mxu1 %vm67_vm0, %v56_v10  ;;  %7829 = vmatprep.mubr.msk.f32.mxu0 %vm67_vm0, %v56_v10  ;;  %p8603_p13 = por %p8602_p12, %p8601_p11 }
  0x2e   :  { %7846 = vmatprep.subr.mxu0 %v262_v11  ;;  %7860 = vmatprep.subr.mxu1 %v8629_v16 }
  0x2f   :  { %7847 = vmatpush3.msra.mxu0 %v262_v11  ;;  %p8604_p0 = pnand %p8603_p13, %p8597_p10 }
  0x30   :  { %7844 = vmatmul.mubr.msk.f32.gmra.mxu1 %vm67_vm0, %v57_v12  ;;  %7830 = vmatmul.mubr.msk.f32.gmra.mxu0 %vm67_vm0, %v57_v12 }
  0x31   :  { %7848 = vmatprep.subr.mxu0 %v261_v13  ;;  %7854 = vmatprep.mubr.msk.f32.mxu0 %vm67_vm0, %v54_v8 }
  0x32   :  { %7849 = vmatpush3.msra.mxu0 %v261_v13  ;;  %7862 = vmatprep.mubr.msk.f32.mxu1 %vm8630_vm1, %v8629_v16 }
  0x33   :  { %7850 = vmatprep.subr.mxu0 %v260_v14 }
  0x34   :  { %7851 = vmatpush3.msra.mxu0 %v260_v14 }
  0x35   :  { %7852 = vmatprep.subr.mxu0 %v259_v15 }
  0x36   :  { %7853 = vmatpush3.msra.mxu0 %v259_v15 }
  0x37   :  { %7855 = vmatmul.mubr.msk.f32.vlgmr.msra.gmra.mxu0 %vm67_vm0, %v55_v9  ;;  %7870 = vmatprep.subr.mxu0 %v8629_v16 }
  0x38   :  { %7857 = vmatprep.mubr.msk.f32.mxu0 %vm67_vm0, %v56_v10 }
  0x3b   :  { %7858 = vmatmul.mubr.msk.f32.gmra.mxu0 %vm67_vm0, %v57_v12 }
  0x3c   :  { %7872 = vmatprep.mubr.msk.f32.mxu0 %vm8630_vm1, %v8629_v16 }
  0xec   :  { %v7828_v19 = vpop.f32.mrf.mxu0  ;;  %v7842_v20 = vpop.f32.mrf.mxu1 }
  0xed   :  { %v152_v21 = vadd.f32 %v7828_v19, %v7402_v17  ;;  %v246_v22 = vadd.f32 %v7842_v20, %v7407_v18 }
  0xee   :  { %v240_v23 = vpop.f32.mrf.mxu1  ;;  %v146_v24 = vpop.f32.mrf.mxu0 }
  0xef   :  { %v241_v25 = vadd.f32 %v7407_v18, %v240_v23  ;;  %387 = vrot.lane.b32.xlu0 %v246_v22, %s8631_s1  ;;  %359 = vrot.lane.b32.xlu1 %v152_v21, %s8631_s1  ;;  %v147_v26 = vadd.f32 %v7402_v17, %v146_v24 }
  0xf0   :  { %v7845_v27 = vpop.f32.mrf.mxu1  ;;  %v7831_v28 = vpop.f32.mrf.mxu0 }
  0xf1   :  { %7861 = vmatpush3.xpose.msk.msra.mxu1 %vm449_vm2, %v241_v25  ;;  %v256_v33 = vadd.f32 %v7845_v27, %v7407_v18  ;;  %v162_v34 = vadd.f32 %v7831_v28, %v7402_v17 }
  0xf2   :  { %v250_v29 = vpop.f32.mrf.mxu1  ;;  %7865 = vmatprep.subr.mxu1 %v8629_v16  ;;  %v156_v30 = vpop.f32.mrf.mxu0 }
  0xf3   :  { %v251_v31 = vadd.f32 %v7407_v18, %v250_v29  ;;  %385 = vrot.lane.b32.xlu0 %v241_v25, %s8631_s1  ;;  %395 = vrot.lane.b32.xlu1 %v246_v22, %s8632_s2  ;;  %v157_v32 = vadd.f32 %v7402_v17, %v156_v30 }
  0xf4   :  { %7863 = vmatmul.mubr.msk.f32.vlgmr.msra.gmra.mxu1 %vm449_vm2, %v147_v26 }
  0xf5   :  { %7866 = vmatpush3.xpose.msk.msra.mxu1 %vm449_vm2, %v246_v22  ;;  %7871 = vmatpush3.xpose.msk.msra.mxu0 %vm449_vm2, %v251_v31 }
  0xf6   :  { %7867 = vmatprep.mubr.msk.f32.mxu1 %vm8630_vm1, %v8629_v16  ;;  %7875 = vmatprep.subr.mxu1 %v8629_v16 }
  0xf7   :  { %393 = vrot.lane.b32.xlu0 %v241_v25, %s8632_s2  ;;  %367 = vrot.lane.b32.xlu1 %v152_v21, %s8632_s2  ;;  %v7856_v35 = vpop.f32.mrf.mxu0 }
  0xf8   :  { %7868 = vmatmul.mubr.msk.f32.vlgmr.msra.gmra.mxu1 %vm449_vm2, %v152_v21  ;;  %7873 = vmatmul.mubr.msk.f32.vlgmr.msra.gmra.mxu0 %vm449_vm2, %v157_v32  ;;  %v8731_v37 = vadd.f32 %v7856_v35, %v7412_v36 }
  0xf9   :  { %7876 = vmatpush3.xpose.msk.msra.mxu1 %vm449_vm2, %v256_v33  ;;  %7877 = vmatprep.mubr.msk.f32.mxu1 %vm8630_vm1, %v8629_v16  ;;  %v334_v38 = vpop.f32.mrf.mxu0 }
  0xfa   :  { %7885 = vmatprep.subr.mxu1 %v8629_v16  ;;  %7880 = vmatprep.subr.mxu0 %v8629_v16  ;;  %v8735_v39 = vadd.f32 %v7412_v36, %v334_v38 }
  0xfb   :  { %403 = vrot.lane.b32.xlu1 %v246_v22, %s8633_s26  ;;  %365 = vrot.lane.b32.xlu0 %v147_v26, %s8632_s2  ;;  %v7859_v40 = vpop.f32.mrf.mxu0 }
  0xfc   :  { %7878 = vmatmul.mubr.msk.f32.vlgmr.msra.gmra.mxu1 %vm449_vm2, %v162_v34  ;;  %7882 = vmatprep.mubr.msk.f32.mxu0 %vm8630_vm1, %v8629_v16  ;;  %v8741_v41 = vadd.f32 %v7859_v40, %v7412_v36 }
  0xfd   :  { %7887 = vmatprep.mubr.msk.f32.mxu1 %vm8630_vm1, %v8629_v16  ;;  %v344_v42 = vpop.f32.mrf.mxu0 }
  0xfe   :  { %v8747_v43 = vadd.f32 %v7412_v36, %v344_v42 }
  0xff   :  { %375 = vrot.lane.b32.xlu1 %v152_v21, %s8633_s26  ;;  %401 = vrot.lane.b32.xlu0 %v241_v25, %s8633_s26 }
 0x103   :  { %373 = vrot.lane.b32.xlu0 %v147_v26, %s8633_s26  ;;  %357 = vrot.lane.b32.xlu1 %v147_v26, %s8631_s1 }
 0x107   :  { %389 = vrot.lane.b32.xlu0 %v251_v31, %s8631_s1  ;;  %391 = vrot.lane.b32.xlu1 %v256_v33, %s8631_s1 }
 0x10b   :  { %361 = vrot.lane.b32.xlu0 %v157_v32, %s8631_s1  ;;  %363 = vrot.lane.b32.xlu1 %v162_v34, %s8631_s1 }
 0x10f   :  { %397 = vrot.lane.b32.xlu0 %v251_v31, %s8632_s2  ;;  %399 = vrot.lane.b32.xlu1 %v256_v33, %s8632_s2 }
 0x113   :  { %369 = vrot.lane.b32.xlu0 %v157_v32, %s8632_s2  ;;  %371 = vrot.lane.b32.xlu1 %v162_v34, %s8632_s2 }
 0x117   :  { %405 = vrot.lane.b32.xlu0 %v251_v31, %s8633_s26  ;;  %407 = vrot.lane.b32.xlu1 %v256_v33, %s8633_s26 }
 0x11b   :  { %377 = vrot.lane.b32.xlu0 %v157_v32, %s8633_s26  ;;  %379 = vrot.lane.b32.xlu1 %v162_v34, %s8633_s26 }
 0x11f   :  { %427 = vrot.lane.b32.xlu1 %v8731_v37, %s8632_s2  ;;  %415 = vrot.lane.b32.xlu0 %v8731_v37, %s8631_s1 }
 0x123   :  { %413 = vrot.lane.b32.xlu1 %v8735_v39, %s8631_s1  ;;  %425 = vrot.lane.b32.xlu0 %v8735_v39, %s8632_s2 }
 0x127   :  { %419 = vrot.lane.b32.xlu1 %v8741_v41, %s8631_s1 }
 0x12b   :  { %417 = vrot.lane.b32.xlu1 %v8747_v43, %s8631_s1 }
 0x161   :  { %v388_v44 = vpop.permute.xlu0 %387  ;;  %v360_v45 = vpop.permute.xlu1 %359 }
 0x162   :  { %7886 = vmatpush3.xpose.msk.msra.mxu1 %vm449_vm2, %v388_v44 }
 0x163   :  { %7895 = vmatprep.subr.mxu1 %v8629_v16 }
 0x165   :  { %v386_v46 = vpop.permute.xlu0 %385  ;;  %v396_v47 = vpop.permute.xlu1 %395  ;;  %7888 = vmatmul.mubr.msk.f32.vlgmr.msra.gmra.mxu1 %vm449_vm2, %v360_v45 }
 0x166   :  { %7881 = vmatpush3.xpose.msk.msra.mxu0 %vm449_vm2, %v386_v46  ;;  %7897 = vmatprep.mubr.msk.f32.mxu1 %vm8630_vm1, %v8629_v16 }
 0x167   :  { %7890 = vmatprep.subr.mxu0 %v8629_v16 }
 0x169   :  { %v394_v48 = vpop.permute.xlu0 %393  ;;  %v368_v49 = vpop.permute.xlu1 %367 }
 0x16d   :  { %v404_v50 = vpop.permute.xlu1 %403  ;;  %v366_v51 = vpop.permute.xlu0 %365 }
 0x171   :  { %v376_v52 = vpop.permute.xlu1 %375  ;;  %v402_v53 = vpop.permute.xlu0 %401 }
 0x175   :  { %v374_v54 = vpop.permute.xlu0 %373  ;;  %v358_v55 = vpop.permute.xlu1 %357 }
 0x176   :  { %7883 = vmatmul.mubr.msk.f32.vlgmr.msra.gmra.mxu0 %vm449_vm2, %v358_v55 }
 0x177   :  { %7892 = vmatprep.mubr.msk.f32.mxu0 %vm8630_vm1, %v8629_v16 }
 0x179   :  { %v390_v56 = vpop.permute.xlu0 %389  ;;  %v392_v57 = vpop.permute.xlu1 %391 }
 0x17a   :  { %7891 = vmatpush3.xpose.msk.msra.mxu0 %vm449_vm2, %v390_v56  ;;  %7896 = vmatpush3.xpose.msk.msra.mxu1 %vm449_vm2, %v392_v57 }
 0x17b   :  { %7900 = vmatprep.subr.mxu0 %v8629_v16  ;;  %7905 = vmatprep.subr.mxu1 %v8629_v16 }
 0x17d   :  { %v362_v58 = vpop.permute.xlu0 %361  ;;  %v364_v59 = vpop.permute.xlu1 %363 }
 0x17e   :  { %7893 = vmatmul.mubr.msk.f32.vlgmr.msra.gmra.mxu0 %vm449_vm2, %v362_v58  ;;  %7898 = vmatmul.mubr.msk.f32.vlgmr.msra.gmra.mxu1 %vm449_vm2, %v364_v59 }
 0x17f   :  { %7901 = vmatpush3.xpose.msk.msra.mxu0 %vm449_vm2, %v394_v48  ;;  %7906 = vmatpush3.xpose.msk.msra.mxu1 %vm449_vm2, %v396_v47 }
 0x180   :  { %7902 = vmatprep.mubr.msk.f32.mxu0 %vm8630_vm1, %v8629_v16  ;;  %7910 = vmatprep.subr.mxu0 %v8629_v16 }
 0x181   :  { %v398_v60 = vpop.permute.xlu0 %397  ;;  %v400_v61 = vpop.permute.xlu1 %399  ;;  %7907 = vmatprep.mubr.msk.f32.mxu1 %vm8630_vm1, %v8629_v16  ;;  %7915 = vmatprep.subr.mxu1 %v8629_v16 }
 0x182   :  { %7903 = vmatmul.mubr.msk.f32.vlgmr.msra.gmra.mxu0 %vm449_vm2, %v366_v51  ;;  %7908 = vmatmul.mubr.msk.f32.vlgmr.msra.gmra.mxu1 %vm449_vm2, %v368_v49 }
 0x183   :  { %7911 = vmatpush3.xpose.msk.msra.mxu0 %vm449_vm2, %v398_v60  ;;  %7916 = vmatpush3.xpose.msk.msra.mxu1 %vm449_vm2, %v400_v61 }
 0x184   :  { %7912 = vmatprep.mubr.msk.f32.mxu0 %vm8630_vm1, %v8629_v16  ;;  %7920 = vmatprep.subr.mxu0 %v8629_v16 }
 0x185   :  { %v370_v62 = vpop.permute.xlu0 %369  ;;  %v372_v63 = vpop.permute.xlu1 %371  ;;  %7917 = vmatprep.mubr.msk.f32.mxu1 %vm8630_vm1, %v8629_v16  ;;  %7925 = vmatprep.subr.mxu1 %v8629_v16 }
 0x186   :  { %7913 = vmatmul.mubr.msk.f32.vlgmr.msra.gmra.mxu0 %vm449_vm2, %v370_v62  ;;  %7918 = vmatmul.mubr.msk.f32.vlgmr.msra.gmra.mxu1 %vm449_vm2, %v372_v63 }
 0x187   :  { %7921 = vmatpush3.xpose.msk.msra.mxu0 %vm449_vm2, %v402_v53  ;;  %7926 = vmatpush3.xpose.msk.msra.mxu1 %vm449_vm2, %v404_v50 }
 0x188   :  { %7922 = vmatprep.mubr.msk.f32.mxu0 %vm8630_vm1, %v8629_v16  ;;  %7930 = vmatprep.subr.mxu0 %v8629_v16 }
 0x189   :  { %v406_v0 = vpop.permute.xlu0 %405  ;;  %v408_v1 = vpop.permute.xlu1 %407  ;;  %7927 = vmatprep.mubr.msk.f32.mxu1 %vm8630_vm1, %v8629_v16  ;;  %7935 = vmatprep.subr.mxu1 %v8629_v16 }
 0x18a   :  { %7923 = vmatmul.mubr.msk.f32.vlgmr.msra.gmra.mxu0 %vm449_vm2, %v374_v54  ;;  %7928 = vmatmul.mubr.msk.f32.vlgmr.msra.gmra.mxu1 %vm449_vm2, %v376_v52 }
 0x18b   :  { %7931 = vmatpush3.xpose.msk.msra.mxu0 %vm449_vm2, %v406_v0  ;;  %7936 = vmatpush3.xpose.msk.msra.mxu1 %vm449_vm2, %v408_v1 }
 0x18c   :  { %7932 = vmatprep.mubr.msk.f32.mxu0 %vm8630_vm1, %v8629_v16  ;;  %7937 = vmatprep.mubr.msk.f32.mxu1 %vm8630_vm1, %v8629_v16 }
 0x18d   :  { %v378_v2 = vpop.permute.xlu0 %377  ;;  %v380_v3 = vpop.permute.xlu1 %379  ;;  %7940 = vmatprep.subr.mxu0 %v8629_v16  ;;  %7945 = vmatprep.subr.mxu1 %v8629_v16 }
 0x18e   :  { %7933 = vmatmul.mubr.msk.f32.vlgmr.msra.gmra.mxu0 %vm449_vm2, %v378_v2  ;;  %7938 = vmatmul.mubr.msk.f32.vlgmr.msra.gmra.mxu1 %vm449_vm2, %v380_v3 }
 0x18f   :  { %7941 = vmatpush3.msra.mxu0 %v8735_v39  ;;  %7946 = vmatpush3.msra.mxu1 %v8731_v37 }
 0x190   :  { %7947 = vmatprep.mubr.msk.f32.mxu1 %vm8630_vm1, %v8629_v16  ;;  %7955 = vmatprep.subr.mxu1 %v8629_v16 }
 0x191   :  { %7942 = vmatprep.mubr.msk.f32.mxu0 %vm8630_vm1, %v8629_v16  ;;  %7950 = vmatprep.subr.mxu0 %v8629_v16  ;;  %v8877_v56 = vpop.permute.xlu1 %427  ;;  %v8879_v57 = vpop.permute.xlu0 %415 }
 0x195   :  { %v8881_v58 = vpop.permute.xlu1 %413  ;;  %v8885_v59 = vpop.permute.xlu0 %425 }
 0x199   :  { %v8887_v60 = vpop.permute.xlu1 %419 }
 0x19d   :  { %v8891_v62 = vpop.permute.xlu1 %417 }
 0x1b4   :  { %v8815_v4 = vpop.f32.mrf.mxu1 }
 0x1b5   :  { %v1634_v5 = vsel %vm449_vm2, %v8815_v4, -inf }
 0x1b6   :  { %1635 = vmax.xlane.f32.xlu0 %v1634_v5  ;;  %v7864_v6 = vpop.f32.mrf.mxu1 }
 0x1b8   :  { %v8819_v7 = vpop.f32.mrf.mxu1  ;;  %v8821_v8 = vpop.f32.mrf.mxu0 }
 0x1b9   :  { %v1640_v9 = vsel %vm449_vm2, %v8821_v8, -inf  ;;  %v1637_v10 = vsel %vm449_vm2, %v8819_v7, -inf }
 0x1ba   :  { %1641 = vmax.xlane.f32.xlu0 %v1640_v9  ;;  %1638 = vmax.xlane.f32.xlu1 %v1637_v10  ;;  %v7869_v11 = vpop.f32.mrf.mxu1  ;;  %v7874_v12 = vpop.f32.mrf.mxu0 }
 0x1bc   :  { %v8827_v13 = vpop.f32.mrf.mxu1 }
 0x1bd   :  { %v1643_v14 = vsel %vm449_vm2, %v8827_v13, -inf }
 0x1be   :  { %1644 = vmax.xlane.f32.xlu0 %v1643_v14  ;;  %v7879_v15 = vpop.f32.mrf.mxu1 }
 0x225   :  { %v8831_v17 = vpop.f32.mrf.mxu1 }
 0x226   :  { %v1649_v18 = vsel %vm449_vm2, %v8831_v17, -inf }
 0x227   :  { %1650 = vmax.xlane.f32.xlu0 %v1649_v18  ;;  %v7889_v19 = vpop.f32.mrf.mxu1 }
 0x236   :  { %v8835_v20 = vpop.f32.mrf.mxu0 }
 0x237   :  { %v1646_v21 = vsel %vm449_vm2, %v8835_v20, -inf }
 0x238   :  { %v7884_v22 = vpop.f32.mrf.mxu0  ;;  %1647 = vmax.xlane.f32.xlu1 %v1646_v21 }
 0x23e   :  { %v8839_v23 = vpop.f32.mrf.mxu0  ;;  %v8841_v24 = vpop.f32.mrf.mxu1 }
 0x23f   :  { %v1652_v25 = vsel %vm449_vm2, %v8839_v23, -inf  ;;  %v1655_v26 = vsel %vm449_vm2, %v8841_v24, -inf  ;;  %v1636_v61 = vpop.xlane.xlu0 %1635 }
 0x240   :  { %v7894_v27 = vpop.f32.mrf.mxu0  ;;  %1653 = vmax.xlane.f32.xlu1 %v1652_v25  ;;  %1656 = vmax.xlane.f32.xlu0 %v1655_v26  ;;  %v7899_v28 = vpop.f32.mrf.mxu1  ;;  %v1682_v12 = vsub.f32 %v8815_v4, %v1636_v61 }
 0x242   :  { %v8847_v29 = vpop.f32.mrf.mxu0  ;;  %v8849_v30 = vpop.f32.mrf.mxu1 }
 0x243   :  { %v1658_v31 = vsel %vm449_vm2, %v8847_v29, -inf  ;;  %v1661_v32 = vsel %vm449_vm2, %v8849_v30, -inf  ;;  %v1642_v63 = vpop.xlane.xlu0 %1641  ;;  %v1639_v0 = vpop.xlane.xlu1 %1638 }
 0x244   :  { %v7904_v33 = vpop.f32.mrf.mxu0  ;;  %1659 = vmax.xlane.f32.xlu1 %v1658_v31  ;;  %1662 = vmax.xlane.f32.xlu0 %v1661_v32  ;;  %v7909_v34 = vpop.f32.mrf.mxu1  ;;  %v1683_v1 = vsub.f32 %v8819_v7, %v1639_v0  ;;  %v1684_v14 = vsub.f32 %v8821_v8, %v1642_v63 }
 0x246   :  { %v8855_v35 = vpop.f32.mrf.mxu0  ;;  %v8857_v36 = vpop.f32.mrf.mxu1  ;;  %v1700_v3 = vmul.f32 1.442695, %v1683_v1  ;;  %v1702_v15 = vmul.f32 1.442695, %v1684_v14 }
 0x247   :  { %v1664_v38 = vsel %vm449_vm2, %v8855_v35, -inf  ;;  %v1667_v40 = vsel %vm449_vm2, %v8857_v36, -inf  ;;  %v1645_v2 = vpop.xlane.xlu0 %1644 }
 0x248   :  { %v7914_v42 = vpop.f32.mrf.mxu0  ;;  %1665 = vmax.xlane.f32.xlu1 %v1664_v38  ;;  %1668 = vmax.xlane.f32.xlu0 %v1667_v40  ;;  %v7919_v44 = vpop.f32.mrf.mxu1  ;;  %v1685_v5 = vsub.f32 %v8827_v13, %v1645_v2  ;;  %8360 = vpow2.f32 %v1700_v3  ;;  %v1698_v13 = vmul.f32 1.442695, %v1682_v12 }
 0x24a   :  { %v8863_v45 = vpop.f32.mrf.mxu0  ;;  %v8865_v46 = vpop.f32.mrf.mxu1  ;;  %v1704_v6 = vmul.f32 1.442695, %v1685_v5 }
 0x24b   :  { %v1670_v47 = vsel %vm449_vm2, %v8863_v45, -inf  ;;  %v1673_v48 = vsel %vm449_vm2, %v8865_v46, -inf }
 0x24c   :  { %v7924_v49 = vpop.f32.mrf.mxu0  ;;  %1671 = vmax.xlane.f32.xlu1 %v1670_v47  ;;  %1674 = vmax.xlane.f32.xlu0 %v1673_v48  ;;  %v7929_v50 = vpop.f32.mrf.mxu1  ;;  %8362 = vpow2.f32 %v1704_v6 }
 0x24d   :  { %8364 = vpow2.f32 %v1698_v13 }
 0x24e   :  { %v8871_v51 = vpop.f32.mrf.mxu0  ;;  %v8873_v52 = vpop.f32.mrf.mxu1  ;;  %8366 = vpow2.f32 %v1702_v15 }
 0x24f   :  { %v1679_v53 = vsel %vm449_vm2, %v8873_v52, -inf  ;;  %v1676_v9 = vsel %vm449_vm2, %v8871_v51, -inf }
 0x250   :  { %v7934_v54 = vpop.f32.mrf.mxu0  ;;  %1680 = vmax.xlane.f32.xlu0 %v1679_v53  ;;  %v7939_v55 = vpop.f32.mrf.mxu1 }
 0x255   :  { %v8899_v10 = vpop.eup %8360 }
 0x259   :  { %v8903_v11 = vpop.eup %8362 }
 0x25a   :  { %v1739_v7 = vsel %vm449_vm2, %v8903_v11, 0.0  ;;  %v8912_v21 = vpop.eup %8364 }
 0x25b   :  { %v1730_v25 = vsel %vm449_vm2, %v8912_v21, 0.0  ;;  %v8916_v26 = vpop.eup %8366 }
 0x25d   :  { %431 = vrot.lane.b32.xlu1 %v8741_v41, %s8632_s2 }
 0x266   :  { %429 = vrot.lane.b32.xlu0 %v8747_v43, %s8632_s2 }
 0x26a   :  { %437 = vrot.lane.b32.xlu0 %v8735_v39, %s8633_s26  ;;  %v1733_v39 = vsel %vm449_vm2, %v8899_v10, 0.0 }
 0x281   :  { %1677 = vmax.xlane.f32.xlu1 %v1676_v9 }
 0x289   :  { %1734 = vadd.xlane.f32.xlu0 %v1733_v39 }
 0x28d   :  { %1740 = vadd.xlane.f32.xlu0 %v1739_v7 }
 0x292   :  { %439 = vrot.lane.b32.xlu1 %v8731_v37, %s8633_s26  ;;  %v1736_v37 = vsel %vm449_vm2, %v8916_v26, 0.0 }
 0x2b0   :  { %v1651_v18 = vpop.xlane.xlu0 %1650 }
 0x2b1   :  { %v1687_v19 = vsub.f32 %v8831_v17, %v1651_v18 }
 0x2b3   :  { %v1708_v22 = vmul.f32 1.442695, %v1687_v19 }
 0x2b5   :  { %8368 = vpow2.f32 %v1708_v22 }
 0x2b6   :  { %1731 = vadd.xlane.f32.xlu1 %v1730_v25 }
 0x2ba   :  { %1737 = vadd.xlane.f32.xlu1 %v1736_v37 }
 0x2c1   :  { %v1648_v4 = vpop.xlane.xlu1 %1647 }
 0x2c2   :  { %v8920_v8 = vpop.eup %8368  ;;  %v1686_v27 = vsub.f32 %v8835_v20, %v1648_v4 }
 0x2c3   :  { %v1745_v17 = vsel %vm449_vm2, %v8920_v8, 0.0 }
 0x2c4   :  { %v1706_v28 = vmul.f32 1.442695, %v1686_v27  ;;  %1746 = vadd.xlane.f32.xlu0 %v1745_v17 }
 0x2c6   :  { %8370 = vpow2.f32 %v1706_v28 }
 0x2c9   :  { %v1654_v31 = vpop.xlane.xlu1 %1653  ;;  %v1657_v32 = vpop.xlane.xlu0 %1656 }
 0x2ca   :  { %v1688_v33 = vsub.f32 %v8839_v23, %v1654_v31  ;;  %v1689_v34 = vsub.f32 %v8841_v24, %v1657_v32 }
 0x2cc   :  { %v1710_v38 = vmul.f32 1.442695, %v1688_v33  ;;  %v1712_v40 = vmul.f32 1.442695, %v1689_v34 }
 0x2cd   :  { %v1660_v42 = vpop.xlane.xlu1 %1659  ;;  %v1663_v44 = vpop.xlane.xlu0 %1662 }
 0x2ce   :  { %8372 = vpow2.f32 %v1710_v38  ;;  %v1690_v47 = vsub.f32 %v8847_v29, %v1660_v42  ;;  %v1691_v20 = vsub.f32 %v8849_v30, %v1663_v44 }
 0x2cf   :  { %8374 = vpow2.f32 %v1712_v40 }
 0x2d0   :  { %v1714_v48 = vmul.f32 1.442695, %v1690_v47  ;;  %v1716_v49 = vmul.f32 1.442695, %v1691_v20 }
 0x2d1   :  { %v1666_v50 = vpop.xlane.xlu1 %1665  ;;  %v1669_v53 = vpop.xlane.xlu0 %1668 }
 0x2d2   :  { %8376 = vpow2.f32 %v1714_v48  ;;  %v1692_v54 = vsub.f32 %v8855_v35, %v1666_v50  ;;  %v1693_v23 = vsub.f32 %v8857_v36, %v1669_v53 }
 0x2d3   :  { %v8931_v24 = vpop.eup %8370  ;;  %8378 = vpow2.f32 %v1716_v49 }
 0x2d4   :  { %v1718_v55 = vmul.f32 1.442695, %v1692_v54  ;;  %v1720_v61 = vmul.f32 1.442695, %v1693_v23  ;;  %v1742_v29 = vsel %vm449_vm2, %v8931_v24, 0.0 }
 0x2d5   :  { %1743 = vadd.xlane.f32.xlu1 %v1742_v29  ;;  %v1672_v30 = vpop.xlane.xlu1 %1671  ;;  %v1675_v63 = vpop.xlane.xlu0 %1674 }
 0x2d6   :  { %8380 = vpow2.f32 %v1718_v55  ;;  %v1694_v0 = vsub.f32 %v8863_v45, %v1672_v30  ;;  %v1695_v1 = vsub.f32 %v8865_v46, %v1675_v63 }
 0x2d7   :  { %8382 = vpow2.f32 %v1720_v61 }
 0x2d8   :  { %v1722_v35 = vmul.f32 1.442695, %v1694_v0  ;;  %v1724_v2 = vmul.f32 1.442695, %v1695_v1 }
 0x2d9   :  { %v1681_v36 = vpop.xlane.xlu0 %1680  ;;  %v8976_v17 = vpop.permute.xlu1 %431 }
 0x2da   :  { %8384 = vpow2.f32 %v1722_v35  ;;  %v1697_v3 = vsub.f32 %v8873_v52, %v1681_v36 }
 0x2db   :  { %v8938_v5 = vpop.eup %8372  ;;  %8386 = vpow2.f32 %v1724_v2 }
 0x2dc   :  { %v8940_v6 = vpop.eup %8374  ;;  %v1728_v9 = vmul.f32 1.442695, %v1697_v3  ;;  %v1748_v39 = vsel %vm449_vm2, %v8938_v5, 0.0 }
 0x2dd   :  { %1749 = vadd.xlane.f32.xlu1 %v1748_v39  ;;  %v1751_v45 = vsel %vm449_vm2, %v8940_v6, 0.0  ;;  %v8978_v28 = vpop.permute.xlu0 %429 }
 0x2de   :  { %8388 = vpow2.f32 %v1728_v9  ;;  %1752 = vadd.xlane.f32.xlu0 %v1751_v45 }
 0x2df   :  { %v8946_v46 = vpop.eup %8376 }
 0x2e0   :  { %v8948_v7 = vpop.eup %8378  ;;  %v1754_v52 = vsel %vm449_vm2, %v8946_v46, 0.0 }
 0x2e1   :  { %1755 = vadd.xlane.f32.xlu1 %v1754_v52  ;;  %v1757_v12 = vsel %vm449_vm2, %v8948_v7, 0.0  ;;  %v8981_v34 = vpop.permute.xlu0 %437 }
 0x2e2   :  { %1758 = vadd.xlane.f32.xlu0 %v1757_v12 }
 0x2e3   :  { %v8954_v13 = vpop.eup %8380 }
 0x2e4   :  { %v8956_v14 = vpop.eup %8382  ;;  %v1760_v15 = vsel %vm449_vm2, %v8954_v13, 0.0 }
 0x2e5   :  { %1761 = vadd.xlane.f32.xlu1 %v1760_v15  ;;  %v1763_v18 = vsel %vm449_vm2, %v8956_v14, 0.0 }
 0x2e6   :  { %1764 = vadd.xlane.f32.xlu0 %v1763_v18 }
 0x2e7   :  { %v8962_v19 = vpop.eup %8384 }
 0x2e8   :  { %v8964_v22 = vpop.eup %8386  ;;  %v1766_v25 = vsel %vm449_vm2, %v8962_v19, 0.0 }
 0x2e9   :  { %1767 = vadd.xlane.f32.xlu1 %v1766_v25  ;;  %v1769_v37 = vsel %vm449_vm2, %v8964_v22, 0.0 }
 0x2ea   :  { %1770 = vadd.xlane.f32.xlu0 %v1769_v37 }
 0x2eb   :  { %v8970_v4 = vpop.eup %8388 }
 0x2ec   :  { %v1775_v27 = vsel %vm449_vm2, %v8970_v4, 0.0 }
 0x2ee   :  { %1776 = vadd.xlane.f32.xlu0 %v1775_v27 }
 0x304   :  { %441 = vrot.lane.b32.xlu0 %v8747_v43, %s8633_s26 }
 0x30a   :  { %v1678_v31 = vpop.xlane.xlu1 %1677 }
 0x30b   :  { %v1696_v32 = vsub.f32 %v8871_v51, %v1678_v31 }
 0x30d   :  { %v1726_v33 = vmul.f32 1.442695, %v1696_v32 }
 0x30f   :  { %8390 = vpow2.f32 %v1726_v33 }
 0x312   :  { %v1735_v38 = vpop.xlane.xlu0 %1734 }
 0x313   :  { %8392 = vrcp.f32 %v1735_v38  ;;  %v3043_v38 = vld [vmem:[#allocation8 + $0x90] sm:$0xff] }
 0x316   :  { %v1741_v40 = vpop.xlane.xlu0 %1740 }
 0x317   :  { %8394 = vrcp.f32 %v1741_v40 }
 0x31c   :  { %v8983_v42 = vpop.eup %8390 }
 0x31d   :  { %v1772_v44 = vsel %vm449_vm2, %v8983_v42, 0.0 }
 0x31e   :  { %1773 = vadd.xlane.f32.xlu1 %v1772_v44  ;;  %v3041_v44 = vld [vmem:[#allocation8 + $0x80] sm:$0xff] }
 0x320   :  { %v8393_v47 = vpop.eup %8392 }
 0x321   :  { %v1795_v20 = vmul.f32 %v8393_v47, %v8899_v10  ;;  %v9001_v10 = vpop.permute.xlu1 %439 }
 0x323   :  { %7948 = vmatmul.mubr.msk.f32.vlgmr.msra.gmra.mxu1 %vm449_vm2, %v1795_v20 }
 0x324   :  { %v8395_v51 = vpop.eup %8394  ;;  %7956 = vmatpush3.msra.mxu1 %v8741_v41  ;;  %7957 = vmatprep.mubr.msk.f32.mxu1 %vm8630_vm1, %v8629_v16 }
 0x325   :  { %7965 = vmatprep.subr.mxu1 %v8629_v16  ;;  %v1797_v48 = vmul.f32 %v8395_v51, %v8903_v11  ;;  %v3040_v51 = vld [vmem:[#allocation8 + $0x78] sm:$0xff] }
 0x327   :  { %7958 = vmatmul.mubr.msk.f32.vlgmr.msra.gmra.mxu1 %vm449_vm2, %v1797_v48 }
 0x328   :  { %7966 = vmatpush3.msra.mxu1 %v8879_v57  ;;  %7967 = vmatprep.mubr.msk.f32.mxu1 %vm8630_vm1, %v8629_v16 }
 0x329   :  { %7975 = vmatprep.subr.mxu1 %v8629_v16 }
 0x32f   :  { %443 = vrot.lane.b32.xlu1 %v8741_v41, %s8633_s26 }
 0x33f   :  { %v1732_v49 = vpop.xlane.xlu1 %1731 }
 0x340   :  { %8396 = vrcp.f32 %v1732_v49 }
 0x343   :  { %v1738_v50 = vpop.xlane.xlu1 %1737 }
 0x344   :  { %8398 = vrcp.f32 %v1738_v50 }
 0x34d   :  { %v8397_v53 = vpop.eup %8396  ;;  %v1747_v11 = vpop.xlane.xlu0 %1746 }
 0x34e   :  { %8400 = vrcp.f32 %v1747_v11  ;;  %v1794_v54 = vmul.f32 %v8397_v53, %v8912_v21 }
 0x350   :  { %7943 = vmatmul.mubr.msk.f32.vlgmr.msra.gmra.mxu0 %vm449_vm2, %v1794_v54 }
 0x351   :  { %v8399_v57 = vpop.eup %8398  ;;  %7951 = vmatpush3.msra.mxu0 %v8747_v43  ;;  %7952 = vmatprep.mubr.msk.f32.mxu0 %vm8630_vm1, %v8629_v16 }
 0x352   :  { %7960 = vmatprep.subr.mxu0 %v8629_v16  ;;  %v1796_v41 = vmul.f32 %v8399_v57, %v8916_v26 }
 0x354   :  { %7953 = vmatmul.mubr.msk.f32.vlgmr.msra.gmra.mxu0 %vm449_vm2, %v1796_v41 }
 0x355   :  { %7961 = vmatpush3.msra.mxu0 %v8881_v58  ;;  %7962 = vmatprep.mubr.msk.f32.mxu0 %vm8630_vm1, %v8629_v16 }
 0x356   :  { %7970 = vmatprep.subr.mxu0 %v8629_v16 }
 0x35b   :  { %v8401_v21 = vpop.eup %8400 }
 0x35c   :  { %v1799_v23 = vmul.f32 %v8401_v21, %v8920_v8 }
 0x35e   :  { %v1744_v43 = vpop.xlane.xlu1 %1743  ;;  %7968 = vmatmul.mubr.msk.f32.vlgmr.msra.gmra.mxu1 %vm449_vm2, %v1799_v23 }
 0x35f   :  { %8402 = vrcp.f32 %v1744_v43  ;;  %7976 = vmatpush3.msra.mxu1 %v8887_v60  ;;  %7977 = vmatprep.mubr.msk.f32.mxu1 %vm8630_vm1, %v8629_v16 }
 0x360   :  { %7985 = vmatprep.subr.mxu1 %v8629_v16 }
 0x366   :  { %v1750_v58 = vpop.xlane.xlu1 %1749 }
 0x367   :  { %8404 = vrcp.f32 %v1750_v58  ;;  %v1753_v26 = vpop.xlane.xlu0 %1752 }
 0x368   :  { %8406 = vrcp.f32 %v1753_v26 }
 0x36a   :  { %v1756_v55 = vpop.xlane.xlu1 %1755 }
 0x36b   :  { %8408 = vrcp.f32 %v1756_v55  ;;  %v1759_v61 = vpop.xlane.xlu0 %1758 }
 0x36c   :  { %v8403_v29 = vpop.eup %8402  ;;  %8410 = vrcp.f32 %v1759_v61 }
 0x36d   :  { %v1798_v8 = vmul.f32 %v8403_v29, %v8931_v24 }
 0x36e   :  { %v1762_v30 = vpop.xlane.xlu1 %1761 }
 0x36f   :  { %8412 = vrcp.f32 %v1762_v30  ;;  %v1765_v63 = vpop.xlane.xlu0 %1764  ;;  %7963 = vmatmul.mubr.msk.f32.vlgmr.msra.gmra.mxu0 %vm449_vm2, %v1798_v8 }
 0x370   :  { %8414 = vrcp.f32 %v1765_v63  ;;  %7971 = vmatpush3.msra.mxu0 %v8891_v62  ;;  %7972 = vmatprep.mubr.msk.f32.mxu0 %vm8630_vm1, %v8629_v16 }
 0x371   :  { %7980 = vmatprep.subr.mxu0 %v8629_v16 }
 0x372   :  { %v1768_v60 = vpop.xlane.xlu1 %1767 }
 0x373   :  { %8416 = vrcp.f32 %v1768_v60  ;;  %v1771_v0 = vpop.xlane.xlu0 %1770 }
 0x374   :  { %v8405_v1 = vpop.eup %8404  ;;  %8418 = vrcp.f32 %v1771_v0 }
 0x375   :  { %v8407_v35 = vpop.eup %8406  ;;  %v1800_v24 = vmul.f32 %v8405_v1, %v8938_v5 }
 0x376   :  { %v1801_v2 = vmul.f32 %v8407_v35, %v8940_v6 }
 0x377   :  { %7973 = vmatmul.mubr.msk.f32.vlgmr.msra.gmra.mxu0 %vm449_vm2, %v1800_v24  ;;  %v1777_v6 = vpop.xlane.xlu0 %1776 }
 0x378   :  { %v8409_v36 = vpop.eup %8408  ;;  %7978 = vmatmul.mubr.msk.f32.vlgmr.msra.gmra.mxu1 %vm449_vm2, %v1801_v2  ;;  %7981 = vmatpush3.msra.mxu0 %v8885_v59  ;;  %8420 = vrcp.f32 %v1777_v6 }
 0x379   :  { %v8411_v62 = vpop.eup %8410  ;;  %7986 = vmatpush3.msra.mxu1 %v8877_v56  ;;  %7982 = vmatprep.mubr.msk.f32.mxu0 %vm8630_vm1, %v8629_v16  ;;  %v1802_v3 = vmul.f32 %v8409_v36, %v8946_v46 }
 0x37a   :  { %7987 = vmatprep.mubr.msk.f32.mxu1 %vm8630_vm1, %v8629_v16  ;;  %7990 = vmatprep.subr.mxu0 %v8629_v16  ;;  %v1803_v5 = vmul.f32 %v8411_v62, %v8948_v7 }
 0x37b   :  { %7995 = vmatprep.subr.mxu1 %v8629_v16  ;;  %7983 = vmatmul.mubr.msk.f32.vlgmr.msra.gmra.mxu0 %vm449_vm2, %v1802_v3  ;;  %v442_v12 = vpop.permute.xlu0 %441 }
 0x37c   :  { %v8413_v59 = vpop.eup %8412  ;;  %7988 = vmatmul.mubr.msk.f32.vlgmr.msra.gmra.mxu1 %vm449_vm2, %v1803_v5  ;;  %7991 = vmatpush3.msra.mxu0 %v8978_v28 }
 0x37d   :  { %v8415_v56 = vpop.eup %8414  ;;  %7996 = vmatpush3.msra.mxu1 %v8976_v17  ;;  %7992 = vmatprep.mubr.msk.f32.mxu0 %vm8630_vm1, %v8629_v16  ;;  %v1804_v9 = vmul.f32 %v8413_v59, %v8954_v13 }
 0x37e   :  { %7997 = vmatprep.mubr.msk.f32.mxu1 %vm8630_vm1, %v8629_v16  ;;  %8000 = vmatprep.subr.mxu0 %v8629_v16  ;;  %v1805_v39 = vmul.f32 %v8415_v56, %v8956_v14 }
 0x37f   :  { %8005 = vmatprep.subr.mxu1 %v8629_v16  ;;  %7993 = vmatmul.mubr.msk.f32.vlgmr.msra.gmra.mxu0 %vm449_vm2, %v1804_v9 }
 0x380   :  { %v8417_v45 = vpop.eup %8416  ;;  %7998 = vmatmul.mubr.msk.f32.vlgmr.msra.gmra.mxu1 %vm449_vm2, %v1805_v39  ;;  %8001 = vmatpush3.msra.mxu0 %v8981_v34 }
 0x381   :  { %v8419_v46 = vpop.eup %8418  ;;  %8006 = vmatpush3.msra.mxu1 %v9001_v10  ;;  %8002 = vmatprep.mubr.msk.f32.mxu0 %vm8630_vm1, %v8629_v16  ;;  %v1806_v7 = vmul.f32 %v8417_v45, %v8962_v19 }
 0x382   :  { %8007 = vmatprep.mubr.msk.f32.mxu1 %vm8630_vm1, %v8629_v16  ;;  %8010 = vmatprep.subr.mxu0 %v8629_v16  ;;  %v1807_v52 = vmul.f32 %v8419_v46, %v8964_v22 }
 0x383   :  { %8003 = vmatmul.mubr.msk.f32.vlgmr.msra.gmra.mxu0 %vm449_vm2, %v1806_v7  ;;  %8015 = vmatprep.subr.mxu1 %v8629_v16 }
 0x384   :  { %8008 = vmatmul.mubr.msk.f32.vlgmr.msra.gmra.mxu1 %vm449_vm2, %v1807_v52  ;;  %8011 = vmatpush3.msra.mxu0 %v442_v12 }
 0x385   :  { %8017 = vmatprep.mubr.msk.f32.mxu1 %vm8630_vm1, %v8629_v16  ;;  %8012 = vmatprep.mubr.msk.f32.mxu0 %vm8630_vm1, %v8629_v16  ;;  %v8421_v14 = vpop.eup %8420 }
 0x386   :  { %v1809_v18 = vmul.f32 %v8421_v14, %v8970_v4  ;;  %8020 = vmatprep.subr.mxu0 %v3043_v38 }
 0x3a7   :  { %v1774_v13 = vpop.xlane.xlu1 %1773 }
 0x3a8   :  { %8422 = vrcp.f32 %v1774_v13 }
 0x3ab   :  { %v444_v15 = vpop.permute.xlu1 %443 }
 0x3ac   :  { %8016 = vmatpush3.msra.mxu1 %v444_v15  ;;  %v7465_v15 = vld [vmem:[#allocation8 + $0x98] ss:$0 sm:$0xff] }
 0x3ad   :  { %8018 = vmatmul.mubr.msk.f32.vlgmr.msra.gmra.mxu1 %vm449_vm2, %v1809_v18 }
 0x3b5   :  { %v8423_v19 = vpop.eup %8422 }
 0x3b6   :  { %v1808_v22 = vmul.f32 %v8423_v19, %v8983_v42  ;;  %v3042_v42 = vld [vmem:[#allocation8 + $0x88] sm:$0xff] }
 0x3b8   :  { %8013 = vmatmul.mubr.msk.f32.vlgmr.msra.gmra.mxu0 %vm449_vm2, %v1808_v22 }
 0x3b9   :  { %8021 = vmatpush3.msra.mxu0 %v3043_v38  ;;  %v3232_v38 = vld [vmem:[#allocation8 + $0xc8] sm:$0xff] }
 0x3ba   :  { %8022 = vmatprep.subr.mxu0 %v3042_v42  ;;  %8034 = vmatprep.subr.mxu1 %v3232_v38 }
 0x3bb   :  { %8023 = vmatpush3.msra.mxu0 %v3042_v42  ;;  %8035 = vmatpush3.msra.mxu1 %v3232_v38  ;;  %v3230_v42 = vld [vmem:[#allocation8 + $0xb8] sm:$0xff] }
 0x3bc   :  { %8024 = vmatprep.subr.mxu0 %v3041_v44 }
 0x3bd   :  { %8025 = vmatpush3.msra.mxu0 %v3041_v44  ;;  %v3229_v44 = vld [vmem:[#allocation8 + $0xb0] sm:$0xff] }
 0x3be   :  { %8026 = vmatprep.subr.mxu0 %v3040_v51 }
 0x3bf   :  { %8027 = vmatpush3.msra.mxu0 %v3040_v51 }
 0x3e3   :  { %v9075_v25 = vpop.f32.mrf.mxu1 }
 0x3e5   :  { %v7949_v37 = vpop.f32.mrf.mxu1 }
 0x3e7   :  { %v9077_v27 = vpop.f32.mrf.mxu1 }
 0x3e9   :  { %v7959_v16 = vpop.f32.mrf.mxu1 }
 0x3ea   :  { %v8543_v16 = vld [vmem:[#allocation7] sm:$0xff] }
 0x410   :  { %v9079_v17 = vpop.f32.mrf.mxu0 }
 0x412   :  { %v7944_v28 = vpop.f32.mrf.mxu0 }
 0x414   :  { %v9081_v31 = vpop.f32.mrf.mxu0 }
 0x416   :  { %v7954_v4 = vpop.f32.mrf.mxu0 }
 0x41e   :  { %v2244_v32 = vpop.f32.mrf.mxu1 }
 0x41f   :  { %2984 = vrot.lane.b32.xlu1 %v2244_v32, %s8627_s19 }
 0x420   :  { %v7969_v33 = vpop.f32.mrf.mxu1 }
 0x42f   :  { %v2171_v34 = vpop.f32.mrf.mxu0 }
 0x430   :  { %2982 = vrot.lane.b32.xlu0 %v2171_v34, %s8627_s19 }
 0x431   :  { %v7964_v40 = vpop.f32.mrf.mxu0 }
 0x432   :  { %v3231_v40 = vld [vmem:[#allocation8 + $0xc0] sm:$0xff] }
 0x433   :  { %8036 = vmatprep.subr.mxu1 %v3231_v40 }
 0x434   :  { %8037 = vmatpush3.msra.mxu1 %v3231_v40 }
 0x435   :  { %8038 = vmatprep.subr.mxu1 %v3230_v42 }
 0x436   :  { %8039 = vmatpush3.msra.mxu1 %v3230_v42 }
 0x437   :  { %v2317_v47 = vpop.f32.mrf.mxu0  ;;  %8040 = vmatprep.subr.mxu1 %v3229_v44 }
 0x438   :  { %v2390_v20 = vpop.f32.mrf.mxu1  ;;  %2986 = vrot.lane.b32.xlu0 %v2317_v47, %s8627_s19  ;;  %8041 = vmatpush3.msra.mxu1 %v3229_v44 }
 0x439   :  { %2988 = vrot.lane.b32.xlu1 %v2390_v20, %s8627_s19  ;;  %v7974_v48 = vpop.f32.mrf.mxu0 }
 0x43a   :  { %v7979_v10 = vpop.f32.mrf.mxu1  ;;  %v8544_v48 = vld [vmem:[#allocation7 + $0x18] sm:$0xff] }
 0x43b   :  { %v2463_v49 = vpop.f32.mrf.mxu0 }
 0x43c   :  { %v2536_v50 = vpop.f32.mrf.mxu1  ;;  %2998 = vrot.lane.b32.xlu0 %v2463_v49, %s8634_s27 }
 0x43d   :  { %3000 = vrot.lane.b32.xlu1 %v2536_v50, %s8634_s27  ;;  %v7984_v53 = vpop.f32.mrf.mxu0  ;;  %v8545_v50 = vld [vmem:[#allocation7 + $0x10] sm:$0xff] }
 0x43e   :  { %v7989_v11 = vpop.f32.mrf.mxu1 }
 0x43f   :  { %v2609_v54 = vpop.f32.mrf.mxu0 }
 0x440   :  { %v2682_v57 = vpop.f32.mrf.mxu1  ;;  %3002 = vrot.lane.b32.xlu0 %v2609_v54, %s8634_s27 }
 0x441   :  { %3004 = vrot.lane.b32.xlu1 %v2682_v57, %s8634_s27  ;;  %v7994_v41 = vpop.f32.mrf.mxu0 }
 0x442   :  { %v7999_v21 = vpop.f32.mrf.mxu1 }
 0x443   :  { %v2755_v23 = vpop.f32.mrf.mxu0 }
 0x444   :  { %v2828_v43 = vpop.f32.mrf.mxu1  ;;  %3014 = vrot.lane.b32.xlu0 %v2755_v23, %s8635_s28 }
 0x445   :  { %3016 = vrot.lane.b32.xlu1 %v2828_v43, %s8635_s28  ;;  %v8004_v58 = vpop.f32.mrf.mxu0 }
 0x446   :  { %v8009_v26 = vpop.f32.mrf.mxu1 }
 0x46d   :  { %v2974_v55 = vpop.f32.mrf.mxu1 }
 0x46e   :  { %3020 = vrot.lane.b32.xlu1 %v2974_v55, %s8635_s28 }
 0x46f   :  { %v8019_v61 = vpop.f32.mrf.mxu1 }
 0x478   :  { %v2901_v29 = vpop.f32.mrf.mxu0 }
 0x479   :  { %3018 = vrot.lane.b32.xlu0 %v2901_v29, %s8635_s28 }
 0x47a   :  { %v8014_v8 = vpop.f32.mrf.mxu0 }
 0x491   :  { %v2985_v63 = vpop.permute.xlu1 %2984 }
 0x492   :  { %v3027_v62 = vsel %vm449_vm2, %v9075_v25, %v2985_v63  ;;  %v8542_v25 = vld [vmem:[#allocation7 + $0x8] sm:$0xff] }
 0x4a2   :  { %v2983_v30 = vpop.permute.xlu0 %2982 }
 0x4a3   :  { %v3026_v36 = vsel %vm449_vm2, %v9079_v17, %v2983_v30 }
 0x4aa   :  { %v2987_v60 = vpop.permute.xlu0 %2986 }
 0x4ab   :  { %v2989_v0 = vpop.permute.xlu1 %2988  ;;  %v3028_v39 = vsel %vm449_vm2, %v9081_v31, %v2987_v60 }
 0x4ac   :  { %v3029_v46 = vsel %vm449_vm2, %v9077_v27, %v2989_v0 }
 0x4ae   :  { %v2999_v1 = vpop.permute.xlu0 %2998 }
 0x4af   :  { %v3001_v35 = vpop.permute.xlu1 %3000  ;;  %v3031_v3 = vsel %vm3030_vm3, %v3026_v36, %v2999_v1 }
 0x4b0   :  { %v3032_v59 = vsel %vm3030_vm3, %v3027_v62, %v3001_v35 }
 0x4b2   :  { %v3003_v24 = vpop.permute.xlu0 %3002 }
 0x4b3   :  { %v3005_v2 = vpop.permute.xlu1 %3004  ;;  %v3033_v7 = vsel %vm3030_vm3, %v3028_v39, %v3003_v24 }
 0x4b4   :  { %v3034_v12 = vsel %vm3030_vm3, %v3029_v46, %v3005_v2 }
 0x4b6   :  { %v3015_v5 = vpop.permute.xlu0 %3014 }
 0x4b7   :  { %v3036_v56 = vsel %vm3035_vm4, %v3031_v3, %v3015_v5  ;;  %v3017_v6 = vpop.permute.xlu1 %3016  ;;  %v7470_v5 = vld [vmem:[#allocation8 + $0xa0] ss:$0 sm:$0xff] }
 0x4b8   :  { %v3037_v9 = vsel %vm3035_vm4, %v3032_v59, %v3017_v6  ;;  %8028 = vmatprep.mubr.msk.f32.mxu0 %vm67_vm0, %v3036_v56 }
 0x4b9   :  { %8029 = vmatmul.mubr.msk.f32.vlgmr.msra.gmra.mxu0 %vm67_vm0, %v3037_v9  ;;  %v7471_v9 = vld [vmem:[#allocation8 + $0xa8] ss:$0 sm:$0xff] }
 0x4e0   :  { %v3021_v45 = vpop.permute.xlu1 %3020 }
 0x4e1   :  { %v3039_v14 = vsel %vm3035_vm4, %v3034_v12, %v3021_v45 }
 0x4eb   :  { %v3019_v52 = vpop.permute.xlu0 %3018 }
 0x4ec   :  { %v3038_v13 = vsel %vm3035_vm4, %v3033_v7, %v3019_v52 }
 0x4ed   :  { %8031 = vmatprep.mubr.msk.f32.mxu0 %vm67_vm0, %v3038_v13 }
 0x4ee   :  { %8032 = vmatmul.mubr.msk.f32.gmra.mxu0 %vm67_vm0, %v3039_v14 }
 0x579   :  { %v8030_v18 = vpop.f32.mrf.mxu0 }
 0x57a   :  { %v3133_v19 = vadd.f32 %v8030_v18, %v7465_v15 }
 0x57b   :  { %v3127_v22 = vpop.f32.mrf.mxu0 }
 0x57c   :  { %v9115_v37 = vadd.f32 %v8542_v25, %v3133_v19  ;;  %v3128_v27 = vadd.f32 %v7465_v15, %v3127_v22 }
 0x57e   :  { %v9117_v17 = vadd.f32 %v8543_v16, %v3128_v27  ;;  %v3155_v28 = vsel %vm67_vm0, %v9115_v37, 0.0  ;;  %v3170_v4 = vmul.f32 %v9115_v37, %v9115_v37 }
 0x57f   :  { %3156 = vadd.xlane.f32.xlu1 %v3155_v28 }
 0x580   :  { %v3152_v31 = vsel %vm67_vm0, %v9117_v17, 0.0  ;;  %v3176_v32 = vsel %vm67_vm0, %v3170_v4, 0.0  ;;  %v3169_v33 = vmul.f32 %v9117_v17, %v9117_v17 }
 0x581   :  { %3153 = vadd.xlane.f32.xlu0 %v3152_v31 }
 0x582   :  { %v3173_v34 = vsel %vm67_vm0, %v3169_v33, 0.0 }
 0x585   :  { %3177 = vadd.xlane.f32.xlu0 %v3176_v32 }
 0x589   :  { %3174 = vadd.xlane.f32.xlu0 %v3173_v34 }
 0x5ae   :  { %v8033_v47 = vpop.f32.mrf.mxu0 }
 0x5af   :  { %v3143_v20 = vadd.f32 %v8033_v47, %v7465_v15  ;;  %v3378_v47 = vld [vmem:[#allocation8 + $0x110] sm:$0xff] }
 0x5b0   :  { %v3137_v51 = vpop.f32.mrf.mxu0  ;;  %8048 = vmatprep.subr.mxu0 %v3378_v47 }
 0x5b1   :  { %v9129_v10 = vadd.f32 %v8544_v48, %v3143_v20  ;;  %v3138_v49 = vadd.f32 %v7465_v15, %v3137_v51  ;;  %8049 = vmatpush3.msra.mxu0 %v3378_v47  ;;  %v3377_v20 = vld [vmem:[#allocation8 + $0x108] sm:$0xff]  ;;  %v3376_v51 = vld [vmem:[#allocation8 + $0x100] sm:$0xff]  ;;  %v3375_v48 = vld [vmem:[#allocation8 + $0xf8] sm:$0xff] }
 0x5b2   :  { %8050 = vmatprep.subr.mxu0 %v3377_v20 }
 0x5b3   :  { %v9131_v53 = vadd.f32 %v8545_v50, %v3138_v49  ;;  %v3161_v11 = vsel %vm67_vm0, %v9129_v10, 0.0  ;;  %v3172_v54 = vmul.f32 %v9129_v10, %v9129_v10  ;;  %8051 = vmatpush3.msra.mxu0 %v3377_v20  ;;  %v3373_v49 = vld [vmem:[#allocation8 + $0xe8] sm:$0xff]  ;;  %v3372_v50 = vld [vmem:[#allocation8 + $0xe0] sm:$0xff] }
 0x5b4   :  { %3162 = vadd.xlane.f32.xlu0 %v3161_v11  ;;  %8052 = vmatprep.subr.mxu0 %v3376_v51  ;;  %v7472_v11 = vld [vmem:[#allocation8 + $0xd0] ss:$0 sm:$0xff] }
 0x5b5   :  { %v3158_v57 = vsel %vm67_vm0, %v9131_v53, 0.0  ;;  %v3171_v41 = vmul.f32 %v9131_v53, %v9131_v53  ;;  %v3182_v21 = vsel %vm67_vm0, %v3172_v54, 0.0  ;;  %8053 = vmatpush3.msra.mxu0 %v3376_v51 }
 0x5b6   :  { %3159 = vadd.xlane.f32.xlu1 %v3158_v57  ;;  %8054 = vmatprep.subr.mxu0 %v3375_v48 }
 0x5b7   :  { %v3179_v23 = vsel %vm67_vm0, %v3171_v41, 0.0  ;;  %8055 = vmatpush3.msra.mxu0 %v3375_v48 }
 0x5b8   :  { %3183 = vadd.xlane.f32.xlu0 %v3182_v21 }
 0x5ba   :  { %3180 = vadd.xlane.f32.xlu1 %v3179_v23 }
 0x608   :  { %v3157_v43 = vpop.xlane.xlu1 %3156 }
 0x609   :  { %v3166_v26 = vmul.f32 0.03125, %v3157_v43 }
 0x60a   :  { %v3154_v58 = vpop.xlane.xlu0 %3153 }
 0x60b   :  { %v3190_v61 = vmul.f32 %v3166_v26, %v3166_v26  ;;  %v3165_v29 = vmul.f32 0.03125, %v3154_v58  ;;  %v3198_v36 = vsub.f32 %v9115_v37, %v3166_v26 }
 0x60d   :  { %v3189_v60 = vmul.f32 %v3165_v29, %v3165_v29  ;;  %v3197_v3 = vsub.f32 %v9117_v17, %v3165_v29 }
 0x60e   :  { %v3178_v55 = vpop.xlane.xlu0 %3177 }
 0x60f   :  { %v3186_v8 = vmul.f32 0.03125, %v3178_v55 }
 0x611   :  { %v3194_v30 = vsub.f32 %v3186_v8, %v3190_v61 }
 0x612   :  { %v3175_v63 = vpop.xlane.xlu0 %3174 }
 0x613   :  { %v3202_v0 = vadd.f32 1e-12, %v3194_v30  ;;  %v3185_v1 = vmul.f32 0.03125, %v3175_v63 }
 0x615   :  { %8424 = vrsqrt.f32 %v3202_v0  ;;  %v3193_v35 = vsub.f32 %v3185_v1, %v3189_v60 }
 0x617   :  { %v3201_v24 = vadd.f32 1e-12, %v3193_v35 }
 0x619   :  { %8426 = vrsqrt.f32 %v3201_v24 }
 0x622   :  { %v8425_v2 = vpop.eup %8424 }
 0x623   :  { %v3210_v62 = vmul.f32 %v8425_v2, %v3198_v36 }
 0x625   :  { %v3218_v6 = vmul.f32 %v7470_v5, %v3210_v62 }
 0x626   :  { %v8427_v59 = vpop.eup %8426 }
 0x627   :  { %v3209_v56 = vmul.f32 %v8427_v59, %v3197_v3  ;;  %v9147_v46 = vadd.f32 %v7471_v9, %v3218_v6 }
 0x629   :  { %v3217_v39 = vmul.f32 %v7470_v5, %v3209_v56 }
 0x62b   :  { %v9145_v45 = vadd.f32 %v7471_v9, %v3217_v39 }
 0x62d   :  { %8042 = vmatprep.mubr.msk.f32.mxu1 %vm67_vm0, %v9145_v45 }
 0x62e   :  { %8043 = vmatmul.mubr.msk.f32.vlgmr.msra.gmra.mxu1 %vm67_vm0, %v9147_v46 }
 0x63d   :  { %v3163_v7 = vpop.xlane.xlu0 %3162 }
 0x63e   :  { %v3168_v52 = vmul.f32 0.03125, %v3163_v7 }
 0x63f   :  { %v3160_v12 = vpop.xlane.xlu1 %3159 }
 0x640   :  { %v3167_v13 = vmul.f32 0.03125, %v3160_v12  ;;  %v3192_v15 = vmul.f32 %v3168_v52, %v3168_v52  ;;  %v3200_v28 = vsub.f32 %v9129_v10, %v3168_v52  ;;  %v3374_v10 = vld [vmem:[#allocation8 + $0xf0] sm:$0xff] }
 0x641   :  { %v3184_v14 = vpop.xlane.xlu0 %3183  ;;  %8056 = vmatprep.subr.mxu0 %v3374_v10 }
 0x642   :  { %v3188_v18 = vmul.f32 0.03125, %v3184_v14  ;;  %v3191_v22 = vmul.f32 %v3167_v13, %v3167_v13  ;;  %v3199_v4 = vsub.f32 %v9131_v53, %v3167_v13  ;;  %8057 = vmatpush3.msra.mxu0 %v3374_v10  ;;  %v3371_v53 = vld [vmem:[#allocation8 + $0xd8] sm:$0xff]  ;;  %v3567_v10 = vld [vmem:[#allocation8 + $0x148] sm:$0xff] }
 0x643   :  { %v3181_v19 = vpop.xlane.xlu1 %3180  ;;  %8058 = vmatprep.subr.mxu0 %v3373_v49  ;;  %8070 = vmatprep.subr.mxu1 %v3567_v10 }
 0x644   :  { %v3196_v25 = vsub.f32 %v3188_v18, %v3192_v15  ;;  %v3187_v37 = vmul.f32 0.03125, %v3181_v19  ;;  %8059 = vmatpush3.msra.mxu0 %v3373_v49  ;;  %v3767_v49 = vld [vmem:[#allocation8 + $0x198] sm:$0xff]  ;;  %8071 = vmatpush3.msra.mxu1 %v3567_v10 }
 0x645   :  { %8060 = vmatprep.subr.mxu0 %v3372_v50 }
 0x646   :  { %v3204_v27 = vadd.f32 1e-12, %v3196_v25  ;;  %v3195_v16 = vsub.f32 %v3187_v37, %v3191_v22  ;;  %8061 = vmatpush3.msra.mxu0 %v3372_v50  ;;  %v3566_v50 = vld [vmem:[#allocation8 + $0x140] sm:$0xff] }
 0x647   :  { %8062 = vmatprep.subr.mxu0 %v3371_v53  ;;  %8072 = vmatprep.subr.mxu1 %v3566_v50 }
 0x648   :  { %8428 = vrsqrt.f32 %v3204_v27  ;;  %v3203_v17 = vadd.f32 1e-12, %v3195_v16  ;;  %8063 = vmatpush3.msra.mxu0 %v3371_v53  ;;  %v3766_v53 = vld [vmem:[#allocation8 + $0x190] sm:$0xff]  ;;  %8073 = vmatpush3.msra.mxu1 %v3566_v50 }
 0x649   :  { %8098 = vmatprep.subr.mxu0 %v3767_v49 }
 0x64a   :  { %8430 = vrsqrt.f32 %v3203_v17 }
 0x655   :  { %v8429_v31 = vpop.eup %8428 }
 0x656   :  { %v3212_v32 = vmul.f32 %v8429_v31, %v3200_v28  ;;  %v7477_v31 = vld [vmem:[#allocation8 + $0x118] ss:$0 sm:$0xff] }
 0x657   :  { %v8431_v33 = vpop.eup %8430 }
 0x658   :  { %v3211_v34 = vmul.f32 %v8431_v33, %v3199_v4  ;;  %v3220_v38 = vmul.f32 %v7470_v5, %v3212_v32 }
 0x65a   :  { %v3219_v40 = vmul.f32 %v7470_v5, %v3211_v34  ;;  %v9157_v44 = vadd.f32 %v7471_v9, %v3220_v38 }
 0x65c   :  { %v9155_v42 = vadd.f32 %v7471_v9, %v3219_v40 }
 0x65e   :  { %8045 = vmatprep.mubr.msk.f32.mxu1 %vm67_vm0, %v9155_v42 }
 0x65f   :  { %8046 = vmatmul.mubr.msk.f32.gmra.mxu1 %vm67_vm0, %v9157_v44 }
 0x6ee   :  { %v8044_v54 = vpop.f32.mrf.mxu1 }
 0x6ef   :  { %v3322_v57 = vadd.f32 %v8044_v54, %v7472_v11  ;;  %v3765_v54 = vld [vmem:[#allocation8 + $0x188] sm:$0xff] }
 0x6f0   :  { %v3316_v41 = vpop.f32.mrf.mxu1 }
 0x6f1   :  { %v3336_v21 = vmul.f32 %v3322_v57, %v3322_v57  ;;  %v3317_v23 = vadd.f32 %v7472_v11, %v3316_v41  ;;  %v3764_v41 = vld [vmem:[#allocation8 + $0x180] sm:$0xff] }
 0x6f3   :  { %v3340_v43 = vmul.f32 %v3336_v21, %v3322_v57  ;;  %v3335_v58 = vmul.f32 %v3317_v23, %v3317_v23 }
 0x6f5   :  { %v3344_v26 = vmul.f32 0.044715, %v3340_v43  ;;  %v3339_v55 = vmul.f32 %v3335_v58, %v3317_v23 }
 0x6f7   :  { %v3348_v61 = vadd.f32 %v3344_v26, %v3322_v57  ;;  %v3343_v29 = vmul.f32 0.044715, %v3339_v55 }
 0x6f9   :  { %v3352_v8 = vmul.f32 0.7978846, %v3348_v61  ;;  %v3347_v30 = vadd.f32 %v3343_v29, %v3317_v23 }
 0x6fb   :  { %8432 = vtanh.f32 %v3352_v8  ;;  %v3351_v63 = vmul.f32 0.7978846, %v3347_v30 }
 0x6fd   :  { %8434 = vtanh.f32 %v3351_v63 }
 0x708   :  { %v8433_v60 = vpop.eup %8432 }
 0x709   :  { %v3360_v0 = vadd.f32 1.0, %v8433_v60  ;;  %v3673_v60 = vld [vmem:[#allocation8 + $0x170] sm:$0xff] }
 0x70a   :  { %v8435_v1 = vpop.eup %8434 }
 0x70b   :  { %v3359_v35 = vadd.f32 1.0, %v8435_v1  ;;  %v3364_v24 = vmul.f32 0.5, %v3360_v0 }
 0x70d   :  { %v3363_v2 = vmul.f32 0.5, %v3359_v35  ;;  %v3368_v62 = vmul.f32 %v3364_v24, %v3322_v57  ;;  %v3564_v57 = vld [vmem:[#allocation8 + $0x130] sm:$0xff] }
 0x70f   :  { %v3367_v36 = vmul.f32 %v3363_v2, %v3317_v23  ;;  %v9183_v23 = vld [vmem:[#allocation10] sm:$0xff] }
 0x711   :  { %8064 = vmatprep.mubr.msk.f32.mxu0 %vm3384_vm5, %v3367_v36 }
 0x712   :  { %8065 = vmatmul.mubr.msk.f32.vlgmr.msra.gmra.mxu0 %vm3384_vm5, %v3368_v62 }
 0x713   :  { %8099 = vmatpush3.msra.mxu0 %v3767_v49 }
 0x714   :  { %8100 = vmatprep.subr.mxu0 %v3766_v53 }
 0x715   :  { %8101 = vmatpush3.msra.mxu0 %v3766_v53 }
 0x716   :  { %8102 = vmatprep.subr.mxu0 %v3765_v54 }
 0x717   :  { %8103 = vmatpush3.msra.mxu0 %v3765_v54 }
 0x718   :  { %8104 = vmatprep.subr.mxu0 %v3764_v41 }
 0x719   :  { %8105 = vmatpush3.msra.mxu0 %v3764_v41 }
 0x71a   :  { %8122 = vmatprep.subr.mxu0 %v9183_v23 }
 0x71f   :  { %v8047_v3 = vpop.f32.mrf.mxu1 }
 0x720   :  { %v3332_v5 = vadd.f32 %v8047_v3, %v7472_v11 }
 0x721   :  { %v3326_v59 = vpop.f32.mrf.mxu1 }
 0x722   :  { %v3338_v56 = vmul.f32 %v3332_v5, %v3332_v5  ;;  %v3327_v6 = vadd.f32 %v7472_v11, %v3326_v59  ;;  %v3565_v11 = vld [vmem:[#allocation8 + $0x138] sm:$0xff] }
 0x723   :  { %8074 = vmatprep.subr.mxu1 %v3565_v11 }
 0x724   :  { %v3342_v9 = vmul.f32 %v3338_v56, %v3332_v5  ;;  %v3337_v39 = vmul.f32 %v3327_v6, %v3327_v6  ;;  %8075 = vmatpush3.msra.mxu1 %v3565_v11 }
 0x725   :  { %8076 = vmatprep.subr.mxu1 %v3564_v57 }
 0x726   :  { %v3346_v7 = vmul.f32 0.044715, %v3342_v9  ;;  %v3341_v52 = vmul.f32 %v3337_v39, %v3327_v6  ;;  %8077 = vmatpush3.msra.mxu1 %v3564_v57 }
 0x727   :  { %8084 = vmatprep.subr.mxu1 %v3673_v60 }
 0x728   :  { %v3350_v12 = vadd.f32 %v3346_v7, %v3332_v5  ;;  %v3345_v13 = vmul.f32 0.044715, %v3341_v52 }
 0x72a   :  { %v3354_v14 = vmul.f32 0.7978846, %v3350_v12  ;;  %v3349_v15 = vadd.f32 %v3345_v13, %v3327_v6 }
 0x72c   :  { %8436 = vtanh.f32 %v3354_v14  ;;  %v3353_v18 = vmul.f32 0.7978846, %v3349_v15  ;;  %v7482_v14 = vld [vmem:[#allocation8 + $0x120] ss:$0 sm:$0xff] }
 0x72e   :  { %8438 = vtanh.f32 %v3353_v18 }
 0x739   :  { %v8437_v19 = vpop.eup %8436 }
 0x73a   :  { %v3362_v22 = vadd.f32 1.0, %v8437_v19 }
 0x73b   :  { %v8439_v25 = vpop.eup %8438 }
 0x73c   :  { %v3361_v37 = vadd.f32 1.0, %v8439_v25  ;;  %v3366_v27 = vmul.f32 0.5, %v3362_v22  ;;  %v7483_v22 = vld [vmem:[#allocation8 + $0x128] ss:$0 sm:$0xff] }
 0x73e   :  { %v3365_v16 = vmul.f32 0.5, %v3361_v37  ;;  %v3370_v28 = vmul.f32 %v3366_v27, %v3332_v5 }
 0x740   :  { %v3369_v17 = vmul.f32 %v3365_v16, %v3327_v6  ;;  %v3672_v16 = vld [vmem:[#allocation8 + $0x168] sm:$0xff] }
 0x742   :  { %8067 = vmatprep.mubr.msk.f32.mxu0 %vm3384_vm5, %v3369_v17  ;;  %v3671_v17 = vld [vmem:[#allocation8 + $0x160] sm:$0xff] }
 0x743   :  { %8068 = vmatmul.mubr.msk.f32.gmra.mxu0 %vm3384_vm5, %v3370_v28  ;;  %v3670_v28 = vld [vmem:[#allocation8 + $0x158] sm:$0xff] }
 0x7d2   :  { %v8066_v4 = vpop.f32.mrf.mxu0 }
 0x7d3   :  { %v3469_v32 = vadd.f32 %v8066_v4, %v7477_v31 }
 0x7d4   :  { %v3463_v33 = vpop.f32.mrf.mxu0 }
 0x7d5   :  { %v9168_v34 = vadd.f32 %v3469_v32, %v9147_v46  ;;  %v3464_v38 = vadd.f32 %v7477_v31, %v3463_v33 }
 0x7d7   :  { %v9171_v40 = vadd.f32 %v3464_v38, %v9145_v45  ;;  %v3491_v47 = vsel %vm67_vm0, %v9168_v34, 0.0  ;;  %v3505_v20 = vmul.f32 %v9168_v34, %v9168_v34 }
 0x7d8   :  { %3492 = vadd.xlane.f32.xlu0 %v3491_v47 }
 0x7d9   :  { %v3488_v51 = vsel %vm67_vm0, %v9171_v40, 0.0  ;;  %v3504_v48 = vmul.f32 %v9171_v40, %v9171_v40  ;;  %v3511_v46 = vsel %vm67_vm0, %v3505_v20, 0.0 }
 0x7da   :  { %3489 = vadd.xlane.f32.xlu1 %v3488_v51 }
 0x7db   :  { %v3508_v45 = vsel %vm67_vm0, %v3504_v48, 0.0 }
 0x7dc   :  { %3512 = vadd.xlane.f32.xlu0 %v3511_v46 }
 0x7de   :  { %3509 = vadd.xlane.f32.xlu1 %v3508_v45 }
 0x803   :  { %v8069_v21 = vpop.f32.mrf.mxu0 }
 0x804   :  { %v3479_v43 = vadd.f32 %v8069_v21, %v7477_v31 }
 0x805   :  { %v3473_v58 = vpop.f32.mrf.mxu0 }
 0x806   :  { %v9187_v26 = vadd.f32 %v3479_v43, %v9157_v44  ;;  %v3474_v55 = vadd.f32 %v7477_v31, %v3473_v58 }
 0x808   :  { %v9190_v61 = vadd.f32 %v3474_v55, %v9155_v42  ;;  %v3497_v29 = vsel %vm67_vm0, %v9187_v26, 0.0  ;;  %v3507_v8 = vmul.f32 %v9187_v26, %v9187_v26 }
 0x809   :  { %3498 = vadd.xlane.f32.xlu0 %v3497_v29 }
 0x80a   :  { %v3494_v30 = vsel %vm67_vm0, %v9190_v61, 0.0  ;;  %v3506_v63 = vmul.f32 %v9190_v61, %v9190_v61  ;;  %v3517_v44 = vsel %vm67_vm0, %v3507_v8, 0.0 }
 0x80b   :  { %3495 = vadd.xlane.f32.xlu1 %v3494_v30 }
 0x80c   :  { %v3514_v42 = vsel %vm67_vm0, %v3506_v63, 0.0 }
 0x80d   :  { %3518 = vadd.xlane.f32.xlu0 %v3517_v44 }
 0x80f   :  { %3515 = vadd.xlane.f32.xlu1 %v3514_v42 }
 0x861   :  { %v3493_v0 = vpop.xlane.xlu0 %3492 }
 0x862   :  { %v3501_v1 = vmul.f32 0.03125, %v3493_v0  ;;  %v7489_v0 = vld [vmem:[#allocation8 + $0x178] ss:$0 sm:$0xff] }
 0x863   :  { %v3490_v35 = vpop.xlane.xlu1 %3489 }
 0x864   :  { %v3500_v24 = vmul.f32 0.03125, %v3490_v35  ;;  %v3525_v36 = vmul.f32 %v3501_v1, %v3501_v1  ;;  %v3533_v7 = vsub.f32 %v9168_v34, %v3501_v1 }
 0x865   :  { %v3513_v2 = vpop.xlane.xlu0 %3512 }
 0x866   :  { %v3521_v62 = vmul.f32 0.03125, %v3513_v2  ;;  %v3524_v5 = vmul.f32 %v3500_v24, %v3500_v24  ;;  %v3532_v12 = vsub.f32 %v9171_v40, %v3500_v24 }
 0x867   :  { %v3510_v3 = vpop.xlane.xlu1 %3509 }
 0x868   :  { %v3529_v59 = vsub.f32 %v3521_v62, %v3525_v36  ;;  %v3520_v56 = vmul.f32 0.03125, %v3510_v3 }
 0x86a   :  { %v3537_v6 = vadd.f32 1e-12, %v3529_v59  ;;  %v3528_v9 = vsub.f32 %v3520_v56, %v3524_v5 }
 0x86c   :  { %8440 = vrsqrt.f32 %v3537_v6  ;;  %v3536_v39 = vadd.f32 1e-12, %v3528_v9  ;;  %v7494_v6 = vld [vmem:[#allocation8 + $0x1a0] ss:$0 sm:$0xff] }
 0x86e   :  { %8442 = vrsqrt.f32 %v3536_v39 }
 0x879   :  { %v8441_v52 = vpop.eup %8440 }
 0x87a   :  { %v3545_v13 = vmul.f32 %v8441_v52, %v3533_v7 }
 0x87b   :  { %v8443_v15 = vpop.eup %8442 }
 0x87c   :  { %v3544_v18 = vmul.f32 %v8443_v15, %v3532_v12  ;;  %v3553_v19 = vmul.f32 %v7482_v14, %v3545_v13 }
 0x87e   :  { %v3552_v25 = vmul.f32 %v7482_v14, %v3544_v18  ;;  %v9206_v27 = vadd.f32 %v7483_v22, %v3553_v19 }
 0x880   :  { %v9204_v37 = vadd.f32 %v7483_v22, %v3552_v25 }
 0x882   :  { %8078 = vmatprep.mubr.msk.f32.mxu1 %vm67_vm0, %v9204_v37  ;;  %8106 = vmatprep.mubr.msk.f32.mxu0 %vm67_vm0, %v9204_v37 }
 0x883   :  { %8079 = vmatmul.mubr.msk.f32.vlgmr.msra.gmra.mxu1 %vm67_vm0, %v9206_v27  ;;  %8107 = vmatmul.mubr.msk.f32.vlgmr.msra.gmra.mxu0 %vm67_vm0, %v9206_v27 }
 0x884   :  { %8085 = vmatpush3.msra.mxu1 %v3673_v60 }
 0x885   :  { %8086 = vmatprep.subr.mxu1 %v3672_v16 }
 0x886   :  { %8087 = vmatpush3.msra.mxu1 %v3672_v16 }
 0x887   :  { %8088 = vmatprep.subr.mxu1 %v3671_v17 }
 0x888   :  { %8089 = vmatpush3.msra.mxu1 %v3671_v17 }
 0x889   :  { %8090 = vmatprep.subr.mxu1 %v3670_v28 }
 0x88a   :  { %8091 = vmatpush3.msra.mxu1 %v3670_v28 }
 0x88b   :  { %8112 = vmatprep.subr.mxu1 %v9183_v23 }
 0x892   :  { %v3499_v31 = vpop.xlane.xlu0 %3498 }
 0x893   :  { %v3503_v4 = vmul.f32 0.03125, %v3499_v31 }
 0x894   :  { %v3496_v32 = vpop.xlane.xlu1 %3495 }
 0x895   :  { %v3502_v33 = vmul.f32 0.03125, %v3496_v32  ;;  %v3527_v38 = vmul.f32 %v3503_v4, %v3503_v4  ;;  %v3535_v49 = vsub.f32 %v9187_v26, %v3503_v4  ;;  %v7484_v26 = vld [vmem:[#allocation8 + $0x150] ss:$0 sm:$0xff] }
 0x896   :  { %v3519_v34 = vpop.xlane.xlu0 %3518 }
 0x897   :  { %v3523_v40 = vmul.f32 0.03125, %v3519_v34  ;;  %v3526_v20 = vmul.f32 %v3502_v33, %v3502_v33  ;;  %v3534_v53 = vsub.f32 %v9190_v61, %v3502_v33 }
 0x898   :  { %v3516_v47 = vpop.xlane.xlu1 %3515 }
 0x899   :  { %v3531_v51 = vsub.f32 %v3523_v40, %v3527_v38  ;;  %v3522_v48 = vmul.f32 0.03125, %v3516_v47 }
 0x89b   :  { %v3539_v46 = vadd.f32 1e-12, %v3531_v51  ;;  %v3530_v45 = vsub.f32 %v3522_v48, %v3526_v20 }
 0x89d   :  { %8444 = vrsqrt.f32 %v3539_v46  ;;  %v3538_v10 = vadd.f32 1e-12, %v3530_v45 }
 0x89f   :  { %8446 = vrsqrt.f32 %v3538_v10 }
 0x8aa   :  { %v8445_v50 = vpop.eup %8444 }
 0x8ab   :  { %v3547_v11 = vmul.f32 %v8445_v50, %v3535_v49 }
 0x8ac   :  { %v8447_v54 = vpop.eup %8446 }
 0x8ad   :  { %v3546_v57 = vmul.f32 %v8447_v54, %v3534_v53  ;;  %v3555_v41 = vmul.f32 %v7482_v14, %v3547_v11 }
 0x8af   :  { %v3554_v21 = vmul.f32 %v7482_v14, %v3546_v57  ;;  %v9221_v58 = vadd.f32 %v7483_v22, %v3555_v41 }
 0x8b1   :  { %v9219_v43 = vadd.f32 %v7483_v22, %v3554_v21 }
 0x8b3   :  { %8081 = vmatprep.mubr.msk.f32.mxu1 %vm67_vm0, %v9219_v43  ;;  %8109 = vmatprep.mubr.msk.f32.mxu0 %vm67_vm0, %v9219_v43 }
 0x8b4   :  { %8082 = vmatmul.mubr.msk.f32.gmra.mxu1 %vm67_vm0, %v9221_v58  ;;  %8110 = vmatmul.mubr.msk.f32.gmra.mxu0 %vm67_vm0, %v9221_v58 }
 0x8b5   :  { %8092 = vmatprep.mubr.msk.f32.mxu1 %vm67_vm0, %v9204_v37  ;;  %8124 = vmatprep.mubr.msk.f32.mxu0 %vm8630_vm1, %v9183_v23 }
 0x8b8   :  { %8093 = vmatmul.mubr.msk.f32.vlgmr.msra.gmra.mxu1 %vm67_vm0, %v9206_v27 }
 0x8b9   :  { %8095 = vmatprep.mubr.msk.f32.mxu1 %vm67_vm0, %v9219_v43 }
 0x8bc   :  { %8096 = vmatmul.mubr.msk.f32.gmra.mxu1 %vm67_vm0, %v9221_v58 }
 0x8bd   :  { %8114 = vmatprep.mubr.msk.f32.mxu1 %vm8630_vm1, %v9183_v23 }
 0x943   :  { %v8080_v55 = vpop.f32.mrf.mxu1  ;;  %v8108_v5 = vpop.f32.mrf.mxu0 }
 0x944   :  { %v3657_v61 = vadd.f32 %v8080_v55, %v7484_v26  ;;  %v9291_v7 = vadd.f32 %v8108_v5, %v7494_v6 }
 0x945   :  { %v3651_v29 = vpop.f32.mrf.mxu1  ;;  %v3839_v59 = vpop.f32.mrf.mxu0 }
 0x946   :  { %v3652_v8 = vadd.f32 %v7484_v26, %v3651_v29  ;;  %3864 = vrot.lane.b32.xlu1 %v3657_v61, %s8631_s1  ;;  %v9286_v9 = vadd.f32 %v7494_v6, %v3839_v59 }
 0x948   :  { %3870 = vrot.lane.b32.xlu0 %v3652_v8, %s8632_s2 }
 0x94a   :  { %3872 = vrot.lane.b32.xlu1 %v3657_v61, %s8632_s2 }
 0x94e   :  { %3862 = vrot.lane.b32.xlu1 %v3652_v8, %s8631_s1 }
 0x974   :  { %v8083_v30 = vpop.f32.mrf.mxu1  ;;  %v8111_v56 = vpop.f32.mrf.mxu0 }
 0x975   :  { %v3667_v63 = vadd.f32 %v8083_v30, %v7484_v26  ;;  %v9299_v12 = vadd.f32 %v8111_v56, %v7494_v6 }
 0x976   :  { %v3661_v44 = vpop.f32.mrf.mxu1  ;;  %v3849_v39 = vpop.f32.mrf.mxu0 }
 0x977   :  { %v3662_v42 = vadd.f32 %v7484_v26, %v3661_v44  ;;  %3868 = vrot.lane.b32.xlu1 %v3667_v63, %s8631_s1  ;;  %v9293_v52 = vadd.f32 %v7494_v6, %v3849_v39 }
 0x978   :  { %v8094_v60 = vpop.f32.mrf.mxu1 }
 0x979   :  { %3866 = vrot.lane.b32.xlu0 %v3662_v42, %s8631_s1  ;;  %v3751_v2 = vadd.f32 %v8094_v60, %v7489_v0 }
 0x97a   :  { %v3745_v1 = vpop.f32.mrf.mxu1 }
 0x97b   :  { %v3746_v35 = vadd.f32 %v7489_v0, %v3745_v1  ;;  %3876 = vrot.lane.b32.xlu1 %v3667_v63, %s8632_s2 }
 0x97c   :  { %v8097_v24 = vpop.f32.mrf.mxu1 }
 0x97d   :  { %8113 = vmatpush3.xpose.msk.msra.mxu1 %vm449_vm2, %v3746_v35  ;;  %3874 = vrot.lane.b32.xlu0 %v3662_v42, %s8632_s2  ;;  %v3761_v3 = vadd.f32 %v8097_v24, %v7489_v0 }
 0x97e   :  { %v3755_v36 = vpop.f32.mrf.mxu1  ;;  %8117 = vmatprep.subr.mxu1 %v9183_v23 }
 0x97f   :  { %v3756_v62 = vadd.f32 %v7489_v0, %v3755_v36  ;;  %3900 = vrot.lane.b32.xlu1 %v3751_v2, %s8632_s2 }
 0x980   :  { %8115 = vmatmul.mubr.msk.f32.vlgmr.msra.gmra.mxu1 %vm449_vm2, %v3652_v8 }
 0x981   :  { %8118 = vmatpush3.xpose.msk.msra.mxu1 %vm449_vm2, %v3751_v2  ;;  %8123 = vmatpush3.xpose.msk.msra.mxu0 %vm449_vm2, %v3756_v62 }
 0x982   :  { %3892 = vrot.lane.b32.xlu0 %v3751_v2, %s8631_s1  ;;  %8119 = vmatprep.mubr.msk.f32.mxu1 %vm8630_vm1, %v9183_v23 }
 0x983   :  { %3890 = vrot.lane.b32.xlu1 %v3746_v35, %s8631_s1  ;;  %8127 = vmatprep.subr.mxu1 %v9183_v23 }
 0x984   :  { %8120 = vmatmul.mubr.msk.f32.vlgmr.msra.gmra.mxu1 %vm449_vm2, %v3657_v61  ;;  %8125 = vmatmul.mubr.msk.f32.vlgmr.msra.gmra.mxu0 %vm449_vm2, %v3662_v42 }
 0x985   :  { %8128 = vmatpush3.xpose.msk.msra.mxu1 %vm449_vm2, %v3761_v3  ;;  %8129 = vmatprep.mubr.msk.f32.mxu1 %vm8630_vm1, %v9183_v23 }
 0x986   :  { %3898 = vrot.lane.b32.xlu0 %v3746_v35, %s8632_s2  ;;  %8137 = vmatprep.subr.mxu1 %v9183_v23 }
 0x987   :  { %3896 = vrot.lane.b32.xlu1 %v3761_v3, %s8631_s1  ;;  %8132 = vmatprep.subr.mxu0 %v9183_v23 }
 0x988   :  { %8130 = vmatmul.mubr.msk.f32.vlgmr.msra.gmra.mxu1 %vm449_vm2, %v3667_v63  ;;  %8134 = vmatprep.mubr.msk.f32.mxu0 %vm8630_vm1, %v9183_v23 }
 0x989   :  { %8139 = vmatprep.mubr.msk.f32.mxu1 %vm8630_vm1, %v9183_v23 }
 0x98a   :  { %3894 = vrot.lane.b32.xlu0 %v3756_v62, %s8631_s1 }
 0x98b   :  { %3904 = vrot.lane.b32.xlu1 %v3761_v3, %s8632_s2 }
 0x98e   :  { %3906 = vrot.lane.b32.xlu0 %v3746_v35, %s8633_s26 }
 0x98f   :  { %3908 = vrot.lane.b32.xlu1 %v3751_v2, %s8633_s26 }
 0x992   :  { %3902 = vrot.lane.b32.xlu0 %v3756_v62, %s8632_s2 }
 0x993   :  { %3880 = vrot.lane.b32.xlu1 %v3657_v61, %s8633_s26 }
 0x996   :  { %3878 = vrot.lane.b32.xlu0 %v3652_v8, %s8633_s26 }
 0x997   :  { %3912 = vrot.lane.b32.xlu1 %v3761_v3, %s8633_s26 }
 0x99a   :  { %3910 = vrot.lane.b32.xlu0 %v3756_v62, %s8633_s26 }
 0x99b   :  { %3884 = vrot.lane.b32.xlu1 %v3667_v63, %s8633_s26 }
 0x99e   :  { %3882 = vrot.lane.b32.xlu0 %v3662_v42, %s8633_s26 }
 0x99f   :  { %3918 = vrot.lane.b32.xlu1 %v9286_v9, %s8631_s1 }
 0x9a2   :  { %3920 = vrot.lane.b32.xlu0 %v9291_v7, %s8631_s1 }
 0x9a3   :  { %3922 = vrot.lane.b32.xlu1 %v9293_v52, %s8631_s1 }
 0x9a6   :  { %3930 = vrot.lane.b32.xlu0 %v9286_v9, %s8632_s2 }
 0x9a7   :  { %3924 = vrot.lane.b32.xlu1 %v9299_v12, %s8631_s1 }
 0x9ab   :  { %3932 = vrot.lane.b32.xlu1 %v9291_v7, %s8632_s2 }
 0x9b8   :  { %v3865_v13 = vpop.permute.xlu1 %3864 }
 0x9ba   :  { %v3871_v18 = vpop.permute.xlu0 %3870 }
 0x9bc   :  { %v3873_v14 = vpop.permute.xlu1 %3872 }
 0x9c0   :  { %v3863_v15 = vpop.permute.xlu1 %3862 }
 0x9e9   :  { %v3869_v19 = vpop.permute.xlu1 %3868 }
 0x9eb   :  { %v3867_v22 = vpop.permute.xlu0 %3866 }
 0x9ed   :  { %v3877_v25 = vpop.permute.xlu1 %3876 }
 0x9ef   :  { %v3875_v16 = vpop.permute.xlu0 %3874 }
 0x9f1   :  { %v3901_v17 = vpop.permute.xlu1 %3900 }
 0x9f4   :  { %v3893_v28 = vpop.permute.xlu0 %3892 }
 0x9f5   :  { %8138 = vmatpush3.xpose.msk.msra.mxu1 %vm449_vm2, %v3893_v28  ;;  %v3891_v31 = vpop.permute.xlu1 %3890 }
 0x9f6   :  { %8133 = vmatpush3.xpose.msk.msra.mxu0 %vm449_vm2, %v3891_v31  ;;  %8147 = vmatprep.subr.mxu1 %v9183_v23 }
 0x9f7   :  { %8142 = vmatprep.subr.mxu0 %v9183_v23 }
 0x9f8   :  { %v3899_v4 = vpop.permute.xlu0 %3898  ;;  %8140 = vmatmul.mubr.msk.f32.vlgmr.msra.gmra.mxu1 %vm449_vm2, %v3865_v13 }
 0x9f9   :  { %8135 = vmatmul.mubr.msk.f32.vlgmr.msra.gmra.mxu0 %vm449_vm2, %v3863_v15  ;;  %v3897_v32 = vpop.permute.xlu1 %3896  ;;  %8149 = vmatprep.mubr.msk.f32.mxu1 %vm8630_vm1, %v9183_v23 }
 0x9fa   :  { %8148 = vmatpush3.xpose.msk.msra.mxu1 %vm449_vm2, %v3897_v32  ;;  %8144 = vmatprep.mubr.msk.f32.mxu0 %vm8630_vm1, %v9183_v23 }
 0x9fb   :  { %8157 = vmatprep.subr.mxu1 %v9183_v23 }
 0x9fc   :  { %v3895_v33 = vpop.permute.xlu0 %3894 }
 0x9fd   :  { %8143 = vmatpush3.xpose.msk.msra.mxu0 %vm449_vm2, %v3895_v33  ;;  %8150 = vmatmul.mubr.msk.f32.vlgmr.msra.gmra.mxu1 %vm449_vm2, %v3869_v19  ;;  %v3905_v34 = vpop.permute.xlu1 %3904 }
 0x9fe   :  { %8158 = vmatpush3.xpose.msk.msra.mxu1 %vm449_vm2, %v3901_v17  ;;  %8152 = vmatprep.subr.mxu0 %v9183_v23 }
 0x9ff   :  { %8159 = vmatprep.mubr.msk.f32.mxu1 %vm8630_vm1, %v9183_v23  ;;  %8167 = vmatprep.subr.mxu1 %v9183_v23 }
 0xa00   :  { %v3907_v38 = vpop.permute.xlu0 %3906  ;;  %8145 = vmatmul.mubr.msk.f32.vlgmr.msra.gmra.mxu0 %vm449_vm2, %v3867_v22 }
 0xa01   :  { %8153 = vmatpush3.xpose.msk.msra.mxu0 %vm449_vm2, %v3899_v4  ;;  %8160 = vmatmul.mubr.msk.f32.vlgmr.msra.gmra.mxu1 %vm449_vm2, %v3873_v14  ;;  %v3909_v40 = vpop.permute.xlu1 %3908 }
 0xa02   :  { %8154 = vmatprep.mubr.msk.f32.mxu0 %vm8630_vm1, %v9183_v23  ;;  %8168 = vmatpush3.xpose.msk.msra.mxu1 %vm449_vm2, %v3905_v34 }
 0xa03   :  { %8162 = vmatprep.subr.mxu0 %v9183_v23  ;;  %8169 = vmatprep.mubr.msk.f32.mxu1 %vm8630_vm1, %v9183_v23 }
 0xa04   :  { %v3903_v47 = vpop.permute.xlu0 %3902  ;;  %8155 = vmatmul.mubr.msk.f32.vlgmr.msra.gmra.mxu0 %vm449_vm2, %v3871_v18  ;;  %8177 = vmatprep.subr.mxu1 %v9183_v23 }
 0xa05   :  { %8163 = vmatpush3.xpose.msk.msra.mxu0 %vm449_vm2, %v3903_v47  ;;  %8170 = vmatmul.mubr.msk.f32.vlgmr.msra.gmra.mxu1 %vm449_vm2, %v3877_v25  ;;  %v3881_v20 = vpop.permute.xlu1 %3880 }
 0xa06   :  { %8164 = vmatprep.mubr.msk.f32.mxu0 %vm8630_vm1, %v9183_v23  ;;  %8178 = vmatpush3.xpose.msk.msra.mxu1 %vm449_vm2, %v3909_v40 }
 0xa07   :  { %8172 = vmatprep.subr.mxu0 %v9183_v23  ;;  %8179 = vmatprep.mubr.msk.f32.mxu1 %vm8630_vm1, %v9183_v23 }
 0xa08   :  { %v3879_v51 = vpop.permute.xlu0 %3878  ;;  %8165 = vmatmul.mubr.msk.f32.vlgmr.msra.gmra.mxu0 %vm449_vm2, %v3875_v16  ;;  %8187 = vmatprep.subr.mxu1 %v9183_v23 }
 0xa09   :  { %8173 = vmatpush3.xpose.msk.msra.mxu0 %vm449_vm2, %v3907_v38  ;;  %8180 = vmatmul.mubr.msk.f32.vlgmr.msra.gmra.mxu1 %vm449_vm2, %v3881_v20  ;;  %v3913_v48 = vpop.permute.xlu1 %3912 }
 0xa0a   :  { %8174 = vmatprep.mubr.msk.f32.mxu0 %vm8630_vm1, %v9183_v23  ;;  %8188 = vmatpush3.xpose.msk.msra.mxu1 %vm449_vm2, %v3913_v48 }
 0xa0b   :  { %8182 = vmatprep.subr.mxu0 %v9183_v23  ;;  %8189 = vmatprep.mubr.msk.f32.mxu1 %vm8630_vm1, %v9183_v23 }
 0xa0c   :  { %v3911_v46 = vpop.permute.xlu0 %3910  ;;  %8175 = vmatmul.mubr.msk.f32.vlgmr.msra.gmra.mxu0 %vm449_vm2, %v3879_v51  ;;  %8197 = vmatprep.subr.mxu1 %v9183_v23 }
 0xa0d   :  { %8183 = vmatpush3.xpose.msk.msra.mxu0 %vm449_vm2, %v3911_v46  ;;  %v3885_v45 = vpop.permute.xlu1 %3884  ;;  %8184 = vmatprep.mubr.msk.f32.mxu0 %vm8630_vm1, %v9183_v23 }
 0xa0e   :  { %8190 = vmatmul.mubr.msk.f32.vlgmr.msra.gmra.mxu1 %vm449_vm2, %v3885_v45  ;;  %8192 = vmatprep.subr.mxu0 %v9183_v23 }
 0xa0f   :  { %8198 = vmatpush3.msra.mxu1 %v9291_v7  ;;  %8199 = vmatprep.mubr.msk.f32.mxu1 %vm8630_vm1, %v9183_v23 }
 0xa10   :  { %v3883_v10 = vpop.permute.xlu0 %3882  ;;  %8207 = vmatprep.subr.mxu1 %v9183_v23 }
 0xa11   :  { %8185 = vmatmul.mubr.msk.f32.vlgmr.msra.gmra.mxu0 %vm449_vm2, %v3883_v10  ;;  %v9433_v40 = vpop.permute.xlu1 %3918 }
 0xa12   :  { %8193 = vmatpush3.msra.mxu0 %v9286_v9  ;;  %8194 = vmatprep.mubr.msk.f32.mxu0 %vm8630_vm1, %v9183_v23 }
 0xa13   :  { %8202 = vmatprep.subr.mxu0 %v9183_v23 }
 0xa14   :  { %v9435_v47 = vpop.permute.xlu0 %3920 }
 0xa15   :  { %v9437_v20 = vpop.permute.xlu1 %3922 }
 0xa18   :  { %v9441_v51 = vpop.permute.xlu0 %3930 }
 0xa19   :  { %v9443_v48 = vpop.permute.xlu1 %3924 }
 0xa1d   :  { %v9447_v45 = vpop.permute.xlu1 %3932 }
 0xa40   :  { %v9371_v49 = vpop.f32.mrf.mxu1 }
 0xa41   :  { %v5138_v50 = vsel %vm449_vm2, %v9371_v49, -inf }
 0xa42   :  { %v8116_v53 = vpop.f32.mrf.mxu1  ;;  %5139 = vmax.xlane.f32.xlu0 %v5138_v50 }
 0xa44   :  { %v9375_v11 = vpop.f32.mrf.mxu1  ;;  %v9377_v54 = vpop.f32.mrf.mxu0 }
 0xa45   :  { %v5141_v57 = vsel %vm449_vm2, %v9375_v11, -inf  ;;  %v5144_v41 = vsel %vm449_vm2, %v9377_v54, -inf }
 0xa46   :  { %5142 = vmax.xlane.f32.xlu1 %v5141_v57  ;;  %v8121_v21 = vpop.f32.mrf.mxu1  ;;  %5145 = vmax.xlane.f32.xlu0 %v5144_v41  ;;  %v8126_v26 = vpop.f32.mrf.mxu0 }
 0xa48   :  { %v9383_v55 = vpop.f32.mrf.mxu1 }
 0xa49   :  { %v5147_v61 = vsel %vm449_vm2, %v9383_v55, -inf }
 0xa4a   :  { %v8131_v29 = vpop.f32.mrf.mxu1  ;;  %5148 = vmax.xlane.f32.xlu0 %v5147_v61 }
 0xab8   :  { %v9387_v8 = vpop.f32.mrf.mxu1 }
 0xab9   :  { %v5153_v30 = vsel %vm449_vm2, %v9387_v8, -inf  ;;  %v9391_v63 = vpop.f32.mrf.mxu0 }
 0xaba   :  { %5154 = vmax.xlane.f32.xlu0 %v5153_v30  ;;  %v8141_v44 = vpop.f32.mrf.mxu1  ;;  %v5150_v42 = vsel %vm449_vm2, %v9391_v63, -inf }
 0xabb   :  { %5151 = vmax.xlane.f32.xlu1 %v5150_v42  ;;  %v8136_v60 = vpop.f32.mrf.mxu0 }
 0xabd   :  { %v9395_v0 = vpop.f32.mrf.mxu1 }
 0xabe   :  { %v5159_v1 = vsel %vm449_vm2, %v9395_v0, -inf }
 0xabf   :  { %5160 = vmax.xlane.f32.xlu0 %v5159_v1  ;;  %v8151_v35 = vpop.f32.mrf.mxu1 }
 0xac0   :  { %v9399_v24 = vpop.f32.mrf.mxu0 }
 0xac1   :  { %v5156_v2 = vsel %vm449_vm2, %v9399_v24, -inf  ;;  %v9403_v36 = vpop.f32.mrf.mxu1 }
 0xac2   :  { %5157 = vmax.xlane.f32.xlu1 %v5156_v2  ;;  %v8146_v62 = vpop.f32.mrf.mxu0  ;;  %v5165_v3 = vsel %vm449_vm2, %v9403_v36, -inf }
 0xac3   :  { %5166 = vmax.xlane.f32.xlu0 %v5165_v3  ;;  %v8161_v5 = vpop.f32.mrf.mxu1 }
 0xac4   :  { %v9407_v59 = vpop.f32.mrf.mxu0 }
 0xac5   :  { %v5162_v56 = vsel %vm449_vm2, %v9407_v59, -inf  ;;  %v9411_v6 = vpop.f32.mrf.mxu1 }
 0xac6   :  { %5163 = vmax.xlane.f32.xlu1 %v5162_v56  ;;  %v8156_v39 = vpop.f32.mrf.mxu0  ;;  %v5171_v13 = vsel %vm449_vm2, %v9411_v6, -inf }
 0xac7   :  { %5172 = vmax.xlane.f32.xlu0 %v5171_v13  ;;  %v8171_v14 = vpop.f32.mrf.mxu1 }
 0xac8   :  { %v9415_v15 = vpop.f32.mrf.mxu0 }
 0xac9   :  { %v5168_v18 = vsel %vm449_vm2, %v9415_v15, -inf  ;;  %v9419_v19 = vpop.f32.mrf.mxu1 }
 0xaca   :  { %5169 = vmax.xlane.f32.xlu1 %v5168_v18  ;;  %v8166_v22 = vpop.f32.mrf.mxu0  ;;  %v5177_v25 = vsel %vm449_vm2, %v9419_v19, -inf }
 0xacb   :  { %5178 = vmax.xlane.f32.xlu0 %v5177_v25  ;;  %v8181_v16 = vpop.f32.mrf.mxu1  ;;  %v5140_v46 = vpop.xlane.xlu0 %5139 }
 0xacc   :  { %v9423_v17 = vpop.f32.mrf.mxu0 }
 0xacd   :  { %v5174_v28 = vsel %vm449_vm2, %v9423_v17, -inf }
 0xace   :  { %5175 = vmax.xlane.f32.xlu1 %v5174_v28  ;;  %v8176_v31 = vpop.f32.mrf.mxu0  ;;  %v9427_v4 = vpop.f32.mrf.mxu1 }
 0xacf   :  { %v5183_v32 = vsel %vm449_vm2, %v9427_v4, -inf  ;;  %v5146_v10 = vpop.xlane.xlu0 %5145  ;;  %v5143_v50 = vpop.xlane.xlu1 %5142 }
 0xad0   :  { %5184 = vmax.xlane.f32.xlu0 %v5183_v32  ;;  %v8191_v33 = vpop.f32.mrf.mxu1  ;;  %v5187_v53 = vsub.f32 %v9375_v11, %v5143_v50  ;;  %v5188_v42 = vsub.f32 %v9377_v54, %v5146_v10 }
 0xad1   :  { %v9431_v34 = vpop.f32.mrf.mxu0 }
 0xad2   :  { %v5204_v41 = vmul.f32 1.442695, %v5187_v53  ;;  %v5180_v61 = vsel %vm449_vm2, %v9431_v34, -inf  ;;  %v5206_v60 = vmul.f32 1.442695, %v5188_v42 }
 0xad3   :  { %v8186_v38 = vpop.f32.mrf.mxu0  ;;  %v5149_v57 = vpop.xlane.xlu0 %5148 }
 0xad4   :  { %v5189_v21 = vsub.f32 %v9383_v55, %v5149_v57  ;;  %8448 = vpow2.f32 %v5204_v41  ;;  %v5186_v55 = vsub.f32 %v9371_v49, %v5140_v46 }
 0xad6   :  { %v5208_v26 = vmul.f32 1.442695, %v5189_v21  ;;  %v5202_v44 = vmul.f32 1.442695, %v5186_v55 }
 0xad8   :  { %8450 = vpow2.f32 %v5208_v26 }
 0xad9   :  { %8452 = vpow2.f32 %v5202_v44 }
 0xada   :  { %8454 = vpow2.f32 %v5206_v60 }
 0xadf   :  { %3936 = vrot.lane.b32.xlu1 %v9299_v12, %s8632_s2 }
 0xae1   :  { %v9455_v29 = vpop.eup %8448 }
 0xae5   :  { %v9459_v30 = vpop.eup %8450 }
 0xae6   :  { %3934 = vrot.lane.b32.xlu0 %v9293_v52, %s8632_s2  ;;  %v5243_v11 = vsel %vm449_vm2, %v9459_v30, 0.0  ;;  %v9467_v1 = vpop.eup %8452 }
 0xae7   :  { %v5234_v35 = vsel %vm449_vm2, %v9467_v1, 0.0  ;;  %v9471_v2 = vpop.eup %8454 }
 0xae8   :  { %v5240_v62 = vsel %vm449_vm2, %v9471_v2, 0.0 }
 0xaea   :  { %3942 = vrot.lane.b32.xlu0 %v9286_v9, %s8633_s26  ;;  %v5237_v9 = vsel %vm449_vm2, %v9455_v29, 0.0 }
 0xb03   :  { %5181 = vmax.xlane.f32.xlu1 %v5180_v61 }
 0xb09   :  { %5238 = vadd.xlane.f32.xlu0 %v5237_v9 }
 0xb0d   :  { %5244 = vadd.xlane.f32.xlu0 %v5243_v11 }
 0xb14   :  { %3944 = vrot.lane.b32.xlu1 %v9291_v7, %s8633_s26 }
 0xb38   :  { %5235 = vadd.xlane.f32.xlu1 %v5234_v35 }
 0xb3c   :  { %5241 = vadd.xlane.f32.xlu1 %v5240_v62 }
 0xb43   :  { %v5155_v7 = vpop.xlane.xlu0 %5154 }
 0xb44   :  { %v5191_v49 = vsub.f32 %v9387_v8, %v5155_v7  ;;  %v5152_v3 = vpop.xlane.xlu1 %5151 }
 0xb45   :  { %v5190_v54 = vsub.f32 %v9391_v63, %v5152_v3 }
 0xb46   :  { %v5212_v5 = vmul.f32 1.442695, %v5191_v49 }
 0xb47   :  { %v5210_v56 = vmul.f32 1.442695, %v5190_v54 }
 0xb48   :  { %8456 = vpow2.f32 %v5212_v5  ;;  %v5161_v39 = vpop.xlane.xlu0 %5160 }
 0xb49   :  { %8458 = vpow2.f32 %v5210_v56  ;;  %v5193_v13 = vsub.f32 %v9395_v0, %v5161_v39 }
 0xb4b   :  { %v5216_v14 = vmul.f32 1.442695, %v5193_v13  ;;  %v5158_v18 = vpop.xlane.xlu1 %5157 }
 0xb4c   :  { %v5192_v22 = vsub.f32 %v9399_v24, %v5158_v18  ;;  %v5167_v25 = vpop.xlane.xlu0 %5166 }
 0xb4d   :  { %8460 = vpow2.f32 %v5216_v14  ;;  %v5195_v16 = vsub.f32 %v9403_v36, %v5167_v25 }
 0xb4e   :  { %v5214_v28 = vmul.f32 1.442695, %v5192_v22 }
 0xb4f   :  { %v5220_v8 = vmul.f32 1.442695, %v5195_v16  ;;  %v5164_v31 = vpop.xlane.xlu1 %5163 }
 0xb50   :  { %8462 = vpow2.f32 %v5214_v28  ;;  %v5194_v63 = vsub.f32 %v9407_v59, %v5164_v31  ;;  %v5173_v32 = vpop.xlane.xlu0 %5172 }
 0xb51   :  { %8464 = vpow2.f32 %v5220_v8  ;;  %v5197_v33 = vsub.f32 %v9411_v6, %v5173_v32 }
 0xb52   :  { %v5218_v38 = vmul.f32 1.442695, %v5194_v63 }
 0xb53   :  { %v5224_v0 = vmul.f32 1.442695, %v5197_v33  ;;  %v5170_v46 = vpop.xlane.xlu1 %5169 }
 0xb54   :  { %8466 = vpow2.f32 %v5218_v38  ;;  %v5196_v24 = vsub.f32 %v9415_v15, %v5170_v46  ;;  %v5179_v10 = vpop.xlane.xlu0 %5178 }
 0xb55   :  { %v9483_v50 = vpop.eup %8456  ;;  %8468 = vpow2.f32 %v5224_v0  ;;  %v5199_v36 = vsub.f32 %v9419_v19, %v5179_v10 }
 0xb56   :  { %v9486_v53 = vpop.eup %8458  ;;  %v5222_v57 = vmul.f32 1.442695, %v5196_v24  ;;  %v5249_v59 = vsel %vm449_vm2, %v9483_v50, 0.0 }
 0xb57   :  { %v5228_v41 = vmul.f32 1.442695, %v5199_v36  ;;  %5250 = vadd.xlane.f32.xlu0 %v5249_v59  ;;  %v5176_v6 = vpop.xlane.xlu1 %5175  ;;  %v5246_v21 = vsel %vm449_vm2, %v9486_v53, 0.0 }
 0xb58   :  { %8470 = vpow2.f32 %v5222_v57  ;;  %v5198_v15 = vsub.f32 %v9423_v17, %v5176_v6  ;;  %5247 = vadd.xlane.f32.xlu1 %v5246_v21 }
 0xb59   :  { %8472 = vpow2.f32 %v5228_v41  ;;  %v5185_v26 = vpop.xlane.xlu0 %5184 }
 0xb5a   :  { %v9493_v61 = vpop.eup %8460  ;;  %v5226_v19 = vmul.f32 1.442695, %v5198_v15  ;;  %v5201_v9 = vsub.f32 %v9427_v4, %v5185_v26 }
 0xb5b   :  { %v5255_v11 = vsel %vm449_vm2, %v9493_v61, 0.0  ;;  %v9532_v18 = vpop.permute.xlu1 %3936 }
 0xb5c   :  { %8474 = vpow2.f32 %v5226_v19  ;;  %v5232_v55 = vmul.f32 1.442695, %v5201_v9  ;;  %5256 = vadd.xlane.f32.xlu0 %v5255_v11 }
 0xb5d   :  { %v9498_v44 = vpop.eup %8462  ;;  %v9534_v22 = vpop.permute.xlu0 %3934 }
 0xb5e   :  { %v9500_v42 = vpop.eup %8464  ;;  %8476 = vpow2.f32 %v5232_v55  ;;  %v5252_v17 = vsel %vm449_vm2, %v9498_v44, 0.0 }
 0xb5f   :  { %5253 = vadd.xlane.f32.xlu1 %v5252_v17  ;;  %v5261_v60 = vsel %vm449_vm2, %v9500_v42, 0.0 }
 0xb60   :  { %5262 = vadd.xlane.f32.xlu0 %v5261_v60 }
 0xb61   :  { %v9506_v4 = vpop.eup %8466  ;;  %v9537_v28 = vpop.permute.xlu0 %3942 }
 0xb62   :  { %v9508_v35 = vpop.eup %8468  ;;  %v5258_v62 = vsel %vm449_vm2, %v9506_v4, 0.0 }
 0xb63   :  { %5259 = vadd.xlane.f32.xlu1 %v5258_v62  ;;  %v5267_v7 = vsel %vm449_vm2, %v9508_v35, 0.0 }
 0xb64   :  { %5268 = vadd.xlane.f32.xlu0 %v5267_v7 }
 0xb65   :  { %v9514_v49 = vpop.eup %8470 }
 0xb66   :  { %v9516_v3 = vpop.eup %8472  ;;  %v5264_v54 = vsel %vm449_vm2, %v9514_v49, 0.0 }
 0xb67   :  { %5265 = vadd.xlane.f32.xlu1 %v5264_v54  ;;  %v5273_v5 = vsel %vm449_vm2, %v9516_v3, 0.0 }
 0xb68   :  { %5274 = vadd.xlane.f32.xlu0 %v5273_v5 }
 0xb69   :  { %v9522_v56 = vpop.eup %8474 }
 0xb6a   :  { %v5270_v39 = vsel %vm449_vm2, %v9522_v56, 0.0 }
 0xb6b   :  { %v9526_v13 = vpop.eup %8476  ;;  %5271 = vadd.xlane.f32.xlu1 %v5270_v39 }
 0xb6c   :  { %v5279_v14 = vsel %vm449_vm2, %v9526_v13, 0.0 }
 0xb6d   :  { %5280 = vadd.xlane.f32.xlu0 %v5279_v14 }
 0xb83   :  { %3946 = vrot.lane.b32.xlu0 %v9293_v52, %s8633_s26 }
 0xb8c   :  { %v5182_v25 = vpop.xlane.xlu1 %5181 }
 0xb8d   :  { %v5200_v16 = vsub.f32 %v9431_v34, %v5182_v25 }
 0xb8f   :  { %v5230_v8 = vmul.f32 1.442695, %v5200_v16 }
 0xb91   :  { %8478 = vpow2.f32 %v5230_v8 }
 0xb92   :  { %v5239_v31 = vpop.xlane.xlu0 %5238 }
 0xb93   :  { %8480 = vrcp.f32 %v5239_v31 }
 0xb96   :  { %v5245_v63 = vpop.xlane.xlu0 %5244 }
 0xb97   :  { %8482 = vrcp.f32 %v5245_v63 }
 0xb9e   :  { %v9539_v32 = vpop.eup %8478 }
 0xb9f   :  { %v5276_v33 = vsel %vm449_vm2, %v9539_v32, 0.0 }
 0xba0   :  { %v8481_v38 = vpop.eup %8480  ;;  %5277 = vadd.xlane.f32.xlu1 %v5276_v33 }
 0xba1   :  { %v5299_v0 = vmul.f32 %v8481_v38, %v9455_v29  ;;  %v9557_v29 = vpop.permute.xlu1 %3944 }
 0xba3   :  { %8200 = vmatmul.mubr.msk.f32.vlgmr.msra.gmra.mxu1 %vm449_vm2, %v5299_v0  ;;  %v6545_v0 = vld [vmem:[#allocation8 + $0x1c0] sm:$0xff] }
 0xba4   :  { %v8483_v34 = vpop.eup %8482  ;;  %8208 = vmatpush3.msra.mxu1 %v9299_v12  ;;  %8209 = vmatprep.mubr.msk.f32.mxu1 %vm8630_vm1, %v9183_v23 }
 0xba5   :  { %8217 = vmatprep.subr.mxu1 %v9183_v23  ;;  %v5301_v46 = vmul.f32 %v8483_v34, %v9459_v30 }
 0xba7   :  { %8210 = vmatmul.mubr.msk.f32.vlgmr.msra.gmra.mxu1 %vm449_vm2, %v5301_v46  ;;  %v6544_v46 = vld [vmem:[#allocation8 + $0x1b8] sm:$0xff] }
 0xba8   :  { %8218 = vmatpush3.msra.mxu1 %v9435_v47  ;;  %8219 = vmatprep.mubr.msk.f32.mxu1 %vm8630_vm1, %v9183_v23 }
 0xba9   :  { %8227 = vmatprep.subr.mxu1 %v9183_v23 }
 0xbb1   :  { %3948 = vrot.lane.b32.xlu1 %v9299_v12, %s8633_s26 }
 0xbc1   :  { %v5236_v24 = vpop.xlane.xlu1 %5235 }
 0xbc2   :  { %8484 = vrcp.f32 %v5236_v24  ;;  %v6543_v24 = vld [vmem:[#allocation8 + $0x1b0] sm:$0xff] }
 0xbc5   :  { %v5242_v10 = vpop.xlane.xlu1 %5241 }
 0xbc6   :  { %8486 = vrcp.f32 %v5242_v10 }
 0xbcf   :  { %v8485_v36 = vpop.eup %8484 }
 0xbd0   :  { %v5298_v30 = vmul.f32 %v8485_v36, %v9467_v1 }
 0xbd2   :  { %8195 = vmatmul.mubr.msk.f32.vlgmr.msra.gmra.mxu0 %vm449_vm2, %v5298_v30  ;;  %v6542_v30 = vld [vmem:[#allocation8 + $0x1a8] sm:$0xff] }
 0xbd3   :  { %v8487_v47 = vpop.eup %8486  ;;  %8203 = vmatpush3.msra.mxu0 %v9293_v52  ;;  %8204 = vmatprep.mubr.msk.f32.mxu0 %vm8630_vm1, %v9183_v23 }
 0xbd4   :  { %8212 = vmatprep.subr.mxu0 %v9183_v23  ;;  %v5300_v12 = vmul.f32 %v8487_v47, %v9471_v2 }
 0xbd6   :  { %8205 = vmatmul.mubr.msk.f32.vlgmr.msra.gmra.mxu0 %vm449_vm2, %v5300_v12 }
 0xbd7   :  { %8213 = vmatpush3.msra.mxu0 %v9433_v40  ;;  %8214 = vmatprep.mubr.msk.f32.mxu0 %vm8630_vm1, %v9183_v23 }
 0xbd8   :  { %8222 = vmatprep.subr.mxu0 %v9183_v23 }
 0xbe0   :  { %v5251_v1 = vpop.xlane.xlu0 %5250 }
 0xbe1   :  { %8488 = vrcp.f32 %v5251_v1  ;;  %v5248_v57 = vpop.xlane.xlu1 %5247 }
 0xbe2   :  { %8490 = vrcp.f32 %v5248_v57 }
 0xbe5   :  { %v5257_v52 = vpop.xlane.xlu0 %5256 }
 0xbe6   :  { %8492 = vrcp.f32 %v5257_v52 }
 0xbe8   :  { %v5254_v59 = vpop.xlane.xlu1 %5253 }
 0xbe9   :  { %8494 = vrcp.f32 %v5254_v59  ;;  %v5263_v41 = vpop.xlane.xlu0 %5262 }
 0xbea   :  { %8496 = vrcp.f32 %v5263_v41 }
 0xbec   :  { %v5260_v2 = vpop.xlane.xlu1 %5259 }
 0xbed   :  { %8498 = vrcp.f32 %v5260_v2  ;;  %v5269_v6 = vpop.xlane.xlu0 %5268 }
 0xbee   :  { %v8489_v21 = vpop.eup %8488  ;;  %8500 = vrcp.f32 %v5269_v6 }
 0xbef   :  { %v8491_v40 = vpop.eup %8490  ;;  %v5303_v15 = vmul.f32 %v8489_v21, %v9483_v50 }
 0xbf0   :  { %v5266_v26 = vpop.xlane.xlu1 %5265  ;;  %v5302_v19 = vmul.f32 %v8491_v40, %v9486_v53 }
 0xbf1   :  { %8502 = vrcp.f32 %v5266_v26  ;;  %8220 = vmatmul.mubr.msk.f32.vlgmr.msra.gmra.mxu1 %vm449_vm2, %v5303_v15  ;;  %v5275_v9 = vpop.xlane.xlu0 %5274 }
 0xbf2   :  { %8228 = vmatpush3.msra.mxu1 %v9443_v48  ;;  %8504 = vrcp.f32 %v5275_v9  ;;  %8215 = vmatmul.mubr.msk.f32.vlgmr.msra.gmra.mxu0 %vm449_vm2, %v5302_v19 }
 0xbf3   :  { %v8493_v11 = vpop.eup %8492  ;;  %8223 = vmatpush3.msra.mxu0 %v9437_v20  ;;  %8229 = vmatprep.mubr.msk.f32.mxu1 %vm8630_vm1, %v9183_v23 }
 0xbf4   :  { %v5272_v55 = vpop.xlane.xlu1 %5271  ;;  %8237 = vmatprep.subr.mxu1 %v9183_v23  ;;  %v5305_v50 = vmul.f32 %v8493_v11, %v9493_v61  ;;  %8224 = vmatprep.mubr.msk.f32.mxu0 %vm8630_vm1, %v9183_v23 }
 0xbf5   :  { %8506 = vrcp.f32 %v5272_v55  ;;  %8232 = vmatprep.subr.mxu0 %v9183_v23 }
 0xbf6   :  { %v8495_v48 = vpop.eup %8494  ;;  %8230 = vmatmul.mubr.msk.f32.vlgmr.msra.gmra.mxu1 %vm449_vm2, %v5305_v50  ;;  %v5281_v62 = vpop.xlane.xlu0 %5280 }
 0xbf7   :  { %v8497_v53 = vpop.eup %8496  ;;  %8238 = vmatpush3.msra.mxu1 %v9447_v45  ;;  %v5304_v20 = vmul.f32 %v8495_v48, %v9498_v44  ;;  %8239 = vmatprep.mubr.msk.f32.mxu1 %vm8630_vm1, %v9183_v23  ;;  %v9595_v45 = vld [vmem:[#allocation10] sm:$0xff]  ;;  %8508 = vrcp.f32 %v5281_v62 }
 0xbf8   :  { %8247 = vmatprep.subr.mxu1 %v9183_v23  ;;  %v5307_v61 = vmul.f32 %v8497_v53, %v9500_v42 }
 0xbf9   :  { %8225 = vmatmul.mubr.msk.f32.vlgmr.msra.gmra.mxu0 %vm449_vm2, %v5304_v20 }
 0xbfa   :  { %v8499_v17 = vpop.eup %8498  ;;  %8233 = vmatpush3.msra.mxu0 %v9441_v51  ;;  %8240 = vmatmul.mubr.msk.f32.vlgmr.msra.gmra.mxu1 %vm449_vm2, %v5307_v61 }
 0xbfb   :  { %v8501_v60 = vpop.eup %8500  ;;  %8248 = vmatpush3.msra.mxu1 %v9532_v18  ;;  %8234 = vmatprep.mubr.msk.f32.mxu0 %vm8630_vm1, %v9595_v45  ;;  %v5306_v44 = vmul.f32 %v8499_v17, %v9506_v4 }
 0xbfc   :  { %8242 = vmatprep.subr.mxu0 %v9595_v45  ;;  %8249 = vmatprep.mubr.msk.f32.mxu1 %vm8630_vm1, %v9595_v45  ;;  %v5309_v23 = vmul.f32 %v8501_v60, %v9508_v35 }
 0xbfd   :  { %8235 = vmatmul.mubr.msk.f32.vlgmr.msra.gmra.mxu0 %vm449_vm2, %v5306_v44  ;;  %8257 = vmatprep.subr.mxu1 %v9595_v45 }
 0xbfe   :  { %v8503_v51 = vpop.eup %8502  ;;  %8243 = vmatpush3.msra.mxu0 %v9534_v22  ;;  %8250 = vmatmul.mubr.msk.f32.vlgmr.msra.gmra.mxu1 %vm449_vm2, %v5309_v23 }
 0xbff   :  { %v8505_v42 = vpop.eup %8504  ;;  %8258 = vmatpush3.msra.mxu1 %v9557_v29  ;;  %8244 = vmatprep.mubr.msk.f32.mxu0 %vm8630_vm1, %v9595_v45  ;;  %v5308_v4 = vmul.f32 %v8503_v51, %v9514_v49 }
 0xc00   :  { %8252 = vmatprep.subr.mxu0 %v9595_v45  ;;  %8259 = vmatprep.mubr.msk.f32.mxu1 %vm8630_vm1, %v9595_v45  ;;  %v5311_v35 = vmul.f32 %v8505_v42, %v9516_v3  ;;  %v3947_v3 = vpop.permute.xlu0 %3946 }
 0xc01   :  { %8245 = vmatmul.mubr.msk.f32.vlgmr.msra.gmra.mxu0 %vm449_vm2, %v5308_v4  ;;  %8267 = vmatprep.subr.mxu1 %v9595_v45 }
 0xc02   :  { %v8507_v7 = vpop.eup %8506  ;;  %8253 = vmatpush3.msra.mxu0 %v9537_v28  ;;  %8260 = vmatmul.mubr.msk.f32.vlgmr.msra.gmra.mxu1 %vm449_vm2, %v5311_v35 }
 0xc03   :  { %8254 = vmatprep.mubr.msk.f32.mxu0 %vm8630_vm1, %v9595_v45  ;;  %8262 = vmatprep.subr.mxu0 %v9595_v45  ;;  %v5310_v49 = vmul.f32 %v8507_v7, %v9522_v56 }
 0xc04   :  { %8269 = vmatprep.mubr.msk.f32.mxu1 %vm8630_vm1, %v9595_v45  ;;  %v8509_v5 = vpop.eup %8508 }
 0xc05   :  { %8255 = vmatmul.mubr.msk.f32.vlgmr.msra.gmra.mxu0 %vm449_vm2, %v5310_v49  ;;  %v5313_v14 = vmul.f32 %v8509_v5, %v9526_v13 }
 0xc06   :  { %8263 = vmatpush3.msra.mxu0 %v3947_v3  ;;  %8264 = vmatprep.mubr.msk.f32.mxu0 %vm8630_vm1, %v9595_v45 }
 0xc07   :  { %8272 = vmatprep.subr.mxu0 %v6545_v0 }
 0xc29   :  { %v5278_v54 = vpop.xlane.xlu1 %5277 }
 0xc2a   :  { %8510 = vrcp.f32 %v5278_v54 }
 0xc2d   :  { %v3949_v39 = vpop.permute.xlu1 %3948 }
 0xc2e   :  { %8268 = vmatpush3.msra.mxu1 %v3949_v39 }
 0xc2f   :  { %8270 = vmatmul.mubr.msk.f32.vlgmr.msra.gmra.mxu1 %vm449_vm2, %v5313_v14 }
 0xc37   :  { %v8511_v56 = vpop.eup %8510 }
 0xc38   :  { %v5312_v18 = vmul.f32 %v8511_v56, %v9539_v32 }
 0xc3a   :  { %8265 = vmatmul.mubr.msk.f32.vlgmr.msra.gmra.mxu0 %vm449_vm2, %v5312_v18 }
 0xc3b   :  { %8273 = vmatpush3.msra.mxu0 %v6545_v0 }
 0xc3c   :  { %8274 = vmatprep.subr.mxu0 %v6544_v46 }
 0xc3d   :  { %8275 = vmatpush3.msra.mxu0 %v6544_v46  ;;  %v6733_v46 = vld [vmem:[#allocation8 + $0x1f8] sm:$0xff] }
 0xc3e   :  { %8276 = vmatprep.subr.mxu0 %v6543_v24  ;;  %8286 = vmatprep.subr.mxu1 %v6733_v46 }
 0xc3f   :  { %8277 = vmatpush3.msra.mxu0 %v6543_v24  ;;  %8287 = vmatpush3.msra.mxu1 %v6733_v46  ;;  %v6730_v24 = vld [vmem:[#allocation8 + $0x1e0] sm:$0xff] }
 0xc40   :  { %8278 = vmatprep.subr.mxu0 %v6542_v30 }
 0xc41   :  { %8279 = vmatpush3.msra.mxu0 %v6542_v30 }
 0xc63   :  { %v9633_v22 = vpop.f32.mrf.mxu1 }
 0xc65   :  { %v8201_v25 = vpop.f32.mrf.mxu1 }
 0xc66   :  { %v7547_v25 = vld [vmem:[#allocation8 + $0x1c8] ss:$0 sm:$0xff] }
 0xc67   :  { %v9635_v16 = vpop.f32.mrf.mxu1 }
 0xc69   :  { %v8211_v28 = vpop.f32.mrf.mxu1 }
 0xc92   :  { %v5383_v8 = vpop.f32.mrf.mxu0 }
 0xc94   :  { %v8196_v31 = vpop.f32.mrf.mxu0 }
 0xc96   :  { %v9637_v63 = vpop.f32.mrf.mxu0 }
 0xc98   :  { %v8206_v33 = vpop.f32.mrf.mxu0 }
 0xcb1   :  { %v5748_v13 = vpop.f32.mrf.mxu1 }
 0xcb2   :  { %6488 = vrot.lane.b32.xlu1 %v5748_v13, %s8627_s19  ;;  %v5675_v38 = vpop.f32.mrf.mxu0 }
 0xcb3   :  { %v8221_v34 = vpop.f32.mrf.mxu1  ;;  %6486 = vrot.lane.b32.xlu0 %v5675_v38, %s8627_s19 }
 0xcb4   :  { %v8216_v32 = vpop.f32.mrf.mxu0 }
 0xcb6   :  { %v5894_v29 = vpop.f32.mrf.mxu1 }
 0xcb7   :  { %6492 = vrot.lane.b32.xlu1 %v5894_v29, %s8627_s19  ;;  %v6731_v29 = vld [vmem:[#allocation8 + $0x1e8] sm:$0xff] }
 0xcb8   :  { %v8231_v10 = vpop.f32.mrf.mxu1 }
 0xcb9   :  { %v5821_v36 = vpop.f32.mrf.mxu0 }
 0xcba   :  { %6490 = vrot.lane.b32.xlu0 %v5821_v36, %s8627_s19  ;;  %v6040_v47 = vpop.f32.mrf.mxu1 }
 0xcbb   :  { %v8226_v12 = vpop.f32.mrf.mxu0  ;;  %6504 = vrot.lane.b32.xlu1 %v6040_v47, %s8634_s27 }
 0xcbc   :  { %v8241_v1 = vpop.f32.mrf.mxu1 }
 0xcbd   :  { %v5967_v57 = vpop.f32.mrf.mxu0 }
 0xcbe   :  { %6502 = vrot.lane.b32.xlu0 %v5967_v57, %s8634_s27  ;;  %v6186_v52 = vpop.f32.mrf.mxu1 }
 0xcbf   :  { %v8236_v59 = vpop.f32.mrf.mxu0  ;;  %6508 = vrot.lane.b32.xlu1 %v6186_v52, %s8634_s27 }
 0xcc0   :  { %v8251_v41 = vpop.f32.mrf.mxu1 }
 0xcc1   :  { %v6113_v2 = vpop.f32.mrf.mxu0 }
 0xcc2   :  { %6506 = vrot.lane.b32.xlu0 %v6113_v2, %s8634_s27  ;;  %v6332_v6 = vpop.f32.mrf.mxu1 }
 0xcc3   :  { %v8246_v21 = vpop.f32.mrf.mxu0  ;;  %6520 = vrot.lane.b32.xlu1 %v6332_v6, %s8635_s28 }
 0xcc4   :  { %v8261_v40 = vpop.f32.mrf.mxu1 }
 0xcc5   :  { %v6259_v15 = vpop.f32.mrf.mxu0 }
 0xcc6   :  { %6518 = vrot.lane.b32.xlu0 %v6259_v15, %s8635_s28 }
 0xcc7   :  { %v8256_v26 = vpop.f32.mrf.mxu0 }
 0xcef   :  { %v6478_v19 = vpop.f32.mrf.mxu1 }
 0xcf0   :  { %6524 = vrot.lane.b32.xlu1 %v6478_v19, %s8635_s28 }
 0xcf1   :  { %v8271_v9 = vpop.f32.mrf.mxu1 }
 0xcfa   :  { %v6405_v11 = vpop.f32.mrf.mxu0 }
 0xcfb   :  { %6522 = vrot.lane.b32.xlu0 %v6405_v11, %s8635_s28 }
 0xcfc   :  { %v8266_v55 = vpop.f32.mrf.mxu0 }
 0xd24   :  { %v6489_v50 = vpop.permute.xlu1 %6488 }
 0xd25   :  { %v6487_v48 = vpop.permute.xlu0 %6486  ;;  %v6531_v42 = vsel %vm449_vm2, %v9633_v22, %v6489_v50 }
 0xd26   :  { %v6530_v23 = vsel %vm449_vm2, %v5383_v8, %v6487_v48 }
 0xd29   :  { %v6493_v53 = vpop.permute.xlu1 %6492 }
 0xd2a   :  { %v6533_v5 = vsel %vm449_vm2, %v9635_v16, %v6493_v53 }
 0xd2c   :  { %v6491_v20 = vpop.permute.xlu0 %6490 }
 0xd2d   :  { %v6505_v61 = vpop.permute.xlu1 %6504  ;;  %v6532_v3 = vsel %vm449_vm2, %v9637_v63, %v6491_v20 }
 0xd2e   :  { %v6535_v35 = vsel %vm3030_vm3, %v6531_v42, %v6505_v61 }
 0xd30   :  { %v6503_v17 = vpop.permute.xlu0 %6502 }
 0xd31   :  { %v6509_v60 = vpop.permute.xlu1 %6508  ;;  %v6534_v62 = vsel %vm3030_vm3, %v6530_v23, %v6503_v17  ;;  %v7552_v23 = vld [vmem:[#allocation8 + $0x1d0] ss:$0 sm:$0xff] }
 0xd32   :  { %v6537_v56 = vsel %vm3030_vm3, %v6533_v5, %v6509_v60 }
 0xd34   :  { %v6507_v44 = vpop.permute.xlu0 %6506 }
 0xd35   :  { %v6521_v51 = vpop.permute.xlu1 %6520  ;;  %v6536_v39 = vsel %vm3030_vm3, %v6532_v3, %v6507_v44 }
 0xd36   :  { %v6539_v49 = vsel %vm3035_vm4, %v6535_v35, %v6521_v51 }
 0xd38   :  { %v6519_v4 = vpop.permute.xlu0 %6518 }
 0xd39   :  { %v6538_v7 = vsel %vm3035_vm4, %v6534_v62, %v6519_v4  ;;  %v7553_v4 = vld [vmem:[#allocation8 + $0x1d8] ss:$0 sm:$0xff] }
 0xd3a   :  { %8280 = vmatprep.mubr.msk.f32.mxu0 %vm67_vm0, %v6538_v7 }
 0xd3b   :  { %8281 = vmatmul.mubr.msk.f32.vlgmr.msra.gmra.mxu0 %vm67_vm0, %v6539_v49 }
 0xd62   :  { %v6525_v54 = vpop.permute.xlu1 %6524 }
 0xd63   :  { %v6541_v22 = vsel %vm3035_vm4, %v6537_v56, %v6525_v54 }
 0xd6d   :  { %v6523_v14 = vpop.permute.xlu0 %6522 }
 0xd6e   :  { %v6540_v18 = vsel %vm3035_vm4, %v6536_v39, %v6523_v14 }
 0xd6f   :  { %8283 = vmatprep.mubr.msk.f32.mxu0 %vm67_vm0, %v6540_v18 }
 0xd70   :  { %8284 = vmatmul.mubr.msk.f32.gmra.mxu0 %vm67_vm0, %v6541_v22 }
 0xdfb   :  { %v8282_v28 = vpop.f32.mrf.mxu0 }
 0xdfc   :  { %v6635_v8 = vadd.f32 %v8282_v28, %v7547_v25 }
 0xdfd   :  { %v6629_v31 = vpop.f32.mrf.mxu0 }
 0xdfe   :  { %v6649_v63 = vadd.f32 %v6635_v8, %v9206_v27  ;;  %v6630_v16 = vadd.f32 %v7547_v25, %v6629_v31 }
 0xe00   :  { %v9672_v33 = vadd.f32 %v6630_v16, %v9204_v37  ;;  %v6657_v13 = vsel %vm67_vm0, %v6649_v63, 0.0  ;;  %v6671_v0 = vmul.f32 %v6649_v63, %v6649_v63  ;;  %v6732_v37 = vld [vmem:[#allocation8 + $0x1f0] sm:$0xff] }
 0xe01   :  { %6658 = vadd.xlane.f32.xlu1 %v6657_v13  ;;  %8288 = vmatprep.subr.mxu1 %v6732_v37 }
 0xe02   :  { %v6654_v38 = vsel %vm67_vm0, %v9672_v33, 0.0  ;;  %v6677_v34 = vsel %vm67_vm0, %v6671_v0, 0.0  ;;  %v6670_v32 = vmul.f32 %v9672_v33, %v9672_v33  ;;  %8289 = vmatpush3.msra.mxu1 %v6732_v37 }
 0xe03   :  { %6655 = vadd.xlane.f32.xlu0 %v6654_v38  ;;  %8290 = vmatprep.subr.mxu1 %v6731_v29 }
 0xe04   :  { %v6674_v27 = vsel %vm67_vm0, %v6670_v32, 0.0  ;;  %8291 = vmatpush3.msra.mxu1 %v6731_v29 }
 0xe05   :  { %8292 = vmatprep.subr.mxu1 %v6730_v24 }
 0xe06   :  { %8293 = vmatpush3.msra.mxu1 %v6730_v24  ;;  %v6879_v24 = vld [vmem:[#allocation8 + $0x240] sm:$0xff] }
 0xe07   :  { %6678 = vadd.xlane.f32.xlu0 %v6677_v34  ;;  %8322 = vmatprep.subr.mxu1 %v9595_v45 }
 0xe08   :  { %8300 = vmatprep.subr.mxu0 %v6879_v24 }
 0xe09   :  { %8301 = vmatpush3.msra.mxu0 %v6879_v24 }
 0xe0b   :  { %6675 = vadd.xlane.f32.xlu0 %v6674_v27 }
 0xe30   :  { %v8285_v10 = vpop.f32.mrf.mxu0 }
 0xe31   :  { %v6645_v36 = vadd.f32 %v8285_v10, %v7547_v25  ;;  %v6878_v10 = vld [vmem:[#allocation8 + $0x238] sm:$0xff] }
 0xe32   :  { %v6639_v30 = vpop.f32.mrf.mxu0  ;;  %8302 = vmatprep.subr.mxu0 %v6878_v10 }
 0xe33   :  { %v9683_v47 = vadd.f32 %v6645_v36, %v9221_v58  ;;  %v6640_v12 = vadd.f32 %v7547_v25, %v6639_v30  ;;  %8303 = vmatpush3.msra.mxu0 %v6878_v10  ;;  %v6877_v36 = vld [vmem:[#allocation8 + $0x230] sm:$0xff]  ;;  %v6876_v30 = vld [vmem:[#allocation8 + $0x228] sm:$0xff] }
 0xe34   :  { %8304 = vmatprep.subr.mxu0 %v6877_v36 }
 0xe35   :  { %v9686_v1 = vadd.f32 %v6640_v12, %v9219_v43  ;;  %v6663_v57 = vsel %vm67_vm0, %v9683_v47, 0.0  ;;  %v6673_v52 = vmul.f32 %v9683_v47, %v9683_v47  ;;  %8305 = vmatpush3.msra.mxu0 %v6877_v36  ;;  %v6874_v12 = vld [vmem:[#allocation8 + $0x218] sm:$0xff] }
 0xe36   :  { %6664 = vadd.xlane.f32.xlu0 %v6663_v57  ;;  %8306 = vmatprep.subr.mxu0 %v6876_v30  ;;  %v6872_v57 = vld [vmem:[#allocation8 + $0x208] sm:$0xff] }
 0xe37   :  { %v6660_v59 = vsel %vm67_vm0, %v9686_v1, 0.0  ;;  %v6672_v41 = vmul.f32 %v9686_v1, %v9686_v1  ;;  %v6683_v58 = vsel %vm67_vm0, %v6673_v52, 0.0  ;;  %8307 = vmatpush3.msra.mxu0 %v6876_v30  ;;  %v7554_v52 = vld [vmem:[#allocation8 + $0x200] ss:$0 sm:$0xff] }
 0xe38   :  { %6661 = vadd.xlane.f32.xlu1 %v6660_v59 }
 0xe39   :  { %v6680_v43 = vsel %vm67_vm0, %v6672_v41, 0.0 }
 0xe3a   :  { %6684 = vadd.xlane.f32.xlu0 %v6683_v58 }
 0xe3c   :  { %6681 = vadd.xlane.f32.xlu1 %v6680_v43 }
 0xe8a   :  { %v6659_v2 = vpop.xlane.xlu1 %6658 }
 0xe8b   :  { %v6667_v21 = vmul.f32 0.03125, %v6659_v2 }
 0xe8c   :  { %v6656_v6 = vpop.xlane.xlu0 %6655 }
 0xe8d   :  { %v6691_v15 = vmul.f32 %v6667_v21, %v6667_v21  ;;  %v6666_v26 = vmul.f32 0.03125, %v6656_v6  ;;  %v6699_v17 = vsub.f32 %v6649_v63, %v6667_v21 }
 0xe8f   :  { %v6690_v55 = vmul.f32 %v6666_v26, %v6666_v26  ;;  %v6698_v44 = vsub.f32 %v9672_v33, %v6666_v26 }
 0xe90   :  { %v6679_v40 = vpop.xlane.xlu0 %6678 }
 0xe91   :  { %v6687_v19 = vmul.f32 0.03125, %v6679_v40 }
 0xe93   :  { %v6695_v9 = vsub.f32 %v6687_v19, %v6691_v15 }
 0xe94   :  { %v6676_v11 = vpop.xlane.xlu0 %6675 }
 0xe95   :  { %v6703_v50 = vadd.f32 1e-12, %v6695_v9  ;;  %v6686_v48 = vmul.f32 0.03125, %v6676_v11 }
 0xe97   :  { %8512 = vrsqrt.f32 %v6703_v50  ;;  %v6694_v53 = vsub.f32 %v6686_v48, %v6690_v55 }
 0xe99   :  { %v6702_v20 = vadd.f32 1e-12, %v6694_v53 }
 0xe9b   :  { %8514 = vrsqrt.f32 %v6702_v20 }
 0xea4   :  { %v8513_v61 = vpop.eup %8512 }
 0xea5   :  { %v6711_v60 = vmul.f32 %v8513_v61, %v6699_v17 }
 0xea7   :  { %v6719_v62 = vmul.f32 %v7552_v23, %v6711_v60 }
 0xea8   :  { %v8515_v51 = vpop.eup %8514 }
 0xea9   :  { %v6710_v42 = vmul.f32 %v8515_v51, %v6698_v44  ;;  %v9701_v49 = vadd.f32 %v7553_v4, %v6719_v62 }
 0xeab   :  { %v6718_v35 = vmul.f32 %v7552_v23, %v6710_v42 }
 0xead   :  { %v9699_v7 = vadd.f32 %v7553_v4, %v6718_v35 }
 0xeaf   :  { %8294 = vmatprep.mubr.msk.f32.mxu1 %vm67_vm0, %v9699_v7 }
 0xeb0   :  { %8295 = vmatmul.mubr.msk.f32.vlgmr.msra.gmra.mxu1 %vm67_vm0, %v9701_v49 }
 0xebf   :  { %v6665_v3 = vpop.xlane.xlu0 %6664 }
 0xec0   :  { %v6669_v54 = vmul.f32 0.03125, %v6665_v3 }
 0xec1   :  { %v6662_v5 = vpop.xlane.xlu1 %6661 }
 0xec2   :  { %v6668_v39 = vmul.f32 0.03125, %v6662_v5  ;;  %v6693_v56 = vmul.f32 %v6669_v54, %v6669_v54  ;;  %v6701_v33 = vsub.f32 %v9683_v47, %v6669_v54  ;;  %v6875_v47 = vld [vmem:[#allocation8 + $0x220] sm:$0xff] }
 0xec3   :  { %v6685_v14 = vpop.xlane.xlu0 %6684  ;;  %8308 = vmatprep.subr.mxu0 %v6875_v47 }
 0xec4   :  { %v6689_v18 = vmul.f32 0.03125, %v6685_v14  ;;  %v6692_v25 = vmul.f32 %v6668_v39, %v6668_v39  ;;  %v6700_v38 = vsub.f32 %v9686_v1, %v6668_v39  ;;  %8309 = vmatpush3.msra.mxu0 %v6875_v47  ;;  %v6873_v1 = vld [vmem:[#allocation8 + $0x210] sm:$0xff] }
 0xec5   :  { %v6682_v22 = vpop.xlane.xlu1 %6681  ;;  %8310 = vmatprep.subr.mxu0 %v6874_v12 }
 0xec6   :  { %v6697_v28 = vsub.f32 %v6689_v18, %v6693_v56  ;;  %v6688_v8 = vmul.f32 0.03125, %v6682_v22  ;;  %8311 = vmatpush3.msra.mxu0 %v6874_v12 }
 0xec7   :  { %8312 = vmatprep.subr.mxu0 %v6873_v1 }
 0xec8   :  { %v6705_v31 = vadd.f32 1e-12, %v6697_v28  ;;  %v6696_v63 = vsub.f32 %v6688_v8, %v6692_v25  ;;  %8313 = vmatpush3.msra.mxu0 %v6873_v1 }
 0xec9   :  { %8314 = vmatprep.subr.mxu0 %v6872_v57 }
 0xeca   :  { %8516 = vrsqrt.f32 %v6705_v31  ;;  %v6704_v16 = vadd.f32 1e-12, %v6696_v63  ;;  %8315 = vmatpush3.msra.mxu0 %v6872_v57 }
 0xecc   :  { %8518 = vrsqrt.f32 %v6704_v16 }
 0xed7   :  { %v8517_v13 = vpop.eup %8516 }
 0xed8   :  { %v6713_v0 = vmul.f32 %v8517_v13, %v6701_v33 }
 0xed9   :  { %v8519_v34 = vpop.eup %8518 }
 0xeda   :  { %v6712_v32 = vmul.f32 %v8519_v34, %v6700_v38  ;;  %v6721_v27 = vmul.f32 %v7552_v23, %v6713_v0  ;;  %v7559_v38 = vld [vmem:[#allocation8 + $0x248] ss:$0 sm:$0xff] }
 0xedc   :  { %v6720_v46 = vmul.f32 %v7552_v23, %v6712_v32  ;;  %v9711_v29 = vadd.f32 %v7553_v4, %v6721_v27 }
 0xede   :  { %v9709_v37 = vadd.f32 %v7553_v4, %v6720_v46 }
 0xee0   :  { %8297 = vmatprep.mubr.msk.f32.mxu1 %vm67_vm0, %v9709_v37 }
 0xee1   :  { %8298 = vmatmul.mubr.msk.f32.gmra.mxu1 %vm67_vm0, %v9711_v29 }
 0xee2   :  { %8330 = vmatprep.mubr.msk.f32.mxu1 %vm8630_vm1, %v9595_v45 }
 0xf70   :  { %v8296_v59 = vpop.f32.mrf.mxu1 }
 0xf71   :  { %v6823_v41 = vadd.f32 %v8296_v59, %v7554_v52 }
 0xf72   :  { %v6817_v58 = vpop.f32.mrf.mxu1 }
 0xf73   :  { %v6837_v43 = vmul.f32 %v6823_v41, %v6823_v41  ;;  %v6818_v2 = vadd.f32 %v7554_v52, %v6817_v58 }
 0xf75   :  { %v6841_v6 = vmul.f32 %v6837_v43, %v6823_v41  ;;  %v6836_v21 = vmul.f32 %v6818_v2, %v6818_v2 }
 0xf77   :  { %v6845_v40 = vmul.f32 0.044715, %v6841_v6  ;;  %v6840_v15 = vmul.f32 %v6836_v21, %v6818_v2  ;;  %v7073_v21 = vld [vmem:[#allocation8 + $0x278] sm:$0xff] }
 0xf78   :  { %8323 = vmatpush3.msra.mxu1 %v7073_v21  ;;  %v7569_v21 = vld [vmem:[#allocation8 + $0x290] ss:$0 sm:$0xff] }
 0xf79   :  { %v6849_v26 = vadd.f32 %v6845_v40, %v6823_v41  ;;  %v6844_v19 = vmul.f32 0.044715, %v6840_v15  ;;  %v7072_v40 = vld [vmem:[#allocation8 + $0x270] sm:$0xff]  ;;  %8324 = vmatprep.subr.mxu1 %v9595_v45  ;;  %v7071_v15 = vld [vmem:[#allocation8 + $0x268] sm:$0xff] }
 0xf7a   :  { %8325 = vmatpush3.msra.mxu1 %v7072_v40 }
 0xf7b   :  { %v6853_v9 = vmul.f32 0.7978846, %v6849_v26  ;;  %v6848_v11 = vadd.f32 %v6844_v19, %v6818_v2  ;;  %8326 = vmatprep.subr.mxu1 %v9595_v45  ;;  %v7070_v26 = vld [vmem:[#allocation8 + $0x260] sm:$0xff] }
 0xf7c   :  { %8327 = vmatpush3.msra.mxu1 %v7071_v15 }
 0xf7d   :  { %8520 = vtanh.f32 %v6853_v9  ;;  %v6852_v55 = vmul.f32 0.7978846, %v6848_v11  ;;  %8328 = vmatprep.subr.mxu1 %v9595_v45 }
 0xf7e   :  { %8329 = vmatpush3.msra.mxu1 %v7070_v26 }
 0xf7f   :  { %8522 = vtanh.f32 %v6852_v55  ;;  %8333 = vmatprep.subr.mxu1 %v9595_v45 }
 0xf8a   :  { %v8521_v50 = vpop.eup %8520 }
 0xf8b   :  { %v6861_v48 = vadd.f32 1.0, %v8521_v50 }
 0xf8c   :  { %v8523_v53 = vpop.eup %8522 }
 0xf8d   :  { %v6860_v20 = vadd.f32 1.0, %v8523_v53  ;;  %v6865_v61 = vmul.f32 0.5, %v6861_v48 }
 0xf8f   :  { %v6864_v17 = vmul.f32 0.5, %v6860_v20  ;;  %v6869_v44 = vmul.f32 %v6865_v61, %v6823_v41 }
 0xf91   :  { %v6868_v60 = vmul.f32 %v6864_v17, %v6818_v2 }
 0xf93   :  { %8316 = vmatprep.mubr.msk.f32.mxu0 %vm3384_vm5, %v6868_v60 }
 0xf94   :  { %8317 = vmatmul.mubr.msk.f32.vlgmr.msra.gmra.mxu0 %vm3384_vm5, %v6869_v44 }
 0xfa1   :  { %v8299_v23 = vpop.f32.mrf.mxu1 }
 0xfa2   :  { %v6833_v51 = vadd.f32 %v8299_v23, %v7554_v52 }
 0xfa3   :  { %v6827_v42 = vpop.f32.mrf.mxu1 }
 0xfa4   :  { %v6839_v62 = vmul.f32 %v6833_v51, %v6833_v51  ;;  %v6828_v4 = vadd.f32 %v7554_v52, %v6827_v42 }
 0xfa6   :  { %v6843_v35 = vmul.f32 %v6839_v62, %v6833_v51  ;;  %v6838_v3 = vmul.f32 %v6828_v4, %v6828_v4 }
 0xfa8   :  { %v6847_v54 = vmul.f32 0.044715, %v6843_v35  ;;  %v6842_v5 = vmul.f32 %v6838_v3, %v6828_v4 }
 0xfaa   :  { %v6851_v39 = vadd.f32 %v6847_v54, %v6833_v51  ;;  %v6846_v14 = vmul.f32 0.044715, %v6842_v5  ;;  %v7565_v5 = vld [vmem:[#allocation8 + $0x258] ss:$0 sm:$0xff] }
 0xfac   :  { %v6855_v56 = vmul.f32 0.7978846, %v6851_v39  ;;  %v6850_v18 = vadd.f32 %v6846_v14, %v6828_v4 }
 0xfae   :  { %8524 = vtanh.f32 %v6855_v56  ;;  %v6854_v22 = vmul.f32 0.7978846, %v6850_v18 }
 0xfb0   :  { %8526 = vtanh.f32 %v6854_v22 }
 0xfbb   :  { %v8525_v25 = vpop.eup %8524 }
 0xfbc   :  { %v6863_v28 = vadd.f32 1.0, %v8525_v25 }
 0xfbd   :  { %v8527_v8 = vpop.eup %8526 }
 0xfbe   :  { %v6862_v31 = vadd.f32 1.0, %v8527_v8  ;;  %v6867_v63 = vmul.f32 0.5, %v6863_v28 }
 0xfc0   :  { %v6866_v16 = vmul.f32 0.5, %v6862_v31  ;;  %v6871_v13 = vmul.f32 %v6867_v63, %v6833_v51 }
 0xfc2   :  { %v6870_v33 = vmul.f32 %v6866_v16, %v6828_v4  ;;  %v7564_v4 = vld [vmem:[#allocation8 + $0x250] ss:$0 sm:$0xff] }
 0xfc4   :  { %8319 = vmatprep.mubr.msk.f32.mxu0 %vm3384_vm5, %v6870_v33 }
 0xfc5   :  { %8320 = vmatmul.mubr.msk.f32.gmra.mxu0 %vm3384_vm5, %v6871_v13 }
0x1054   :  { %v8318_v0 = vpop.f32.mrf.mxu0 }
0x1055   :  { %v6969_v34 = vadd.f32 %v8318_v0, %v7559_v38 }
0x1056   :  { %v6963_v32 = vpop.f32.mrf.mxu0 }
0x1057   :  { %v6983_v27 = vadd.f32 %v6969_v34, %v9701_v49  ;;  %v6964_v46 = vadd.f32 %v7559_v38, %v6963_v32 }
0x1059   :  { %v9725_v24 = vadd.f32 %v6964_v46, %v9699_v7  ;;  %v6991_v10 = vsel %vm67_vm0, %v6983_v27, 0.0  ;;  %v7005_v36 = vmul.f32 %v6983_v27, %v6983_v27 }
0x105a   :  { %6992 = vadd.xlane.f32.xlu0 %v6991_v10 }
0x105b   :  { %v6988_v30 = vsel %vm67_vm0, %v9725_v24, 0.0  ;;  %v7004_v47 = vmul.f32 %v9725_v24, %v9725_v24  ;;  %v7011_v12 = vsel %vm67_vm0, %v7005_v36, 0.0 }
0x105c   :  { %6989 = vadd.xlane.f32.xlu1 %v6988_v30 }
0x105d   :  { %v7008_v49 = vsel %vm67_vm0, %v7004_v47, 0.0 }
0x105e   :  { %7012 = vadd.xlane.f32.xlu0 %v7011_v12 }
0x1060   :  { %7009 = vadd.xlane.f32.xlu1 %v7008_v49 }
0x1085   :  { %v8321_v1 = vpop.f32.mrf.mxu0 }
0x1086   :  { %v6979_v7 = vadd.f32 %v8321_v1, %v7559_v38 }
0x1087   :  { %v6973_v57 = vpop.f32.mrf.mxu0 }
0x1088   :  { %v9735_v52 = vadd.f32 %v6979_v7, %v9711_v29  ;;  %v6974_v59 = vadd.f32 %v7559_v38, %v6973_v57 }
0x108a   :  { %v9738_v41 = vadd.f32 %v6974_v59, %v9709_v37  ;;  %v6997_v58 = vsel %vm67_vm0, %v9735_v52, 0.0  ;;  %v7007_v43 = vmul.f32 %v9735_v52, %v9735_v52 }
0x108b   :  { %6998 = vadd.xlane.f32.xlu0 %v6997_v58 }
0x108c   :  { %v6994_v2 = vsel %vm67_vm0, %v9738_v41, 0.0  ;;  %v7006_v6 = vmul.f32 %v9738_v41, %v9738_v41  ;;  %v7017_v29 = vsel %vm67_vm0, %v7007_v43, 0.0 }
0x108d   :  { %6995 = vadd.xlane.f32.xlu1 %v6994_v2  ;;  %v7568_v2 = vld [vmem:[#allocation8 + $0x288] ss:$0 sm:$0xff] }
0x108e   :  { %v7014_v37 = vsel %vm67_vm0, %v7006_v6, 0.0 }
0x108f   :  { %7018 = vadd.xlane.f32.xlu0 %v7017_v29 }
0x1091   :  { %7015 = vadd.xlane.f32.xlu1 %v7014_v37 }
0x10e3   :  { %v6993_v19 = vpop.xlane.xlu0 %6992 }
0x10e4   :  { %v7001_v9 = vmul.f32 0.03125, %v6993_v19 }
0x10e5   :  { %v6990_v11 = vpop.xlane.xlu1 %6989 }
0x10e6   :  { %v7000_v55 = vmul.f32 0.03125, %v6990_v11  ;;  %v7025_v48 = vmul.f32 %v7001_v9, %v7001_v9  ;;  %v7033_v42 = vsub.f32 %v6983_v27, %v7001_v9 }
0x10e7   :  { %v7013_v50 = vpop.xlane.xlu0 %7012 }
0x10e8   :  { %v7021_v53 = vmul.f32 0.03125, %v7013_v50  ;;  %v7024_v61 = vmul.f32 %v7000_v55, %v7000_v55  ;;  %v7032_v35 = vsub.f32 %v9725_v24, %v7000_v55 }
0x10e9   :  { %v7010_v20 = vpop.xlane.xlu1 %7009 }
0x10ea   :  { %v7029_v17 = vsub.f32 %v7021_v53, %v7025_v48  ;;  %v7020_v60 = vmul.f32 0.03125, %v7010_v20  ;;  %v7169_v20 = vlaneseq }
0x10ec   :  { %v7037_v44 = vadd.f32 1e-12, %v7029_v17  ;;  %v7028_v23 = vsub.f32 %v7020_v60, %v7024_v61  ;;  %v7170_v61 = vshrl.u32 %v7169_v20, 7 }
0x10ee   :  { %8528 = vrsqrt.f32 %v7037_v44  ;;  %v7036_v51 = vadd.f32 1e-12, %v7028_v23  ;;  %v7175_v23 = vadd.s32 1, %v7170_v61  ;;  %vm7277_vm8 = vcmp.eq.s32.totalorder %v7170_v61, 0 }
0x10ef   :  { %vm7281_vm9 = vcmp.eq.s32.totalorder %v7170_v61, 1 }
0x10f0   :  { %8530 = vrsqrt.f32 %v7036_v51  ;;  %v7279_v51 = vstv %s7278_s29 }
0x10fb   :  { %v8529_v62 = vpop.eup %8528 }
0x10fc   :  { %v7045_v3 = vmul.f32 %v8529_v62, %v7033_v42  ;;  %v7172_v42 = vand.u32 127, %v7169_v20  ;;  %v7173_v62 = vmul.u32 2, %v7170_v61 }
0x10fd   :  { %v8531_v54 = vpop.eup %8530 }
0x10fe   :  { %v7053_v39 = vmul.f32 %v7564_v4, %v7045_v3  ;;  %v7044_v14 = vmul.f32 %v8531_v54, %v7032_v35  ;;  %v7280_v35 = vsel %vm7277_vm8, %v7279_v51, 0  ;;  %v7283_v3 = vstv %s7573_s4 }
0x10ff   :  { %vm7174_vm10 = vcmp.ge.s32.totalorder %v7172_v42, %v7173_v62  ;;  %v7284_v54 = vsel %vm7281_vm9, %v7283_v3, %v7280_v35 }
0x1100   :  { %v7061_v56 = vadd.f32 %v7565_v5, %v7053_v39  ;;  %v7052_v18 = vmul.f32 %v7564_v4, %v7044_v14 }
0x1102   :  { %7065 = vst.msk [vmem:[#allocation2 + $0x8] sm:$0xff] %vm67_vm0, %v7061_v56  ;;  %v7060_v22 = vadd.f32 %v7565_v5, %v7052_v18 }
0x1104   :  { %7064 = vst.msk [vmem:[#allocation2] sm:$0xff] %vm67_vm0, %v7060_v22 }
0x1114   :  { %v6999_v25 = vpop.xlane.xlu0 %6998 }
0x1115   :  { %v7003_v28 = vmul.f32 0.03125, %v6999_v25 }
0x1116   :  { %v6996_v8 = vpop.xlane.xlu1 %6995 }
0x1117   :  { %v7002_v31 = vmul.f32 0.03125, %v6996_v8  ;;  %v7027_v16 = vmul.f32 %v7003_v28, %v7003_v28  ;;  %v7035_v24 = vsub.f32 %v9735_v52, %v7003_v28  ;;  %v7566_v52 = vld [vmem:[#allocation8 + $0x280] ss:$0 sm:$0xff] }
0x1118   :  { %v7019_v63 = vpop.xlane.xlu0 %7018 }
0x1119   :  { %v7023_v33 = vmul.f32 0.03125, %v7019_v63  ;;  %v7026_v38 = vmul.f32 %v7002_v31, %v7002_v31  ;;  %v7034_v36 = vsub.f32 %v9738_v41, %v7002_v31 }
0x111a   :  { %v7016_v13 = vpop.xlane.xlu1 %7015 }
0x111b   :  { %v7031_v0 = vsub.f32 %v7023_v33, %v7027_v16  ;;  %v7022_v34 = vmul.f32 0.03125, %v7016_v13 }
0x111d   :  { %v7039_v32 = vadd.f32 1e-12, %v7031_v0  ;;  %v7030_v27 = vsub.f32 %v7022_v34, %v7026_v38 }
0x111f   :  { %8532 = vrsqrt.f32 %v7039_v32  ;;  %v7038_v46 = vadd.f32 1e-12, %v7030_v27 }
0x1121   :  { %8534 = vrsqrt.f32 %v7038_v46 }
0x112c   :  { %v8533_v10 = vpop.eup %8532 }
0x112d   :  { %v7047_v30 = vmul.f32 %v8533_v10, %v7035_v24 }
0x112e   :  { %v8535_v47 = vpop.eup %8534 }
0x112f   :  { %v7055_v12 = vmul.f32 %v7564_v4, %v7047_v30  ;;  %v7046_v49 = vmul.f32 %v8535_v47, %v7034_v36 }
0x1131   :  { %v7063_v1 = vadd.f32 %v7565_v5, %v7055_v12  ;;  %v7054_v7 = vmul.f32 %v7564_v4, %v7046_v49  ;;  %v7176_v4 = vmul.u32 2, %v7175_v23 }
0x1133   :  { %7067 = vst.msk [vmem:[#allocation2 + $0x18] sm:$0xff] %vm67_vm0, %v7063_v1  ;;  %v7062_v57 = vadd.f32 %v7565_v5, %v7054_v7  ;;  %vm7177_vm11 = vcmp.lt.s32.totalorder %v7172_v42, %v7176_v4  ;;  %v7285_v5 = vadd.s32 %v7284_v54, %v7173_v62 }
0x1134   :  { %vm7178_vm12 = vmand %vm7174_vm10, %vm7177_vm11 }
0x1135   :  { %7066 = vst.msk [vmem:[#allocation2 + $0x10] sm:$0xff] %vm67_vm0, %v7062_v57  ;;  %v7570_v39 = vsel %vm7178_vm12, 1.0, %v9595_v45  ;;  %vm7286_vm15 = vcmp.eq.s32.totalorder %v7172_v42, %v7285_v5 }
0x1136   :  { %v7574_v56 = vsel %vm7286_vm15, 1.0, %v9595_v45 }
0x113c   :  { %v7069_v59 = vld [vmem:[#allocation2 + $0x7] ss:$8 sm:$0xf] }
0x113d   :  { %8331 = vmatmul.mubr.msk.f32.vlgmr.msra.gmra.mxu1 %vm67_vm0, %v7069_v59  ;;  %vm7366_vm0 = vcmask 1024  }
0x113e   :  { %8335 = vmatprep.mubr.msk.f32.mxu1 %vm8630_vm1, %v9595_v45 }
0x11fd   :  { %v7148_v58 = vpop.f32.mrf.mxu1 }
0x11fe   :  { %v7149_v41 = vadd.f32 %v7566_v52, %v7148_v58 }
0x11ff   :  { %v8332_v43 = vpop.f32.mrf.mxu1 }
0x1200   :  { %8536 = vtanh.f32 %v7149_v41 }
0x120d   :  { %v8537_v6 = vpop.eup %8536 }
0x120e   :  { %v7158_v29 = vmul.f32 %v8537_v6, %v7568_v2 }
0x1210   :  { %v7160_v37 = vsel %vm7159_vm6, %v7158_v29, 0.0 }
0x1211   :  { %7161 = vadd.xlane.f32.xlu1 %v7160_v37 }
0x129a   :  { %v7162_v40 = vpop.xlane.xlu1 %7161 }
0x129b   :  { %v7168_v15 = vadd.f32 %v7569_v21, %v7162_v40 }
0x129d   :  { %v7182_v26 = vsel %vm7181_vm7, %v7168_v15, -inf  ;;  %7381 = vst.msk [vmem:[#allocation10] sm:$0xf] %vm7181_vm7, %v7168_v15 }
0x129e   :  { %7183 = vmax.xlane.f32.xlu0 %v7182_v26 }
0x1327   :  { %v7184_v19 = vpop.xlane.xlu0 %7183 }
0x1328   :  { %v7185_v9 = vrot.slane %v7184_v19, 4 }
0x132a   :  { %v7186_v11 = vmax.f32 %v7184_v19, %v7185_v9 }
0x132c   :  { %v7187_v55 = vrot.slane %v7186_v11, 2 }
0x132e   :  { %v7188_v50 = vmax.f32 %v7186_v11, %v7187_v55 }
0x1330   :  { %v7189_v48 = vrot.slane %v7188_v50, 1 }
0x1332   :  { %v7190_v53 = vmax.f32 %v7188_v50, %v7189_v48 }
0x1334   :  { %8343 = vpush %v7190_v53 }
0x1365   :  { %s9764_s30 = spop %8343 }
0x1366   :  { %v7192_v17 = vstv %s9764_s30 }
0x1367   :  { %v7193_v60 = vsub.f32 %v7168_v15, %v7192_v17 }
0x1369   :  { %v7194_v44 = vmul.f32 1.442695, %v7193_v60 }
0x136b   :  { %8538 = vpow2.f32 %v7194_v44 }
0x1378   :  { %v8539_v14 = vpop.eup %8538 }
0x1379   :  { %8334 = vmatpush3.msk.msra.mxu1 %vm7200_vm13, %v8539_v14 }
0x137a   :  { %8336 = vmatmul.mubr.msk.f32.vlgmr.msra.gmra.mxu1 %vm7196_vm14, %v7570_v39  ;;  %8338 = vmatprep.subr.mxu1 %v9595_v45 }
0x137b   :  { %8339 = vmatpush3.msk.msra.mxu1 %vm7200_vm13, %v7168_v15  ;;  %8340 = vmatprep.mubr.msk.f32.mxu1 %vm8630_vm1, %v9595_v45  ;;  %vm7383_vm1 = vcmask 0  }
0x137e   :  { %8341 = vmatmul.mubr.msk.f32.vlgmr.msra.gmra.mxu1 %vm7196_vm14, %v7574_v56 }
0x143a   :  { %v7270_v18 = vpop.f32.mrf.mxu1 }
0x143b   :  { %8540 = vlog2.f32 %v7270_v18 }
0x143c   :  { %v8337_v22 = vpop.f32.mrf.mxu1 }
0x143e   :  { %v7361_v25 = vpop.f32.mrf.mxu1 }
0x1440   :  { %v8342_v28 = vpop.f32.mrf.mxu1 }
0x1448   :  { %v8541_v8 = vpop.eup %8540 }
0x1449   :  { %v7275_v31 = vmul.f32 0.6931472, %v8541_v8 }
0x144b   :  { %v7276_v63 = vadd.f32 %v7275_v31, %v7192_v17 }
0x144d   :  { %v7365_v16 = vsub.f32 %v7276_v63, %v7361_v25 }
0x144f   :  { %v7367_v33 = vsel %vm7366_vm0, %v7365_v16, 0.0 }
0x1450   :  { %7368 = vadd.xlane.f32.xlu1 %v7367_v33 }
0x14d9   :  { %v7369_v13 = vpop.xlane.xlu1 %7368 }
0x14da   :  { %v7370_v38 = vrot.slane %v7369_v13, 4 }
0x14dc   :  { %v7371_v0 = vadd.f32 %v7370_v38, %v7369_v13 }
0x14de   :  { %v7372_v34 = vrot.slane %v7371_v0, 2 }
0x14e0   :  { %v7373_v32 = vadd.f32 %v7372_v34, %v7371_v0 }
0x14e2   :  { %v7374_v27 = vrot.slane %v7373_v32, 1 }
0x14e4   :  { %v7375_v45 = vadd.f32 %v7374_v27, %v7373_v32 }
0x14e6   :  { %8345 = vpush %v7375_v45 }
0x1517   :  { %s8346_s7 = spop %8345 }
0x1518   :  { %s7379_s8 = smul.f32 0.5, %s8346_s7 }
0x151a   :  { %v7382_v46 = vstv %s7379_s8 }
0x151b   :  { %7384 = vst.msk [vmem:[#allocation10 + $0x4] sm:$0x1] %vm7383_vm1, %v7382_v46 }
0x151c   :  { %8607 = shalt.err (!%p8604_p0)
}
0x151d   :  { %7394 = dma.vmem_to_hbm [thread:$0]  %s7392_s6, 128, %s9778_s3, [#allocation5]  }
0x151e   :  { %8622 = dma.done.wait [#allocation5], 128  }
0x151f   :  { %8623 = vsyncadd [#allocation5], 4294967168 }
0x1520   :  { %7398 = vsyncpa [#allocation4], 1 }
0x1521   :  { %7399 = vsyncpa [#allocation9], 1 }
0x1522   :  { %7400 = vsyncpa [#allocation5], 1 }
0x1523   :  { %7401 = vsyncpa [#allocation6], 1 }

</bundles_post_ra>
